<compile_context>
chip_gen: v6e
topology: v6e:2x2x1
jax: 0.10.0
libtpu: 0.0.40
codegen_flags: <defaults>
</compile_context>

<pallas_src>
import functools

import jax
import jax.numpy as jnp
from jax.experimental import pallas as pl
from jax.experimental.pallas import tpu as pltpu


def _round_up(x, m):
    return (x + m - 1) // m * m


# --------------------------- Tiled GEMM kernel ------------------------------

def _mm_bias_kernel(a_ref, b_ref, bias_ref, o_ref, acc_ref, *, activation):
    @pl.when(pl.program_id(2) == 0)
    def _():
        acc_ref[...] = jnp.zeros_like(acc_ref)

    acc_ref[...] += jnp.dot(a_ref[...], b_ref[...],
                            preferred_element_type=jnp.float32)

    @pl.when(pl.program_id(2) == pl.num_programs(2) - 1)
    def _():
        r = acc_ref[...] + bias_ref[...]
        if activation == "relu":
            r = jnp.maximum(r, 0.0)
        o_ref[...] = r.astype(o_ref.dtype)


def matmul_bias(a, b, bias=None, activation="none",
                tm=256, tn=256, tk=512, out_dtype=jnp.float32):
    """(M,K) @ (K,N) + bias with optional fused ReLU.

    bf16 operands, f32 accumulation in VMEM scratch; M/N/K are padded so every
    block is (8/16,128)-aligned and the output store is lane-dense.
    """
    M, K = a.shape
    Kb, N = b.shape
    assert K == Kb
    if bias is None:
        bias = jnp.zeros((N,), jnp.float32)

    Mp = _round_up(M, 16)
    Np = _round_up(N, 128)
    Kp = _round_up(K, 128)
    tm = min(tm, Mp)
    tn = min(tn, Np)
    tk = min(tk, Kp)
    Mp = _round_up(Mp, tm)
    Np = _round_up(Np, tn)
    Kp = _round_up(Kp, tk)

    a_p = jnp.pad(a.astype(jnp.bfloat16), ((0, Mp - M), (0, Kp - K)))
    b_p = jnp.pad(b.astype(jnp.bfloat16), ((0, Kp - K), (0, Np - N)))
    bias_p = jnp.pad(bias.astype(jnp.float32), (0, Np - N)).reshape(1, Np)

    grid = (Mp // tm, Np // tn, Kp // tk)
    out = pl.pallas_call(
        functools.partial(_mm_bias_kernel, activation=activation),
        grid=grid,
        in_specs=[pl.BlockSpec((tm, tk), lambda i, j, k: (i, k)),
                  pl.BlockSpec((tk, tn), lambda i, j, k: (k, j)),
                  pl.BlockSpec((1, tn), lambda i, j, k: (0, j))],
        out_specs=pl.BlockSpec((tm, tn), lambda i, j, k: (i, j)),
        out_shape=jax.ShapeDtypeStruct((Mp, Np), out_dtype),
        scratch_shapes=[pltpu.VMEM((tm, tn), jnp.float32)],
        compiler_params=pltpu.CompilerParams(
            dimension_semantics=("parallel", "parallel", "arbitrary")),
    )(a_p, b_p, bias_p)
    return out[:M, :N]


# ------------------------------ Convolutions --------------------------------

def conv1x1(x, w, b, activation="none", out_dtype=jnp.float32):
    """1x1 conv == per-pixel linear layer -> straight to the tiled GEMM."""
    B, H, W, Cin = x.shape
    Cout = w.shape[-1]
    y = matmul_bias(x.reshape(B * H * W, Cin), w.reshape(Cin, Cout), b,
                    activation, out_dtype=out_dtype)
    return y.reshape(B, H, W, Cout)


def conv3x3(x, w, b, stride=1, activation="none", out_dtype=jnp.float32):
    """3x3 conv via bf16 im2col slab feeding the tiled GEMM."""
    # TODO(synk): the kh*kw taps could be folded into the GEMM's K grid axis
    # (shifted index_maps) to avoid materializing the im2col slab, but strided
    # window extraction isn't expressible with rectangular BlockSpecs; the
    # slab stays bf16 to keep the extra HBM traffic halved.
    B, H, W, Cin = x.shape
    kh, kw, _, Cout = w.shape
    pad = kh // 2
    xp = jnp.pad(x, ((0, 0), (pad, pad), (pad, pad), (0, 0))).astype(jnp.bfloat16)
    Ho = (H + 2 * pad - kh) // stride + 1
    Wo = (W + 2 * pad - kw) // stride + 1
    cols = [xp[:, i:i + stride * Ho:stride, j:j + stride * Wo:stride, :]
            for i in range(kh) for j in range(kw)]
    col = jnp.concatenate(cols, axis=-1).reshape(B * Ho * Wo, kh * kw * Cin)
    y = matmul_bias(col, w.reshape(kh * kw * Cin, Cout), b, activation,
                    out_dtype=out_dtype)
    return y.reshape(B, Ho, Wo, Cout)


# --------------------- Fused Mask2Former decoder kernel ----------------------

_DEC_WEIGHT_NAMES = (
    "ca_wq", "ca_wq_b", "ca_wkv", "ca_wkv_b", "ca_wo", "ca_wo_b",
    "ln1_g", "ln1_b",
    "sa_wqkv", "sa_wqkv_b", "sa_wo", "sa_wo_b",
    "ln2_g", "ln2_b",
    "ffn1_w", "ffn1_b", "ffn2_w", "ffn2_b",
    "ln3_g", "ln3_b",
    "cls_head_w", "cls_head_b",
    "me1_w", "me1_b", "me2_w", "me2_b",
)


def _decoder_kernel(*refs, nheads, hd):
    mem_ref, qe_ref = refs[0], refs[1]
    wref = dict(zip(_DEC_WEIGHT_NAMES, refs[2:2 + len(_DEC_WEIGHT_NAMES)]))
    labels_ref, membed_ref = refs[2 + len(_DEC_WEIGHT_NAMES):]

    f32, bf16 = jnp.float32, jnp.bfloat16
    dh = hd // nheads
    scale = 1.0 / float(dh) ** 0.5

    def mm(x, w, b=None, relu=False):
        y = jnp.dot(x.astype(bf16), w, preferred_element_type=f32)
        if b is not None:
            y = y + b
        if relu:
            y = jnp.maximum(y, 0.0)
        return y

    def layer_norm(x, g, b):
        mu = jnp.mean(x, axis=-1, keepdims=True)
        var = jnp.mean(jnp.square(x - mu), axis=-1, keepdims=True)
        return (x - mu) * jax.lax.rsqrt(var + 1e-5) * g + b

    def heads_attention(qp, kp, vp, wo, wo_b):
        # qp: (Lq, hd), kp/vp: (Lk, hd). Heads stay folded on the lane axis;
        # per-head outputs are accumulated straight through the output
        # projection (avoids lane-concat of tiny dh-wide slices).
        out = jnp.zeros((qp.shape[0], hd), f32) + wo_b
        for h in range(nheads):
            sl = slice(h * dh, (h + 1) * dh)
            s = jax.lax.dot_general(
                qp[:, sl].astype(bf16), kp[:, sl].astype(bf16),
                (((1,), (1,)), ((), ())), preferred_element_type=f32) * scale
            s = s - jnp.max(s, axis=-1, keepdims=True)
            p = jnp.exp(s)
            p = p * pl.reciprocal(jnp.sum(p, axis=-1, keepdims=True), approx=True)
            oh = jnp.dot(p.astype(bf16), vp[:, sl].astype(bf16),
                         preferred_element_type=f32)
            out = out + jnp.dot(oh.astype(bf16), wo[sl, :],
                                preferred_element_type=f32)
        return out

    mem = mem_ref[0]                      # (S, hd) bf16
    q = qe_ref[...].astype(f32)           # (nq, hd) f32 residual stream

    # ---- cross-attention: queries attend to flattened P3 memory ----
    qp = mm(q, wref["ca_wq"][...], wref["ca_wq_b"][...])
    kvp = mm(mem, wref["ca_wkv"][...], wref["ca_wkv_b"][...])
    ca = heads_attention(qp, kvp[:, :hd], kvp[:, hd:],
                         wref["ca_wo"][...], wref["ca_wo_b"][...])
    q = layer_norm(q + ca, wref["ln1_g"][...], wref["ln1_b"][...])

    # ---- self-attention over queries (fused QKV projection) ----
    qkv = mm(q, wref["sa_wqkv"][...], wref["sa_wqkv_b"][...])
    sa = heads_attention(qkv[:, :hd], qkv[:, hd:2 * hd], qkv[:, 2 * hd:],
                         wref["sa_wo"][...], wref["sa_wo_b"][...])
    q = layer_norm(q + sa, wref["ln2_g"][...], wref["ln2_b"][...])

    # ---- feed-forward ----
    ffn = mm(mm(q, wref["ffn1_w"][...], wref["ffn1_b"][...], relu=True),
             wref["ffn2_w"][...], wref["ffn2_b"][...])
    q = layer_norm(q + ffn, wref["ln3_g"][...], wref["ln3_b"][...])

    # ---- prediction heads (class head padded to 128 lanes) ----
    labels_ref[0] = mm(q, wref["cls_head_w"][...], wref["cls_head_b"][...])
    membed_ref[0] = mm(mm(q, wref["me1_w"][...], wref["me1_b"][...], relu=True),
                       wref["me2_w"][...], wref["me2_b"][...])


def run_decoder(params, mem, cfg):
    """mem: (B, S, hd) flattened P3 (bf16). Returns (pred_mask_labels, mask_embed)."""
    B, S, hd = mem.shape
    nq, nheads = cfg["num_queries"], cfg["nheads"]
    ncls = cfg["num_classes"] + 1
    ncls_pad = _round_up(ncls, 128)

    def as_mat(x):
        return x.astype(jnp.bfloat16)

    def as_row(x):
        return x.reshape(1, -1).astype(jnp.float32)

    wdict = {}
    for name in _DEC_WEIGHT_NAMES:
        arr = params[name]
        if name == "cls_head_w":
            wdict[name] = as_mat(jnp.pad(arr, ((0, 0), (0, ncls_pad - arr.shape[1]))))
        elif name == "cls_head_b":
            wdict[name] = as_row(jnp.pad(arr, (0, ncls_pad - arr.shape[0])))
        elif name.endswith("_b") or name.startswith("ln"):
            wdict[name] = as_row(arr)
        else:
            wdict[name] = as_mat(arr)

    inputs = [mem.astype(jnp.bfloat16), params["query_embed"].astype(jnp.float32)]
    in_specs = [pl.BlockSpec((1, S, hd), lambda b: (b, 0, 0)),
                pl.BlockSpec((nq, hd), lambda b: (0, 0))]
    for name in _DEC_WEIGHT_NAMES:
        arr = wdict[name]
        inputs.append(arr)
        in_specs.append(pl.BlockSpec(arr.shape, lambda b: (0, 0)))

    labels, membed = pl.pallas_call(
        functools.partial(_decoder_kernel, nheads=nheads, hd=hd),
        grid=(B,),
        in_specs=in_specs,
        out_specs=[pl.BlockSpec((1, nq, ncls_pad), lambda b: (b, 0, 0)),
                   pl.BlockSpec((1, nq, hd), lambda b: (b, 0, 0))],
        out_shape=[jax.ShapeDtypeStruct((B, nq, ncls_pad), jnp.float32),
                   jax.ShapeDtypeStruct((B, nq, hd), jnp.float32)],
        compiler_params=pltpu.CompilerParams(dimension_semantics=("parallel",)),
    )(*inputs)
    return labels[:, :, :ncls], membed


# ------------------- Query->mask einsum (no HBM transpose) -------------------

def _mask_matmul_kernel(me_ref, feat_ref, o_ref):
    # (nq, hd) x (tn, hd) contracted on hd -> (nq, tn); MXU does the transpose.
    o_ref[0] = jax.lax.dot_general(
        me_ref[0], feat_ref[0], (((1,), (1,)), ((), ())),
        preferred_element_type=jnp.float32)


def query_mask_matmul(mask_embed, feat, tn=512):
    """mask_embed: (B, nq, hd); feat: (B, HW, hd) -> (B, nq, HW)."""
    B, nq, hd = mask_embed.shape
    HW = feat.shape[1]
    HWp = _round_up(HW, 128)
    tn = min(tn, HWp)
    HWp = _round_up(HWp, tn)

    feat_p = jnp.pad(feat.astype(jnp.bfloat16), ((0, 0), (0, HWp - HW), (0, 0)))
    me = mask_embed.astype(jnp.bfloat16)

    out = pl.pallas_call(
        _mask_matmul_kernel,
        grid=(B, HWp // tn),
        in_specs=[pl.BlockSpec((1, nq, hd), lambda b, n: (b, 0, 0)),
                  pl.BlockSpec((1, tn, hd), lambda b, n: (b, n, 0))],
        out_specs=pl.BlockSpec((1, nq, tn), lambda b, n: (b, 0, n)),
        out_shape=jax.ShapeDtypeStruct((B, nq, HWp), jnp.float32),
        compiler_params=pltpu.CompilerParams(
            dimension_semantics=("parallel", "parallel")),
    )(me, feat_p)
    return out[:, :, :HW]


# ------------------------------ Parameters ----------------------------------

def init_params(key, cfg):
    hd, C, A = cfg["hidden_dim"], cfg["num_classes"], cfg["num_anchors"]
    nq, ff = cfg["num_queries"], cfg["dim_feedforward"]
    ks = iter(jax.random.split(key, 64))

    def w(shape, scale=0.05):
        return scale * jax.random.normal(next(ks), shape, jnp.float32)

    def z(n):
        return jnp.zeros((n,), jnp.float32)

    p = {}
    # EFPN backbone + FPN
    p["stem_w"], p["stem_b"] = w((3, 3, 3, 16)), z(16)
    p["c2_w"], p["c2_b"] = w((3, 3, 16, 32)), z(32)
    p["c3_w"], p["c3_b"] = w((3, 3, 32, 64)), z(64)
    p["lat2_w"], p["lat2_b"] = w((1, 1, 32, hd)), z(hd)
    p["lat3_w"], p["lat3_b"] = w((1, 1, 64, hd)), z(hd)
    p["sm2_w"], p["sm2_b"] = w((3, 3, hd, hd)), z(hd)
    p["sm3_w"], p["sm3_b"] = w((3, 3, hd, hd)), z(hd)
    p["box_w"], p["box_b"] = w((1, 1, hd, A * 4)), z(A * 4)
    p["cls_w"], p["cls_b"] = w((1, 1, hd, A * C)), z(A * C)
    # Mask2Former decoder (dec_layers = 1) -- QKV projections already fused.
    p["query_embed"] = w((nq, hd), 1.0)
    p["ca_wq"], p["ca_wq_b"] = w((hd, hd)), z(hd)
    p["ca_wkv"], p["ca_wkv_b"] = w((hd, 2 * hd)), z(2 * hd)
    p["ca_wo"], p["ca_wo_b"] = w((hd, hd)), z(hd)
    p["sa_wqkv"], p["sa_wqkv_b"] = w((hd, 3 * hd)), z(3 * hd)
    p["sa_wo"], p["sa_wo_b"] = w((hd, hd)), z(hd)
    for i in (1, 2, 3):
        p[f"ln{i}_g"] = jnp.ones((hd,), jnp.float32)
        p[f"ln{i}_b"] = z(hd)
    p["ffn1_w"], p["ffn1_b"] = w((hd, ff)), z(ff)
    p["ffn2_w"], p["ffn2_b"] = w((ff, hd)), z(hd)
    p["cls_head_w"], p["cls_head_b"] = w((hd, C + 1)), z(C + 1)
    p["me1_w"], p["me1_b"] = w((hd, hd)), z(hd)
    p["me2_w"], p["me2_b"] = w((hd, hd)), z(hd)
    return p


# ------------------------------- Forward pass --------------------------------

def extended_mask2former_forward(params, image_nchw, masks, cfg):
    hd = cfg["hidden_dim"]
    A, C, nq = cfg["num_anchors"], cfg["num_classes"], cfg["num_queries"]
    bf16 = jnp.bfloat16

    # Layout: PyTorch NCHW -> NHWC for TPU kernels.
    x = jnp.transpose(image_nchw, (0, 2, 3, 1)).astype(jnp.float32)

    # ---- EFPN: backbone convs + FPN lateral/top-down + detection heads ----
    # Intermediate activations stay bf16: every consumer is a bf16 GEMM, so
    # this halves HBM bytes on the mem-bound conv stages.
    c1 = conv3x3(x, params["stem_w"], params["stem_b"], stride=2,
                 activation="relu", out_dtype=bf16)
    c2 = conv3x3(c1, params["c2_w"], params["c2_b"], stride=2,
                 activation="relu", out_dtype=bf16)
    c3 = conv3x3(c2, params["c3_w"], params["c3_b"], stride=2,
                 activation="relu", out_dtype=bf16)

    p3 = conv1x1(c3, params["lat3_w"], params["lat3_b"], out_dtype=bf16)
    p2 = conv1x1(c2, params["lat2_w"], params["lat2_b"], out_dtype=bf16)
    p3_up = jnp.repeat(jnp.repeat(p3, 2, axis=1), 2, axis=2)   # nearest 2x upsample
    p2 = conv3x3(p2 + p3_up, params["sm2_w"], params["sm2_b"], stride=1,
                 out_dtype=bf16)
    p3 = conv3x3(p3, params["sm3_w"], params["sm3_b"], stride=1,
                 out_dtype=bf16)

    B, H3, W3, _ = p3.shape
    # Fused box + class heads: one lane-dense 1x1-conv GEMM, split afterwards.
    wbc = jnp.concatenate([params["box_w"].reshape(hd, A * 4),
                           params["cls_w"].reshape(hd, A * C)], axis=1)
    bbc = jnp.concatenate([params["box_b"], params["cls_b"]])
    bc = matmul_bias(p3.reshape(B * H3 * W3, hd), wbc, bbc)
    bounding_box = bc[:, :A * 4].reshape(B, H3 * W3 * A, 4)
    class_scores = bc[:, A * 4:].reshape(B, H3 * W3 * A, C)

    # ---- Mask2Former: fused query decoder over flattened P3 ----
    # TODO(synk): EFPN / Mask2Former source not provided; the `masks` argument's
    # role inside the reference Mask2Former is unspecified, so it is accepted
    # but unused here.
    mem = p3.reshape(B, H3 * W3, hd)
    pred_mask_labels, mask_embed = run_decoder(params, mem, cfg)

    # ---- masks: query embeddings x P2 features (channel-contraction kernel) ----
    _, H2, W2, _ = p2.shape
    feat = p2.reshape(B, H2 * W2, hd)                     # channels stay on lanes
    pred_masks = query_mask_matmul(mask_embed, feat).reshape(B, nq, H2, W2)

    return {
        "pred_masks": pred_masks,              # (B, num_queries, H2, W2)
        "pred_mask_labels": pred_mask_labels,  # (B, num_queries, num_classes+1)
        "bounding_box": bounding_box,          # (B, H3*W3*num_anchors, 4)
        "class_scores": class_scores,          # (B, H3*W3*num_anchors, num_classes)
    }


# ---------------------------------- Main -------------------------------------

if __name__ == "__main__":
    cfg = dict(hidden_dim=32, num_classes=4, num_anchors=3, num_queries=8,
               nheads=4, dim_feedforward=64, dec_layers=1, mask_dim=8)

    key = jax.random.PRNGKey(0)
    kp, ki, km = jax.random.split(key, 3)
    params = init_params(kp, cfg)

    image = jax.random.normal(ki, (2, 3, 32, 32), jnp.float32)      # NCHW, like PyTorch
    masks = (jax.random.uniform(km, (2, cfg["num_queries"], 8, 8)) > 0.5).astype(jnp.float32)

    fwd = jax.jit(functools.partial(extended_mask2former_forward, cfg=cfg))
    out = fwd(params, image, masks)
    for v in out.values():
        jax.block_until_ready(v)
    print("KERNEL_OK")
</pallas_src>

<mosaic_0001>
module attributes {stable_mosaic.version = 11 : i64} {
  func.func @_mm_bias_kernel(%arg0: i32, %arg1: i32, %arg2: i32, %arg3: memref<256x128xbf16, #tpu.memory_space<vmem>>, %arg4: memref<128x128xbf16, #tpu.memory_space<vmem>>, %arg5: memref<1x128xf32, #tpu.memory_space<vmem>>, %arg6: memref<256x128xbf16, #tpu.memory_space<vmem>>, %arg7: memref<256x128xf32, #tpu.memory_space<vmem>>) attributes {dimension_semantics = [#tpu.dimension_semantics<parallel>, #tpu.dimension_semantics<parallel>, #tpu.dimension_semantics<arbitrary>], iteration_bounds = array<i64: 2, 1, 1>, scalar_prefetch = 0 : i64, scratch_operands = 1 : i64, tpu.core_type = #tpu.core_type<tc>, window_params = [{transform_indices = @transform_0, window_bounds = array<i64: 256, 128>}, {transform_indices = @transform_1, window_bounds = array<i64: 128, 128>}, {transform_indices = @transform_2, window_bounds = array<i64: 1, 128>}, {transform_indices = @transform_3, window_bounds = array<i64: 256, 128>}]} {
    %c0_i32 = arith.constant 0 : i32
    %0 = arith.cmpi eq, %arg2, %c0_i32 : i32
    %1 = arith.extui %0 : i1 to i32
    %c0_i32_0 = arith.constant 0 : i32
    %2 = arith.cmpi ne, %1, %c0_i32_0 : i32
    scf.if %2 {
      %cst_10 = arith.constant 0.000000e+00 : f32
      %12 = vector.broadcast %cst_10 : f32 to vector<256x128xf32>
      %c0_11 = arith.constant 0 : index
      %c0_12 = arith.constant 0 : index
      %13 = vector.load %arg7[%c0_11, %c0_12] : memref<256x128xf32, #tpu.memory_space<vmem>>, vector<256x128xf32>
      tpu.vector_store %arg7[%c0_11, %c0_12], %12 {strides = array<i32>} : memref<256x128xf32, #tpu.memory_space<vmem>>, vector<256x128xf32>,
    } else {
    }
    %c0 = arith.constant 0 : index
    %c0_1 = arith.constant 0 : index
    %3 = vector.load %arg7[%c0, %c0_1] : memref<256x128xf32, #tpu.memory_space<vmem>>, vector<256x128xf32>
    %c0_2 = arith.constant 0 : index
    %c0_3 = arith.constant 0 : index
    %4 = vector.load %arg3[%c0_2, %c0_3] : memref<256x128xbf16, #tpu.memory_space<vmem>>, vector<256x128xbf16>
    %c0_4 = arith.constant 0 : index
    %c0_5 = arith.constant 0 : index
    %5 = vector.load %arg4[%c0_4, %c0_5] : memref<128x128xbf16, #tpu.memory_space<vmem>>, vector<128x128xbf16>
    %cst = arith.constant dense<0.000000e+00> : vector<256x128xf32>
    %6 = tpu.matmul %4, %5, %cst {dimension_numbers = #tpu.dot_dimension_numbers<[1], [0], [0], [1], [0, 0, 1, 1], [], []>} : vector<256x128xbf16>, vector<128x128xbf16>, vector<256x128xf32> -> vector<256x128xf32>
    %7 = arith.addf %3, %6 : vector<256x128xf32>
    %c0_6 = arith.constant 0 : index
    %c0_7 = arith.constant 0 : index
    %8 = vector.load %arg7[%c0_6, %c0_7] : memref<256x128xf32, #tpu.memory_space<vmem>>, vector<256x128xf32>
    tpu.vector_store %arg7[%c0_6, %c0_7], %7 {strides = array<i32>} : memref<256x128xf32, #tpu.memory_space<vmem>>, vector<256x128xf32>,
    %c0_i32_8 = arith.constant 0 : i32
    %9 = arith.cmpi eq, %arg2, %c0_i32_8 : i32
    %10 = arith.extui %9 : i1 to i32
    %c0_i32_9 = arith.constant 0 : i32
    %11 = arith.cmpi ne, %10, %c0_i32_9 : i32
    scf.if %11 {
      %c0_10 = arith.constant 0 : index
      %c0_11 = arith.constant 0 : index
      %12 = vector.load %arg7[%c0_10, %c0_11] : memref<256x128xf32, #tpu.memory_space<vmem>>, vector<256x128xf32>
      %c0_12 = arith.constant 0 : index
      %c0_13 = arith.constant 0 : index
      %13 = vector.load %arg5[%c0_12, %c0_13] : memref<1x128xf32, #tpu.memory_space<vmem>>, vector<1x128xf32>
      %14 = vector.broadcast %13 : vector<1x128xf32> to vector<256x128xf32>
      %15 = arith.addf %12, %14 : vector<256x128xf32>
      %cst_14 = arith.constant 0.000000e+00 : f32
      %16 = vector.broadcast %cst_14 : f32 to vector<256x128xf32>
      %17 = arith.maximumf %15, %16 : vector<256x128xf32>
      %18 = arith.truncf %17 : vector<256x128xf32> to vector<256x128xbf16>
      %c0_15 = arith.constant 0 : index
      %c0_16 = arith.constant 0 : index
      %19 = vector.load %arg6[%c0_15, %c0_16] : memref<256x128xbf16, #tpu.memory_space<vmem>>, vector<256x128xbf16>
      tpu.vector_store %arg6[%c0_15, %c0_16], %18 {strides = array<i32>} : memref<256x128xbf16, #tpu.memory_space<vmem>>, vector<256x128xbf16>,
    } else {
    }
    return
  }
  func.func @transform_0(%arg0: i32, %arg1: i32, %arg2: i32) -> (i32, i32) {
    %c0_i32 = arith.constant 0 : i32
    return %arg0, %arg2 : i32, i32
  }
  func.func @transform_1(%arg0: i32, %arg1: i32, %arg2: i32) -> (i32, i32) {
    %c0_i32 = arith.constant 0 : i32
    return %arg2, %arg1 : i32, i32
  }
  func.func @transform_2(%arg0: i32, %arg1: i32, %arg2: i32) -> (i32, i32) {
    %c0_i32 = arith.constant 0 : i32
    %c0_i32_0 = arith.constant 0 : i32
    return %c0_i32, %arg1 : i32, i32
  }
  func.func @transform_3(%arg0: i32, %arg1: i32, %arg2: i32) -> (i32, i32) {
    %c0_i32 = arith.constant 0 : i32
    return %arg0, %arg1 : i32, i32
  }
}

module attributes {stable_mosaic.version = 11 : i64} {
  func.func @_mm_bias_kernel(%arg0: i32, %arg1: i32, %arg2: i32, %arg3: memref<128x256xbf16, #tpu.memory_space<vmem>>, %arg4: memref<256x128xbf16, #tpu.memory_space<vmem>>, %arg5: memref<1x128xf32, #tpu.memory_space<vmem>>, %arg6: memref<128x128xbf16, #tpu.memory_space<vmem>>, %arg7: memref<128x128xf32, #tpu.memory_space<vmem>>) attributes {dimension_semantics = [#tpu.dimension_semantics<parallel>, #tpu.dimension_semantics<parallel>, #tpu.dimension_semantics<arbitrary>], iteration_bounds = array<i64: 1, 1, 1>, scalar_prefetch = 0 : i64, scratch_operands = 1 : i64, tpu.core_type = #tpu.core_type<tc>, window_params = [{transform_indices = @transform_0, window_bounds = array<i64: 128, 256>}, {transform_indices = @transform_1, window_bounds = array<i64: 256, 128>}, {transform_indices = @transform_2, window_bounds = array<i64: 1, 128>}, {transform_indices = @transform_3, window_bounds = array<i64: 128, 128>}]} {
    %c0_i32 = arith.constant 0 : i32
    %0 = arith.cmpi eq, %arg2, %c0_i32 : i32
    %1 = arith.extui %0 : i1 to i32
    %c0_i32_0 = arith.constant 0 : i32
    %2 = arith.cmpi ne, %1, %c0_i32_0 : i32
    scf.if %2 {
      %cst_10 = arith.constant 0.000000e+00 : f32
      %12 = vector.broadcast %cst_10 : f32 to vector<128x128xf32>
      %c0_11 = arith.constant 0 : index
      %c0_12 = arith.constant 0 : index
      %13 = vector.load %arg7[%c0_11, %c0_12] : memref<128x128xf32, #tpu.memory_space<vmem>>, vector<128x128xf32>
      tpu.vector_store %arg7[%c0_11, %c0_12], %12 {strides = array<i32>} : memref<128x128xf32, #tpu.memory_space<vmem>>, vector<128x128xf32>,
    } else {
    }
    %c0 = arith.constant 0 : index
    %c0_1 = arith.constant 0 : index
    %3 = vector.load %arg7[%c0, %c0_1] : memref<128x128xf32, #tpu.memory_space<vmem>>, vector<128x128xf32>
    %c0_2 = arith.constant 0 : index
    %c0_3 = arith.constant 0 : index
    %4 = vector.load %arg3[%c0_2, %c0_3] : memref<128x256xbf16, #tpu.memory_space<vmem>>, vector<128x256xbf16>
    %c0_4 = arith.constant 0 : index
    %c0_5 = arith.constant 0 : index
    %5 = vector.load %arg4[%c0_4, %c0_5] : memref<256x128xbf16, #tpu.memory_space<vmem>>, vector<256x128xbf16>
    %cst = arith.constant dense<0.000000e+00> : vector<128x128xf32>
    %6 = tpu.matmul %4, %5, %cst {dimension_numbers = #tpu.dot_dimension_numbers<[1], [0], [0], [1], [0, 0, 1, 1], [], []>} : vector<128x256xbf16>, vector<256x128xbf16>, vector<128x128xf32> -> vector<128x128xf32>
    %7 = arith.addf %3, %6 : vector<128x128xf32>
    %c0_6 = arith.constant 0 : index
    %c0_7 = arith.constant 0 : index
    %8 = vector.load %arg7[%c0_6, %c0_7] : memref<128x128xf32, #tpu.memory_space<vmem>>, vector<128x128xf32>
    tpu.vector_store %arg7[%c0_6, %c0_7], %7 {strides = array<i32>} : memref<128x128xf32, #tpu.memory_space<vmem>>, vector<128x128xf32>,
    %c0_i32_8 = arith.constant 0 : i32
    %9 = arith.cmpi eq, %arg2, %c0_i32_8 : i32
    %10 = arith.extui %9 : i1 to i32
    %c0_i32_9 = arith.constant 0 : i32
    %11 = arith.cmpi ne, %10, %c0_i32_9 : i32
    scf.if %11 {
      %c0_10 = arith.constant 0 : index
      %c0_11 = arith.constant 0 : index
      %12 = vector.load %arg7[%c0_10, %c0_11] : memref<128x128xf32, #tpu.memory_space<vmem>>, vector<128x128xf32>
      %c0_12 = arith.constant 0 : index
      %c0_13 = arith.constant 0 : index
      %13 = vector.load %arg5[%c0_12, %c0_13] : memref<1x128xf32, #tpu.memory_space<vmem>>, vector<1x128xf32>
      %14 = vector.broadcast %13 : vector<1x128xf32> to vector<128x128xf32>
      %15 = arith.addf %12, %14 : vector<128x128xf32>
      %cst_14 = arith.constant 0.000000e+00 : f32
      %16 = vector.broadcast %cst_14 : f32 to vector<128x128xf32>
      %17 = arith.maximumf %15, %16 : vector<128x128xf32>
      %18 = arith.truncf %17 : vector<128x128xf32> to vector<128x128xbf16>
      %c0_15 = arith.constant 0 : index
      %c0_16 = arith.constant 0 : index
      %19 = vector.load %arg6[%c0_15, %c0_16] : memref<128x128xbf16, #tpu.memory_space<vmem>>, vector<128x128xbf16>
      tpu.vector_store %arg6[%c0_15, %c0_16], %18 {strides = array<i32>} : memref<128x128xbf16, #tpu.memory_space<vmem>>, vector<128x128xbf16>,
    } else {
    }
    return
  }
  func.func @transform_0(%arg0: i32, %arg1: i32, %arg2: i32) -> (i32, i32) {
    %c0_i32 = arith.constant 0 : i32
    return %arg0, %arg2 : i32, i32
  }
  func.func @transform_1(%arg0: i32, %arg1: i32, %arg2: i32) -> (i32, i32) {
    %c0_i32 = arith.constant 0 : i32
    return %arg2, %arg1 : i32, i32
  }
  func.func @transform_2(%arg0: i32, %arg1: i32, %arg2: i32) -> (i32, i32) {
    %c0_i32 = arith.constant 0 : i32
    %c0_i32_0 = arith.constant 0 : i32
    return %c0_i32, %arg1 : i32, i32
  }
  func.func @transform_3(%arg0: i32, %arg1: i32, %arg2: i32) -> (i32, i32) {
    %c0_i32 = arith.constant 0 : i32
    return %arg0, %arg1 : i32, i32
  }
}

module attributes {stable_mosaic.version = 11 : i64} {
  func.func @_mm_bias_kernel(%arg0: i32, %arg1: i32, %arg2: i32, %arg3: memref<32x384xbf16, #tpu.memory_space<vmem>>, %arg4: memref<384x128xbf16, #tpu.memory_space<vmem>>, %arg5: memref<1x128xf32, #tpu.memory_space<vmem>>, %arg6: memref<32x128xbf16, #tpu.memory_space<vmem>>, %arg7: memref<32x128xf32, #tpu.memory_space<vmem>>) attributes {dimension_semantics = [#tpu.dimension_semantics<parallel>, #tpu.dimension_semantics<parallel>, #tpu.dimension_semantics<arbitrary>], iteration_bounds = array<i64: 1, 1, 1>, scalar_prefetch = 0 : i64, scratch_operands = 1 : i64, tpu.core_type = #tpu.core_type<tc>, window_params = [{transform_indices = @transform_0, window_bounds = array<i64: 32, 384>}, {transform_indices = @transform_1, window_bounds = array<i64: 384, 128>}, {transform_indices = @transform_2, window_bounds = array<i64: 1, 128>}, {transform_indices = @transform_3, window_bounds = array<i64: 32, 128>}]} {
    %c0_i32 = arith.constant 0 : i32
    %0 = arith.cmpi eq, %arg2, %c0_i32 : i32
    %1 = arith.extui %0 : i1 to i32
    %c0_i32_0 = arith.constant 0 : i32
    %2 = arith.cmpi ne, %1, %c0_i32_0 : i32
    scf.if %2 {
      %cst_10 = arith.constant 0.000000e+00 : f32
      %12 = vector.broadcast %cst_10 : f32 to vector<32x128xf32>
      %c0_11 = arith.constant 0 : index
      %c0_12 = arith.constant 0 : index
      %13 = vector.load %arg7[%c0_11, %c0_12] : memref<32x128xf32, #tpu.memory_space<vmem>>, vector<32x128xf32>
      tpu.vector_store %arg7[%c0_11, %c0_12], %12 {strides = array<i32>} : memref<32x128xf32, #tpu.memory_space<vmem>>, vector<32x128xf32>,
    } else {
    }
    %c0 = arith.constant 0 : index
    %c0_1 = arith.constant 0 : index
    %3 = vector.load %arg7[%c0, %c0_1] : memref<32x128xf32, #tpu.memory_space<vmem>>, vector<32x128xf32>
    %c0_2 = arith.constant 0 : index
    %c0_3 = arith.constant 0 : index
    %4 = vector.load %arg3[%c0_2, %c0_3] : memref<32x384xbf16, #tpu.memory_space<vmem>>, vector<32x384xbf16>
    %c0_4 = arith.constant 0 : index
    %c0_5 = arith.constant 0 : index
    %5 = vector.load %arg4[%c0_4, %c0_5] : memref<384x128xbf16, #tpu.memory_space<vmem>>, vector<384x128xbf16>
    %cst = arith.constant dense<0.000000e+00> : vector<32x128xf32>
    %6 = tpu.matmul %4, %5, %cst {dimension_numbers = #tpu.dot_dimension_numbers<[1], [0], [0], [1], [0, 0, 1, 1], [], []>} : vector<32x384xbf16>, vector<384x128xbf16>, vector<32x128xf32> -> vector<32x128xf32>
    %7 = arith.addf %3, %6 : vector<32x128xf32>
    %c0_6 = arith.constant 0 : index
    %c0_7 = arith.constant 0 : index
    %8 = vector.load %arg7[%c0_6, %c0_7] : memref<32x128xf32, #tpu.memory_space<vmem>>, vector<32x128xf32>
    tpu.vector_store %arg7[%c0_6, %c0_7], %7 {strides = array<i32>} : memref<32x128xf32, #tpu.memory_space<vmem>>, vector<32x128xf32>,
    %c0_i32_8 = arith.constant 0 : i32
    %9 = arith.cmpi eq, %arg2, %c0_i32_8 : i32
    %10 = arith.extui %9 : i1 to i32
    %c0_i32_9 = arith.constant 0 : i32
    %11 = arith.cmpi ne, %10, %c0_i32_9 : i32
    scf.if %11 {
      %c0_10 = arith.constant 0 : index
      %c0_11 = arith.constant 0 : index
      %12 = vector.load %arg7[%c0_10, %c0_11] : memref<32x128xf32, #tpu.memory_space<vmem>>, vector<32x128xf32>
      %c0_12 = arith.constant 0 : index
      %c0_13 = arith.constant 0 : index
      %13 = vector.load %arg5[%c0_12, %c0_13] : memref<1x128xf32, #tpu.memory_space<vmem>>, vector<1x128xf32>
      %14 = vector.broadcast %13 : vector<1x128xf32> to vector<32x128xf32>
      %15 = arith.addf %12, %14 : vector<32x128xf32>
      %cst_14 = arith.constant 0.000000e+00 : f32
      %16 = vector.broadcast %cst_14 : f32 to vector<32x128xf32>
      %17 = arith.maximumf %15, %16 : vector<32x128xf32>
      %18 = arith.truncf %17 : vector<32x128xf32> to vector<32x128xbf16>
      %c0_15 = arith.constant 0 : index
      %c0_16 = arith.constant 0 : index
      %19 = vector.load %arg6[%c0_15, %c0_16] : memref<32x128xbf16, #tpu.memory_space<vmem>>, vector<32x128xbf16>
      tpu.vector_store %arg6[%c0_15, %c0_16], %18 {strides = array<i32>} : memref<32x128xbf16, #tpu.memory_space<vmem>>, vector<32x128xbf16>,
    } else {
    }
    return
  }
  func.func @transform_0(%arg0: i32, %arg1: i32, %arg2: i32) -> (i32, i32) {
    %c0_i32 = arith.constant 0 : i32
    return %arg0, %arg2 : i32, i32
  }
  func.func @transform_1(%arg0: i32, %arg1: i32, %arg2: i32) -> (i32, i32) {
    %c0_i32 = arith.constant 0 : i32
    return %arg2, %arg1 : i32, i32
  }
  func.func @transform_2(%arg0: i32, %arg1: i32, %arg2: i32) -> (i32, i32) {
    %c0_i32 = arith.constant 0 : i32
    %c0_i32_0 = arith.constant 0 : i32
    return %c0_i32, %arg1 : i32, i32
  }
  func.func @transform_3(%arg0: i32, %arg1: i32, %arg2: i32) -> (i32, i32) {
    %c0_i32 = arith.constant 0 : i32
    return %arg0, %arg1 : i32, i32
  }
}

module attributes {stable_mosaic.version = 11 : i64} {
  func.func @_mm_bias_kernel(%arg0: i32, %arg1: i32, %arg2: i32, %arg3: memref<32x128xbf16, #tpu.memory_space<vmem>>, %arg4: memref<128x128xbf16, #tpu.memory_space<vmem>>, %arg5: memref<1x128xf32, #tpu.memory_space<vmem>>, %arg6: memref<32x128xbf16, #tpu.memory_space<vmem>>, %arg7: memref<32x128xf32, #tpu.memory_space<vmem>>) attributes {dimension_semantics = [#tpu.dimension_semantics<parallel>, #tpu.dimension_semantics<parallel>, #tpu.dimension_semantics<arbitrary>], iteration_bounds = array<i64: 1, 1, 1>, scalar_prefetch = 0 : i64, scratch_operands = 1 : i64, tpu.core_type = #tpu.core_type<tc>, window_params = [{transform_indices = @transform_0, window_bounds = array<i64: 32, 128>}, {transform_indices = @transform_1, window_bounds = array<i64: 128, 128>}, {transform_indices = @transform_2, window_bounds = array<i64: 1, 128>}, {transform_indices = @transform_3, window_bounds = array<i64: 32, 128>}]} {
    %c0_i32 = arith.constant 0 : i32
    %0 = arith.cmpi eq, %arg2, %c0_i32 : i32
    %1 = arith.extui %0 : i1 to i32
    %c0_i32_0 = arith.constant 0 : i32
    %2 = arith.cmpi ne, %1, %c0_i32_0 : i32
    scf.if %2 {
      %cst_10 = arith.constant 0.000000e+00 : f32
      %12 = vector.broadcast %cst_10 : f32 to vector<32x128xf32>
      %c0_11 = arith.constant 0 : index
      %c0_12 = arith.constant 0 : index
      %13 = vector.load %arg7[%c0_11, %c0_12] : memref<32x128xf32, #tpu.memory_space<vmem>>, vector<32x128xf32>
      tpu.vector_store %arg7[%c0_11, %c0_12], %12 {strides = array<i32>} : memref<32x128xf32, #tpu.memory_space<vmem>>, vector<32x128xf32>,
    } else {
    }
    %c0 = arith.constant 0 : index
    %c0_1 = arith.constant 0 : index
    %3 = vector.load %arg7[%c0, %c0_1] : memref<32x128xf32, #tpu.memory_space<vmem>>, vector<32x128xf32>
    %c0_2 = arith.constant 0 : index
    %c0_3 = arith.constant 0 : index
    %4 = vector.load %arg3[%c0_2, %c0_3] : memref<32x128xbf16, #tpu.memory_space<vmem>>, vector<32x128xbf16>
    %c0_4 = arith.constant 0 : index
    %c0_5 = arith.constant 0 : index
    %5 = vector.load %arg4[%c0_4, %c0_5] : memref<128x128xbf16, #tpu.memory_space<vmem>>, vector<128x128xbf16>
    %cst = arith.constant dense<0.000000e+00> : vector<32x128xf32>
    %6 = tpu.matmul %4, %5, %cst {dimension_numbers = #tpu.dot_dimension_numbers<[1], [0], [0], [1], [0, 0, 1, 1], [], []>} : vector<32x128xbf16>, vector<128x128xbf16>, vector<32x128xf32> -> vector<32x128xf32>
    %7 = arith.addf %3, %6 : vector<32x128xf32>
    %c0_6 = arith.constant 0 : index
    %c0_7 = arith.constant 0 : index
    %8 = vector.load %arg7[%c0_6, %c0_7] : memref<32x128xf32, #tpu.memory_space<vmem>>, vector<32x128xf32>
    tpu.vector_store %arg7[%c0_6, %c0_7], %7 {strides = array<i32>} : memref<32x128xf32, #tpu.memory_space<vmem>>, vector<32x128xf32>,
    %c0_i32_8 = arith.constant 0 : i32
    %9 = arith.cmpi eq, %arg2, %c0_i32_8 : i32
    %10 = arith.extui %9 : i1 to i32
    %c0_i32_9 = arith.constant 0 : i32
    %11 = arith.cmpi ne, %10, %c0_i32_9 : i32
    scf.if %11 {
      %c0_10 = arith.constant 0 : index
      %c0_11 = arith.constant 0 : index
      %12 = vector.load %arg7[%c0_10, %c0_11] : memref<32x128xf32, #tpu.memory_space<vmem>>, vector<32x128xf32>
      %c0_12 = arith.constant 0 : index
      %c0_13 = arith.constant 0 : index
      %13 = vector.load %arg5[%c0_12, %c0_13] : memref<1x128xf32, #tpu.memory_space<vmem>>, vector<1x128xf32>
      %14 = vector.broadcast %13 : vector<1x128xf32> to vector<32x128xf32>
      %15 = arith.addf %12, %14 : vector<32x128xf32>
      %16 = arith.truncf %15 : vector<32x128xf32> to vector<32x128xbf16>
      %c0_14 = arith.constant 0 : index
      %c0_15 = arith.constant 0 : index
      %17 = vector.load %arg6[%c0_14, %c0_15] : memref<32x128xbf16, #tpu.memory_space<vmem>>, vector<32x128xbf16>
      tpu.vector_store %arg6[%c0_14, %c0_15], %16 {strides = array<i32>} : memref<32x128xbf16, #tpu.memory_space<vmem>>, vector<32x128xbf16>,
    } else {
    }
    return
  }
  func.func @transform_0(%arg0: i32, %arg1: i32, %arg2: i32) -> (i32, i32) {
    %c0_i32 = arith.constant 0 : i32
    return %arg0, %arg2 : i32, i32
  }
  func.func @transform_1(%arg0: i32, %arg1: i32, %arg2: i32) -> (i32, i32) {
    %c0_i32 = arith.constant 0 : i32
    return %arg2, %arg1 : i32, i32
  }
  func.func @transform_2(%arg0: i32, %arg1: i32, %arg2: i32) -> (i32, i32) {
    %c0_i32 = arith.constant 0 : i32
    %c0_i32_0 = arith.constant 0 : i32
    return %c0_i32, %arg1 : i32, i32
  }
  func.func @transform_3(%arg0: i32, %arg1: i32, %arg2: i32) -> (i32, i32) {
    %c0_i32 = arith.constant 0 : i32
    return %arg0, %arg1 : i32, i32
  }
}

module attributes {stable_mosaic.version = 11 : i64} {
  func.func @_mm_bias_kernel(%arg0: i32, %arg1: i32, %arg2: i32, %arg3: memref<128x128xbf16, #tpu.memory_space<vmem>>, %arg4: memref<128x128xbf16, #tpu.memory_space<vmem>>, %arg5: memref<1x128xf32, #tpu.memory_space<vmem>>, %arg6: memref<128x128xbf16, #tpu.memory_space<vmem>>, %arg7: memref<128x128xf32, #tpu.memory_space<vmem>>) attributes {dimension_semantics = [#tpu.dimension_semantics<parallel>, #tpu.dimension_semantics<parallel>, #tpu.dimension_semantics<arbitrary>], iteration_bounds = array<i64: 1, 1, 1>, scalar_prefetch = 0 : i64, scratch_operands = 1 : i64, tpu.core_type = #tpu.core_type<tc>, window_params = [{transform_indices = @transform_0, window_bounds = array<i64: 128, 128>}, {transform_indices = @transform_1, window_bounds = array<i64: 128, 128>}, {transform_indices = @transform_2, window_bounds = array<i64: 1, 128>}, {transform_indices = @transform_3, window_bounds = array<i64: 128, 128>}]} {
    %c0_i32 = arith.constant 0 : i32
    %0 = arith.cmpi eq, %arg2, %c0_i32 : i32
    %1 = arith.extui %0 : i1 to i32
    %c0_i32_0 = arith.constant 0 : i32
    %2 = arith.cmpi ne, %1, %c0_i32_0 : i32
    scf.if %2 {
      %cst_10 = arith.constant 0.000000e+00 : f32
      %12 = vector.broadcast %cst_10 : f32 to vector<128x128xf32>
      %c0_11 = arith.constant 0 : index
      %c0_12 = arith.constant 0 : index
      %13 = vector.load %arg7[%c0_11, %c0_12] : memref<128x128xf32, #tpu.memory_space<vmem>>, vector<128x128xf32>
      tpu.vector_store %arg7[%c0_11, %c0_12], %12 {strides = array<i32>} : memref<128x128xf32, #tpu.memory_space<vmem>>, vector<128x128xf32>,
    } else {
    }
    %c0 = arith.constant 0 : index
    %c0_1 = arith.constant 0 : index
    %3 = vector.load %arg7[%c0, %c0_1] : memref<128x128xf32, #tpu.memory_space<vmem>>, vector<128x128xf32>
    %c0_2 = arith.constant 0 : index
    %c0_3 = arith.constant 0 : index
    %4 = vector.load %arg3[%c0_2, %c0_3] : memref<128x128xbf16, #tpu.memory_space<vmem>>, vector<128x128xbf16>
    %c0_4 = arith.constant 0 : index
    %c0_5 = arith.constant 0 : index
    %5 = vector.load %arg4[%c0_4, %c0_5] : memref<128x128xbf16, #tpu.memory_space<vmem>>, vector<128x128xbf16>
    %cst = arith.constant dense<0.000000e+00> : vector<128x128xf32>
    %6 = tpu.matmul %4, %5, %cst {dimension_numbers = #tpu.dot_dimension_numbers<[1], [0], [0], [1], [0, 0, 1, 1], [], []>} : vector<128x128xbf16>, vector<128x128xbf16>, vector<128x128xf32> -> vector<128x128xf32>
    %7 = arith.addf %3, %6 : vector<128x128xf32>
    %c0_6 = arith.constant 0 : index
    %c0_7 = arith.constant 0 : index
    %8 = vector.load %arg7[%c0_6, %c0_7] : memref<128x128xf32, #tpu.memory_space<vmem>>, vector<128x128xf32>
    tpu.vector_store %arg7[%c0_6, %c0_7], %7 {strides = array<i32>} : memref<128x128xf32, #tpu.memory_space<vmem>>, vector<128x128xf32>,
    %c0_i32_8 = arith.constant 0 : i32
    %9 = arith.cmpi eq, %arg2, %c0_i32_8 : i32
    %10 = arith.extui %9 : i1 to i32
    %c0_i32_9 = arith.constant 0 : i32
    %11 = arith.cmpi ne, %10, %c0_i32_9 : i32
    scf.if %11 {
      %c0_10 = arith.constant 0 : index
      %c0_11 = arith.constant 0 : index
      %12 = vector.load %arg7[%c0_10, %c0_11] : memref<128x128xf32, #tpu.memory_space<vmem>>, vector<128x128xf32>
      %c0_12 = arith.constant 0 : index
      %c0_13 = arith.constant 0 : index
      %13 = vector.load %arg5[%c0_12, %c0_13] : memref<1x128xf32, #tpu.memory_space<vmem>>, vector<1x128xf32>
      %14 = vector.broadcast %13 : vector<1x128xf32> to vector<128x128xf32>
      %15 = arith.addf %12, %14 : vector<128x128xf32>
      %16 = arith.truncf %15 : vector<128x128xf32> to vector<128x128xbf16>
      %c0_14 = arith.constant 0 : index
      %c0_15 = arith.constant 0 : index
      %17 = vector.load %arg6[%c0_14, %c0_15] : memref<128x128xbf16, #tpu.memory_space<vmem>>, vector<128x128xbf16>
      tpu.vector_store %arg6[%c0_14, %c0_15], %16 {strides = array<i32>} : memref<128x128xbf16, #tpu.memory_space<vmem>>, vector<128x128xbf16>,
    } else {
    }
    return
  }
  func.func @transform_0(%arg0: i32, %arg1: i32, %arg2: i32) -> (i32, i32) {
    %c0_i32 = arith.constant 0 : i32
    return %arg0, %arg2 : i32, i32
  }
  func.func @transform_1(%arg0: i32, %arg1: i32, %arg2: i32) -> (i32, i32) {
    %c0_i32 = arith.constant 0 : i32
    return %arg2, %arg1 : i32, i32
  }
  func.func @transform_2(%arg0: i32, %arg1: i32, %arg2: i32) -> (i32, i32) {
    %c0_i32 = arith.constant 0 : i32
    %c0_i32_0 = arith.constant 0 : i32
    return %c0_i32, %arg1 : i32, i32
  }
  func.func @transform_3(%arg0: i32, %arg1: i32, %arg2: i32) -> (i32, i32) {
    %c0_i32 = arith.constant 0 : i32
    return %arg0, %arg1 : i32, i32
  }
}

module attributes {stable_mosaic.version = 11 : i64} {
  func.func @_mm_bias_kernel(%arg0: i32, %arg1: i32, %arg2: i32, %arg3: memref<128x384xbf16, #tpu.memory_space<vmem>>, %arg4: memref<384x128xbf16, #tpu.memory_space<vmem>>, %arg5: memref<1x128xf32, #tpu.memory_space<vmem>>, %arg6: memref<128x128xbf16, #tpu.memory_space<vmem>>, %arg7: memref<128x128xf32, #tpu.memory_space<vmem>>) attributes {dimension_semantics = [#tpu.dimension_semantics<parallel>, #tpu.dimension_semantics<parallel>, #tpu.dimension_semantics<arbitrary>], iteration_bounds = array<i64: 1, 1, 1>, scalar_prefetch = 0 : i64, scratch_operands = 1 : i64, tpu.core_type = #tpu.core_type<tc>, window_params = [{transform_indices = @transform_0, window_bounds = array<i64: 128, 384>}, {transform_indices = @transform_1, window_bounds = array<i64: 384, 128>}, {transform_indices = @transform_2, window_bounds = array<i64: 1, 128>}, {transform_indices = @transform_3, window_bounds = array<i64: 128, 128>}]} {
    %c0_i32 = arith.constant 0 : i32
    %0 = arith.cmpi eq, %arg2, %c0_i32 : i32
    %1 = arith.extui %0 : i1 to i32
    %c0_i32_0 = arith.constant 0 : i32
    %2 = arith.cmpi ne, %1, %c0_i32_0 : i32
    scf.if %2 {
      %cst_10 = arith.constant 0.000000e+00 : f32
      %12 = vector.broadcast %cst_10 : f32 to vector<128x128xf32>
      %c0_11 = arith.constant 0 : index
      %c0_12 = arith.constant 0 : index
      %13 = vector.load %arg7[%c0_11, %c0_12] : memref<128x128xf32, #tpu.memory_space<vmem>>, vector<128x128xf32>
      tpu.vector_store %arg7[%c0_11, %c0_12], %12 {strides = array<i32>} : memref<128x128xf32, #tpu.memory_space<vmem>>, vector<128x128xf32>,
    } else {
    }
    %c0 = arith.constant 0 : index
    %c0_1 = arith.constant 0 : index
    %3 = vector.load %arg7[%c0, %c0_1] : memref<128x128xf32, #tpu.memory_space<vmem>>, vector<128x128xf32>
    %c0_2 = arith.constant 0 : index
    %c0_3 = arith.constant 0 : index
    %4 = vector.load %arg3[%c0_2, %c0_3] : memref<128x384xbf16, #tpu.memory_space<vmem>>, vector<128x384xbf16>
    %c0_4 = arith.constant 0 : index
    %c0_5 = arith.constant 0 : index
    %5 = vector.load %arg4[%c0_4, %c0_5] : memref<384x128xbf16, #tpu.memory_space<vmem>>, vector<384x128xbf16>
    %cst = arith.constant dense<0.000000e+00> : vector<128x128xf32>
    %6 = tpu.matmul %4, %5, %cst {dimension_numbers = #tpu.dot_dimension_numbers<[1], [0], [0], [1], [0, 0, 1, 1], [], []>} : vector<128x384xbf16>, vector<384x128xbf16>, vector<128x128xf32> -> vector<128x128xf32>
    %7 = arith.addf %3, %6 : vector<128x128xf32>
    %c0_6 = arith.constant 0 : index
    %c0_7 = arith.constant 0 : index
    %8 = vector.load %arg7[%c0_6, %c0_7] : memref<128x128xf32, #tpu.memory_space<vmem>>, vector<128x128xf32>
    tpu.vector_store %arg7[%c0_6, %c0_7], %7 {strides = array<i32>} : memref<128x128xf32, #tpu.memory_space<vmem>>, vector<128x128xf32>,
    %c0_i32_8 = arith.constant 0 : i32
    %9 = arith.cmpi eq, %arg2, %c0_i32_8 : i32
    %10 = arith.extui %9 : i1 to i32
    %c0_i32_9 = arith.constant 0 : i32
    %11 = arith.cmpi ne, %10, %c0_i32_9 : i32
    scf.if %11 {
      %c0_10 = arith.constant 0 : index
      %c0_11 = arith.constant 0 : index
      %12 = vector.load %arg7[%c0_10, %c0_11] : memref<128x128xf32, #tpu.memory_space<vmem>>, vector<128x128xf32>
      %c0_12 = arith.constant 0 : index
      %c0_13 = arith.constant 0 : index
      %13 = vector.load %arg5[%c0_12, %c0_13] : memref<1x128xf32, #tpu.memory_space<vmem>>, vector<1x128xf32>
      %14 = vector.broadcast %13 : vector<1x128xf32> to vector<128x128xf32>
      %15 = arith.addf %12, %14 : vector<128x128xf32>
      %16 = arith.truncf %15 : vector<128x128xf32> to vector<128x128xbf16>
      %c0_14 = arith.constant 0 : index
      %c0_15 = arith.constant 0 : index
      %17 = vector.load %arg6[%c0_14, %c0_15] : memref<128x128xbf16, #tpu.memory_space<vmem>>, vector<128x128xbf16>
      tpu.vector_store %arg6[%c0_14, %c0_15], %16 {strides = array<i32>} : memref<128x128xbf16, #tpu.memory_space<vmem>>, vector<128x128xbf16>,
    } else {
    }
    return
  }
  func.func @transform_0(%arg0: i32, %arg1: i32, %arg2: i32) -> (i32, i32) {
    %c0_i32 = arith.constant 0 : i32
    return %arg0, %arg2 : i32, i32
  }
  func.func @transform_1(%arg0: i32, %arg1: i32, %arg2: i32) -> (i32, i32) {
    %c0_i32 = arith.constant 0 : i32
    return %arg2, %arg1 : i32, i32
  }
  func.func @transform_2(%arg0: i32, %arg1: i32, %arg2: i32) -> (i32, i32) {
    %c0_i32 = arith.constant 0 : i32
    %c0_i32_0 = arith.constant 0 : i32
    return %c0_i32, %arg1 : i32, i32
  }
  func.func @transform_3(%arg0: i32, %arg1: i32, %arg2: i32) -> (i32, i32) {
    %c0_i32 = arith.constant 0 : i32
    return %arg0, %arg1 : i32, i32
  }
}

module attributes {stable_mosaic.version = 11 : i64} {
  func.func @_mm_bias_kernel(%arg0: i32, %arg1: i32, %arg2: i32, %arg3: memref<32x384xbf16, #tpu.memory_space<vmem>>, %arg4: memref<384x128xbf16, #tpu.memory_space<vmem>>, %arg5: memref<1x128xf32, #tpu.memory_space<vmem>>, %arg6: memref<32x128xbf16, #tpu.memory_space<vmem>>, %arg7: memref<32x128xf32, #tpu.memory_space<vmem>>) attributes {dimension_semantics = [#tpu.dimension_semantics<parallel>, #tpu.dimension_semantics<parallel>, #tpu.dimension_semantics<arbitrary>], iteration_bounds = array<i64: 1, 1, 1>, scalar_prefetch = 0 : i64, scratch_operands = 1 : i64, tpu.core_type = #tpu.core_type<tc>, window_params = [{transform_indices = @transform_0, window_bounds = array<i64: 32, 384>}, {transform_indices = @transform_1, window_bounds = array<i64: 384, 128>}, {transform_indices = @transform_2, window_bounds = array<i64: 1, 128>}, {transform_indices = @transform_3, window_bounds = array<i64: 32, 128>}]} {
    %c0_i32 = arith.constant 0 : i32
    %0 = arith.cmpi eq, %arg2, %c0_i32 : i32
    %1 = arith.extui %0 : i1 to i32
    %c0_i32_0 = arith.constant 0 : i32
    %2 = arith.cmpi ne, %1, %c0_i32_0 : i32
    scf.if %2 {
      %cst_10 = arith.constant 0.000000e+00 : f32
      %12 = vector.broadcast %cst_10 : f32 to vector<32x128xf32>
      %c0_11 = arith.constant 0 : index
      %c0_12 = arith.constant 0 : index
      %13 = vector.load %arg7[%c0_11, %c0_12] : memref<32x128xf32, #tpu.memory_space<vmem>>, vector<32x128xf32>
      tpu.vector_store %arg7[%c0_11, %c0_12], %12 {strides = array<i32>} : memref<32x128xf32, #tpu.memory_space<vmem>>, vector<32x128xf32>,
    } else {
    }
    %c0 = arith.constant 0 : index
    %c0_1 = arith.constant 0 : index
    %3 = vector.load %arg7[%c0, %c0_1] : memref<32x128xf32, #tpu.memory_space<vmem>>, vector<32x128xf32>
    %c0_2 = arith.constant 0 : index
    %c0_3 = arith.constant 0 : index
    %4 = vector.load %arg3[%c0_2, %c0_3] : memref<32x384xbf16, #tpu.memory_space<vmem>>, vector<32x384xbf16>
    %c0_4 = arith.constant 0 : index
    %c0_5 = arith.constant 0 : index
    %5 = vector.load %arg4[%c0_4, %c0_5] : memref<384x128xbf16, #tpu.memory_space<vmem>>, vector<384x128xbf16>
    %cst = arith.constant dense<0.000000e+00> : vector<32x128xf32>
    %6 = tpu.matmul %4, %5, %cst {dimension_numbers = #tpu.dot_dimension_numbers<[1], [0], [0], [1], [0, 0, 1, 1], [], []>} : vector<32x384xbf16>, vector<384x128xbf16>, vector<32x128xf32> -> vector<32x128xf32>
    %7 = arith.addf %3, %6 : vector<32x128xf32>
    %c0_6 = arith.constant 0 : index
    %c0_7 = arith.constant 0 : index
    %8 = vector.load %arg7[%c0_6, %c0_7] : memref<32x128xf32, #tpu.memory_space<vmem>>, vector<32x128xf32>
    tpu.vector_store %arg7[%c0_6, %c0_7], %7 {strides = array<i32>} : memref<32x128xf32, #tpu.memory_space<vmem>>, vector<32x128xf32>,
    %c0_i32_8 = arith.constant 0 : i32
    %9 = arith.cmpi eq, %arg2, %c0_i32_8 : i32
    %10 = arith.extui %9 : i1 to i32
    %c0_i32_9 = arith.constant 0 : i32
    %11 = arith.cmpi ne, %10, %c0_i32_9 : i32
    scf.if %11 {
      %c0_10 = arith.constant 0 : index
      %c0_11 = arith.constant 0 : index
      %12 = vector.load %arg7[%c0_10, %c0_11] : memref<32x128xf32, #tpu.memory_space<vmem>>, vector<32x128xf32>
      %c0_12 = arith.constant 0 : index
      %c0_13 = arith.constant 0 : index
      %13 = vector.load %arg5[%c0_12, %c0_13] : memref<1x128xf32, #tpu.memory_space<vmem>>, vector<1x128xf32>
      %14 = vector.broadcast %13 : vector<1x128xf32> to vector<32x128xf32>
      %15 = arith.addf %12, %14 : vector<32x128xf32>
      %16 = arith.truncf %15 : vector<32x128xf32> to vector<32x128xbf16>
      %c0_14 = arith.constant 0 : index
      %c0_15 = arith.constant 0 : index
      %17 = vector.load %arg6[%c0_14, %c0_15] : memref<32x128xbf16, #tpu.memory_space<vmem>>, vector<32x128xbf16>
      tpu.vector_store %arg6[%c0_14, %c0_15], %16 {strides = array<i32>} : memref<32x128xbf16, #tpu.memory_space<vmem>>, vector<32x128xbf16>,
    } else {
    }
    return
  }
  func.func @transform_0(%arg0: i32, %arg1: i32, %arg2: i32) -> (i32, i32) {
    %c0_i32 = arith.constant 0 : i32
    return %arg0, %arg2 : i32, i32
  }
  func.func @transform_1(%arg0: i32, %arg1: i32, %arg2: i32) -> (i32, i32) {
    %c0_i32 = arith.constant 0 : i32
    return %arg2, %arg1 : i32, i32
  }
  func.func @transform_2(%arg0: i32, %arg1: i32, %arg2: i32) -> (i32, i32) {
    %c0_i32 = arith.constant 0 : i32
    %c0_i32_0 = arith.constant 0 : i32
    return %c0_i32, %arg1 : i32, i32
  }
  func.func @transform_3(%arg0: i32, %arg1: i32, %arg2: i32) -> (i32, i32) {
    %c0_i32 = arith.constant 0 : i32
    return %arg0, %arg1 : i32, i32
  }
}

module attributes {stable_mosaic.version = 11 : i64} {
  func.func @_decoder_kernel(%arg0: i32, %arg1: memref<1x16x32xbf16, #tpu.memory_space<vmem>>, %arg2: memref<8x32xf32, #tpu.memory_space<vmem>>, %arg3: memref<32x32xbf16, #tpu.memory_space<vmem>>, %arg4: memref<1x32xf32, #tpu.memory_space<vmem>>, %arg5: memref<32x64xbf16, #tpu.memory_space<vmem>>, %arg6: memref<1x64xf32, #tpu.memory_space<vmem>>, %arg7: memref<32x32xbf16, #tpu.memory_space<vmem>>, %arg8: memref<1x32xf32, #tpu.memory_space<vmem>>, %arg9: memref<1x32xf32, #tpu.memory_space<vmem>>, %arg10: memref<1x32xf32, #tpu.memory_space<vmem>>, %arg11: memref<32x96xbf16, #tpu.memory_space<vmem>>, %arg12: memref<1x96xf32, #tpu.memory_space<vmem>>, %arg13: memref<32x32xbf16, #tpu.memory_space<vmem>>, %arg14: memref<1x32xf32, #tpu.memory_space<vmem>>, %arg15: memref<1x32xf32, #tpu.memory_space<vmem>>, %arg16: memref<1x32xf32, #tpu.memory_space<vmem>>, %arg17: memref<32x64xbf16, #tpu.memory_space<vmem>>, %arg18: memref<1x64xf32, #tpu.memory_space<vmem>>, %arg19: memref<64x32xbf16, #tpu.memory_space<vmem>>, %arg20: memref<1x32xf32, #tpu.memory_space<vmem>>, %arg21: memref<1x32xf32, #tpu.memory_space<vmem>>, %arg22: memref<1x32xf32, #tpu.memory_space<vmem>>, %arg23: memref<32x128xbf16, #tpu.memory_space<vmem>>, %arg24: memref<1x128xf32, #tpu.memory_space<vmem>>, %arg25: memref<32x32xbf16, #tpu.memory_space<vmem>>, %arg26: memref<1x32xf32, #tpu.memory_space<vmem>>, %arg27: memref<32x32xbf16, #tpu.memory_space<vmem>>, %arg28: memref<1x32xf32, #tpu.memory_space<vmem>>, %arg29: memref<1x8x128xf32, #tpu.memory_space<vmem>>, %arg30: memref<1x8x32xf32, #tpu.memory_space<vmem>>) attributes {dimension_semantics = [#tpu.dimension_semantics<parallel>], iteration_bounds = array<i64: 2>, scalar_prefetch = 0 : i64, scratch_operands = 0 : i64, tpu.core_type = #tpu.core_type<tc>, window_params = [{transform_indices = @transform_0, window_bounds = array<i64: 1, 16, 32>}, {pipeline_mode = #tpu.pipeline_mode<synchronous>, transform_indices = @transform_1, window_bounds = array<i64: 8, 32>}, {pipeline_mode = #tpu.pipeline_mode<synchronous>, transform_indices = @transform_2, window_bounds = array<i64: 32, 32>}, {pipeline_mode = #tpu.pipeline_mode<synchronous>, transform_indices = @transform_3, window_bounds = array<i64: 1, 32>}, {pipeline_mode = #tpu.pipeline_mode<synchronous>, transform_indices = @transform_4, window_bounds = array<i64: 32, 64>}, {pipeline_mode = #tpu.pipeline_mode<synchronous>, transform_indices = @transform_5, window_bounds = array<i64: 1, 64>}, {pipeline_mode = #tpu.pipeline_mode<synchronous>, transform_indices = @transform_6, window_bounds = array<i64: 32, 32>}, {pipeline_mode = #tpu.pipeline_mode<synchronous>, transform_indices = @transform_7, window_bounds = array<i64: 1, 32>}, {pipeline_mode = #tpu.pipeline_mode<synchronous>, transform_indices = @transform_8, window_bounds = array<i64: 1, 32>}, {pipeline_mode = #tpu.pipeline_mode<synchronous>, transform_indices = @transform_9, window_bounds = array<i64: 1, 32>}, {pipeline_mode = #tpu.pipeline_mode<synchronous>, transform_indices = @transform_10, window_bounds = array<i64: 32, 96>}, {pipeline_mode = #tpu.pipeline_mode<synchronous>, transform_indices = @transform_11, window_bounds = array<i64: 1, 96>}, {pipeline_mode = #tpu.pipeline_mode<synchronous>, transform_indices = @transform_12, window_bounds = array<i64: 32, 32>}, {pipeline_mode = #tpu.pipeline_mode<synchronous>, transform_indices = @transform_13, window_bounds = array<i64: 1, 32>}, {pipeline_mode = #tpu.pipeline_mode<synchronous>, transform_indices = @transform_14, window_bounds = array<i64: 1, 32>}, {pipeline_mode = #tpu.pipeline_mode<synchronous>, transform_indices = @transform_15, window_bounds = array<i64: 1, 32>}, {pipeline_mode = #tpu.pipeline_mode<synchronous>, transform_indices = @transform_16, window_bounds = array<i64: 32, 64>}, {pipeline_mode = #tpu.pipeline_mode<synchronous>, transform_indices = @transform_17, window_bounds = array<i64: 1, 64>}, {pipeline_mode = #tpu.pipeline_mode<synchronous>, transform_indices = @transform_18, window_bounds = array<i64: 64, 32>}, {pipeline_mode = #tpu.pipeline_mode<synchronous>, transform_indices = @transform_19, window_bounds = array<i64: 1, 32>}, {pipeline_mode = #tpu.pipeline_mode<synchronous>, transform_indices = @transform_20, window_bounds = array<i64: 1, 32>}, {pipeline_mode = #tpu.pipeline_mode<synchronous>, transform_indices = @transform_21, window_bounds = array<i64: 1, 32>}, {pipeline_mode = #tpu.pipeline_mode<synchronous>, transform_indices = @transform_22, window_bounds = array<i64: 32, 128>}, {pipeline_mode = #tpu.pipeline_mode<synchronous>, transform_indices = @transform_23, window_bounds = array<i64: 1, 128>}, {pipeline_mode = #tpu.pipeline_mode<synchronous>, transform_indices = @transform_24, window_bounds = array<i64: 32, 32>}, {pipeline_mode = #tpu.pipeline_mode<synchronous>, transform_indices = @transform_25, window_bounds = array<i64: 1, 32>}, {pipeline_mode = #tpu.pipeline_mode<synchronous>, transform_indices = @transform_26, window_bounds = array<i64: 32, 32>}, {pipeline_mode = #tpu.pipeline_mode<synchronous>, transform_indices = @transform_27, window_bounds = array<i64: 1, 32>}, {transform_indices = @transform_28, window_bounds = array<i64: 1, 8, 128>}, {transform_indices = @transform_29, window_bounds = array<i64: 1, 8, 32>}]} {
    %c0 = arith.constant 0 : index
    %c0_0 = arith.constant 0 : index
    %c0_1 = arith.constant 0 : index
    %0 = vector.load %arg1[%c0, %c0_0, %c0_1] : memref<1x16x32xbf16, #tpu.memory_space<vmem>>, vector<1x16x32xbf16>
    %1 = vector.shape_cast %0 : vector<1x16x32xbf16> to vector<16x32xbf16>
    %c0_2 = arith.constant 0 : index
    %c0_3 = arith.constant 0 : index
    %2 = vector.load %arg2[%c0_2, %c0_3] : memref<8x32xf32, #tpu.memory_space<vmem>>, vector<8x32xf32>
    %c0_4 = arith.constant 0 : index
    %c0_5 = arith.constant 0 : index
    %3 = vector.load %arg3[%c0_4, %c0_5] : memref<32x32xbf16, #tpu.memory_space<vmem>>, vector<32x32xbf16>
    %c0_6 = arith.constant 0 : index
    %c0_7 = arith.constant 0 : index
    %4 = vector.load %arg4[%c0_6, %c0_7] : memref<1x32xf32, #tpu.memory_space<vmem>>, vector<1x32xf32>
    %5 = arith.truncf %2 : vector<8x32xf32> to vector<8x32xbf16>
    %cst = arith.constant dense<0.000000e+00> : vector<8x32xf32>
    %6 = tpu.matmul %5, %3, %cst {dimension_numbers = #tpu.dot_dimension_numbers<[1], [0], [0], [1], [0, 0, 1, 1], [], []>} : vector<8x32xbf16>, vector<32x32xbf16>, vector<8x32xf32> -> vector<8x32xf32>
    %7 = vector.broadcast %4 : vector<1x32xf32> to vector<8x32xf32>
    %8 = arith.addf %6, %7 : vector<8x32xf32>
    %c0_8 = arith.constant 0 : index
    %c0_9 = arith.constant 0 : index
    %9 = vector.load %arg5[%c0_8, %c0_9] : memref<32x64xbf16, #tpu.memory_space<vmem>>, vector<32x64xbf16>
    %c0_10 = arith.constant 0 : index
    %c0_11 = arith.constant 0 : index
    %10 = vector.load %arg6[%c0_10, %c0_11] : memref<1x64xf32, #tpu.memory_space<vmem>>, vector<1x64xf32>
    %cst_12 = arith.constant dense<0.000000e+00> : vector<16x64xf32>
    %11 = tpu.matmul %1, %9, %cst_12 {dimension_numbers = #tpu.dot_dimension_numbers<[1], [0], [0], [1], [0, 0, 1, 1], [], []>} : vector<16x32xbf16>, vector<32x64xbf16>, vector<16x64xf32> -> vector<16x64xf32>
    %12 = vector.broadcast %10 : vector<1x64xf32> to vector<16x64xf32>
    %13 = arith.addf %11, %12 : vector<16x64xf32>
    %14 = vector.extract_strided_slice %13 {offsets = [0, 0], sizes = [16, 32], strides = [1, 1]} : vector<16x64xf32> to vector<16x32xf32>
    %15 = vector.extract_strided_slice %13 {offsets = [0, 32], sizes = [16, 32], strides = [1, 1]} : vector<16x64xf32> to vector<16x32xf32>
    %c0_13 = arith.constant 0 : index
    %c0_14 = arith.constant 0 : index
    %16 = vector.load %arg7[%c0_13, %c0_14] : memref<32x32xbf16, #tpu.memory_space<vmem>>, vector<32x32xbf16>
    %c0_15 = arith.constant 0 : index
    %c0_16 = arith.constant 0 : index
    %17 = vector.load %arg8[%c0_15, %c0_16] : memref<1x32xf32, #tpu.memory_space<vmem>>, vector<1x32xf32>
    %cst_17 = arith.constant 0.000000e+00 : f32
    %18 = vector.broadcast %cst_17 : f32 to vector<8x32xf32>
    %19 = vector.broadcast %17 : vector<1x32xf32> to vector<8x32xf32>
    %20 = arith.addf %18, %19 : vector<8x32xf32>
    %21 = vector.extract_strided_slice %8 {offsets = [0, 0], sizes = [8, 8], strides = [1, 1]} : vector<8x32xf32> to vector<8x8xf32>
    %22 = arith.truncf %21 : vector<8x8xf32> to vector<8x8xbf16>
    %23 = vector.extract_strided_slice %14 {offsets = [0, 0], sizes = [16, 8], strides = [1, 1]} : vector<16x32xf32> to vector<16x8xf32>
    %24 = arith.truncf %23 : vector<16x8xf32> to vector<16x8xbf16>
    %cst_18 = arith.constant dense<0.000000e+00> : vector<8x16xf32>
    %25 = tpu.matmul %22, %24, %cst_18 {dimension_numbers = #tpu.dot_dimension_numbers<[1], [1], [0], [0], [0, 0, 1, 0], [], []>} : vector<8x8xbf16>, vector<16x8xbf16>, vector<8x16xf32> -> vector<8x16xf32>
    %cst_19 = arith.constant 0.353553385 : f32
    %26 = vector.broadcast %cst_19 : f32 to vector<8x16xf32>
    %27 = arith.mulf %25, %26 : vector<8x16xf32>
    %cst_20 = arith.constant dense<0xFF800000> : vector<8xf32>
    %28 = vector.multi_reduction <maximumf>, %27, %cst_20 [1] : vector<8x16xf32> to vector<8xf32>
    %29 = vector.shape_cast %28 : vector<8xf32> to vector<8x1xf32>
    %30 = vector.broadcast %29 : vector<8x1xf32> to vector<8x16xf32>
    %31 = arith.subf %27, %30 : vector<8x16xf32>
    %32 = math.exp %31 : vector<8x16xf32>
    %cst_21 = arith.constant dense<0.000000e+00> : vector<8xf32>
    %33 = vector.multi_reduction <add>, %32, %cst_21 [1] : vector<8x16xf32> to vector<8xf32>
    %34 = vector.shape_cast %33 : vector<8xf32> to vector<8x1xf32>
    %35 = tpu.reciprocal %34 {approx = true} : vector<8x1xf32> -> vector<8x1xf32>
    %36 = vector.broadcast %35 : vector<8x1xf32> to vector<8x16xf32>
    %37 = arith.mulf %32, %36 : vector<8x16xf32>
    %38 = arith.truncf %37 : vector<8x16xf32> to vector<8x16xbf16>
    %39 = vector.extract_strided_slice %15 {offsets = [0, 0], sizes = [16, 8], strides = [1, 1]} : vector<16x32xf32> to vector<16x8xf32>
    %40 = arith.truncf %39 : vector<16x8xf32> to vector<16x8xbf16>
    %cst_22 = arith.constant dense<0.000000e+00> : vector<8x8xf32>
    %41 = tpu.matmul %38, %40, %cst_22 {dimension_numbers = #tpu.dot_dimension_numbers<[1], [0], [0], [1], [0, 0, 1, 1], [], []>} : vector<8x16xbf16>, vector<16x8xbf16>, vector<8x8xf32> -> vector<8x8xf32>
    %42 = arith.truncf %41 : vector<8x8xf32> to vector<8x8xbf16>
    %43 = vector.extract_strided_slice %16 {offsets = [0, 0], sizes = [8, 32], strides = [1, 1]} : vector<32x32xbf16> to vector<8x32xbf16>
    %cst_23 = arith.constant dense<0.000000e+00> : vector<8x32xf32>
    %44 = tpu.matmul %42, %43, %cst_23 {dimension_numbers = #tpu.dot_dimension_numbers<[1], [0], [0], [1], [0, 0, 1, 1], [], []>} : vector<8x8xbf16>, vector<8x32xbf16>, vector<8x32xf32> -> vector<8x32xf32>
    %45 = arith.addf %20, %44 : vector<8x32xf32>
    %46 = vector.extract_strided_slice %8 {offsets = [0, 8], sizes = [8, 8], strides = [1, 1]} : vector<8x32xf32> to vector<8x8xf32>
    %47 = arith.truncf %46 : vector<8x8xf32> to vector<8x8xbf16>
    %48 = vector.extract_strided_slice %14 {offsets = [0, 8], sizes = [16, 8], strides = [1, 1]} : vector<16x32xf32> to vector<16x8xf32>
    %49 = arith.truncf %48 : vector<16x8xf32> to vector<16x8xbf16>
    %cst_24 = arith.constant dense<0.000000e+00> : vector<8x16xf32>
    %50 = tpu.matmul %47, %49, %cst_24 {dimension_numbers = #tpu.dot_dimension_numbers<[1], [1], [0], [0], [0, 0, 1, 0], [], []>} : vector<8x8xbf16>, vector<16x8xbf16>, vector<8x16xf32> -> vector<8x16xf32>
    %cst_25 = arith.constant 0.353553385 : f32
    %51 = vector.broadcast %cst_25 : f32 to vector<8x16xf32>
    %52 = arith.mulf %50, %51 : vector<8x16xf32>
    %cst_26 = arith.constant dense<0xFF800000> : vector<8xf32>
    %53 = vector.multi_reduction <maximumf>, %52, %cst_26 [1] : vector<8x16xf32> to vector<8xf32>
    %54 = vector.shape_cast %53 : vector<8xf32> to vector<8x1xf32>
    %55 = vector.broadcast %54 : vector<8x1xf32> to vector<8x16xf32>
    %56 = arith.subf %52, %55 : vector<8x16xf32>
    %57 = math.exp %56 : vector<8x16xf32>
    %cst_27 = arith.constant dense<0.000000e+00> : vector<8xf32>
    %58 = vector.multi_reduction <add>, %57, %cst_27 [1] : vector<8x16xf32> to vector<8xf32>
    %59 = vector.shape_cast %58 : vector<8xf32> to vector<8x1xf32>
    %60 = tpu.reciprocal %59 {approx = true} : vector<8x1xf32> -> vector<8x1xf32>
    %61 = vector.broadcast %60 : vector<8x1xf32> to vector<8x16xf32>
    %62 = arith.mulf %57, %61 : vector<8x16xf32>
    %63 = arith.truncf %62 : vector<8x16xf32> to vector<8x16xbf16>
    %64 = vector.extract_strided_slice %15 {offsets = [0, 8], sizes = [16, 8], strides = [1, 1]} : vector<16x32xf32> to vector<16x8xf32>
    %65 = arith.truncf %64 : vector<16x8xf32> to vector<16x8xbf16>
    %cst_28 = arith.constant dense<0.000000e+00> : vector<8x8xf32>
    %66 = tpu.matmul %63, %65, %cst_28 {dimension_numbers = #tpu.dot_dimension_numbers<[1], [0], [0], [1], [0, 0, 1, 1], [], []>} : vector<8x16xbf16>, vector<16x8xbf16>, vector<8x8xf32> -> vector<8x8xf32>
    %67 = arith.truncf %66 : vector<8x8xf32> to vector<8x8xbf16>
    %68 = vector.extract_strided_slice %16 {offsets = [8, 0], sizes = [8, 32], strides = [1, 1]} : vector<32x32xbf16> to vector<8x32xbf16>
    %cst_29 = arith.constant dense<0.000000e+00> : vector<8x32xf32>
    %69 = tpu.matmul %67, %68, %cst_29 {dimension_numbers = #tpu.dot_dimension_numbers<[1], [0], [0], [1], [0, 0, 1, 1], [], []>} : vector<8x8xbf16>, vector<8x32xbf16>, vector<8x32xf32> -> vector<8x32xf32>
    %70 = arith.addf %45, %69 : vector<8x32xf32>
    %71 = vector.extract_strided_slice %8 {offsets = [0, 16], sizes = [8, 8], strides = [1, 1]} : vector<8x32xf32> to vector<8x8xf32>
    %72 = arith.truncf %71 : vector<8x8xf32> to vector<8x8xbf16>
    %73 = vector.extract_strided_slice %14 {offsets = [0, 16], sizes = [16, 8], strides = [1, 1]} : vector<16x32xf32> to vector<16x8xf32>
    %74 = arith.truncf %73 : vector<16x8xf32> to vector<16x8xbf16>
    %cst_30 = arith.constant dense<0.000000e+00> : vector<8x16xf32>
    %75 = tpu.matmul %72, %74, %cst_30 {dimension_numbers = #tpu.dot_dimension_numbers<[1], [1], [0], [0], [0, 0, 1, 0], [], []>} : vector<8x8xbf16>, vector<16x8xbf16>, vector<8x16xf32> -> vector<8x16xf32>
    %cst_31 = arith.constant 0.353553385 : f32
    %76 = vector.broadcast %cst_31 : f32 to vector<8x16xf32>
    %77 = arith.mulf %75, %76 : vector<8x16xf32>
    %cst_32 = arith.constant dense<0xFF800000> : vector<8xf32>
    %78 = vector.multi_reduction <maximumf>, %77, %cst_32 [1] : vector<8x16xf32> to vector<8xf32>
    %79 = vector.shape_cast %78 : vector<8xf32> to vector<8x1xf32>
    %80 = vector.broadcast %79 : vector<8x1xf32> to vector<8x16xf32>
    %81 = arith.subf %77, %80 : vector<8x16xf32>
    %82 = math.exp %81 : vector<8x16xf32>
    %cst_33 = arith.constant dense<0.000000e+00> : vector<8xf32>
    %83 = vector.multi_reduction <add>, %82, %cst_33 [1] : vector<8x16xf32> to vector<8xf32>
    %84 = vector.shape_cast %83 : vector<8xf32> to vector<8x1xf32>
    %85 = tpu.reciprocal %84 {approx = true} : vector<8x1xf32> -> vector<8x1xf32>
    %86 = vector.broadcast %85 : vector<8x1xf32> to vector<8x16xf32>
    %87 = arith.mulf %82, %86 : vector<8x16xf32>
    %88 = arith.truncf %87 : vector<8x16xf32> to vector<8x16xbf16>
    %89 = vector.extract_strided_slice %15 {offsets = [0, 16], sizes = [16, 8], strides = [1, 1]} : vector<16x32xf32> to vector<16x8xf32>
    %90 = arith.truncf %89 : vector<16x8xf32> to vector<16x8xbf16>
    %cst_34 = arith.constant dense<0.000000e+00> : vector<8x8xf32>
    %91 = tpu.matmul %88, %90, %cst_34 {dimension_numbers = #tpu.dot_dimension_numbers<[1], [0], [0], [1], [0, 0, 1, 1], [], []>} : vector<8x16xbf16>, vector<16x8xbf16>, vector<8x8xf32> -> vector<8x8xf32>
    %92 = arith.truncf %91 : vector<8x8xf32> to vector<8x8xbf16>
    %93 = vector.extract_strided_slice %16 {offsets = [16, 0], sizes = [8, 32], strides = [1, 1]} : vector<32x32xbf16> to vector<8x32xbf16>
    %cst_35 = arith.constant dense<0.000000e+00> : vector<8x32xf32>
    %94 = tpu.matmul %92, %93, %cst_35 {dimension_numbers = #tpu.dot_dimension_numbers<[1], [0], [0], [1], [0, 0, 1, 1], [], []>} : vector<8x8xbf16>, vector<8x32xbf16>, vector<8x32xf32> -> vector<8x32xf32>
    %95 = arith.addf %70, %94 : vector<8x32xf32>
    %96 = vector.extract_strided_slice %8 {offsets = [0, 24], sizes = [8, 8], strides = [1, 1]} : vector<8x32xf32> to vector<8x8xf32>
    %97 = arith.truncf %96 : vector<8x8xf32> to vector<8x8xbf16>
    %98 = vector.extract_strided_slice %14 {offsets = [0, 24], sizes = [16, 8], strides = [1, 1]} : vector<16x32xf32> to vector<16x8xf32>
    %99 = arith.truncf %98 : vector<16x8xf32> to vector<16x8xbf16>
    %cst_36 = arith.constant dense<0.000000e+00> : vector<8x16xf32>
    %100 = tpu.matmul %97, %99, %cst_36 {dimension_numbers = #tpu.dot_dimension_numbers<[1], [1], [0], [0], [0, 0, 1, 0], [], []>} : vector<8x8xbf16>, vector<16x8xbf16>, vector<8x16xf32> -> vector<8x16xf32>
    %cst_37 = arith.constant 0.353553385 : f32
    %101 = vector.broadcast %cst_37 : f32 to vector<8x16xf32>
    %102 = arith.mulf %100, %101 : vector<8x16xf32>
    %cst_38 = arith.constant dense<0xFF800000> : vector<8xf32>
    %103 = vector.multi_reduction <maximumf>, %102, %cst_38 [1] : vector<8x16xf32> to vector<8xf32>
    %104 = vector.shape_cast %103 : vector<8xf32> to vector<8x1xf32>
    %105 = vector.broadcast %104 : vector<8x1xf32> to vector<8x16xf32>
    %106 = arith.subf %102, %105 : vector<8x16xf32>
    %107 = math.exp %106 : vector<8x16xf32>
    %cst_39 = arith.constant dense<0.000000e+00> : vector<8xf32>
    %108 = vector.multi_reduction <add>, %107, %cst_39 [1] : vector<8x16xf32> to vector<8xf32>
    %109 = vector.shape_cast %108 : vector<8xf32> to vector<8x1xf32>
    %110 = tpu.reciprocal %109 {approx = true} : vector<8x1xf32> -> vector<8x1xf32>
    %111 = vector.broadcast %110 : vector<8x1xf32> to vector<8x16xf32>
    %112 = arith.mulf %107, %111 : vector<8x16xf32>
    %113 = arith.truncf %112 : vector<8x16xf32> to vector<8x16xbf16>
    %114 = vector.extract_strided_slice %15 {offsets = [0, 24], sizes = [16, 8], strides = [1, 1]} : vector<16x32xf32> to vector<16x8xf32>
    %115 = arith.truncf %114 : vector<16x8xf32> to vector<16x8xbf16>
    %cst_40 = arith.constant dense<0.000000e+00> : vector<8x8xf32>
    %116 = tpu.matmul %113, %115, %cst_40 {dimension_numbers = #tpu.dot_dimension_numbers<[1], [0], [0], [1], [0, 0, 1, 1], [], []>} : vector<8x16xbf16>, vector<16x8xbf16>, vector<8x8xf32> -> vector<8x8xf32>
    %117 = arith.truncf %116 : vector<8x8xf32> to vector<8x8xbf16>
    %118 = vector.extract_strided_slice %16 {offsets = [24, 0], sizes = [8, 32], strides = [1, 1]} : vector<32x32xbf16> to vector<8x32xbf16>
    %cst_41 = arith.constant dense<0.000000e+00> : vector<8x32xf32>
    %119 = tpu.matmul %117, %118, %cst_41 {dimension_numbers = #tpu.dot_dimension_numbers<[1], [0], [0], [1], [0, 0, 1, 1], [], []>} : vector<8x8xbf16>, vector<8x32xbf16>, vector<8x32xf32> -> vector<8x32xf32>
    %120 = arith.addf %95, %119 : vector<8x32xf32>
    %121 = arith.addf %2, %120 : vector<8x32xf32>
    %c0_42 = arith.constant 0 : index
    %c0_43 = arith.constant 0 : index
    %122 = vector.load %arg9[%c0_42, %c0_43] : memref<1x32xf32, #tpu.memory_space<vmem>>, vector<1x32xf32>
    %c0_44 = arith.constant 0 : index
    %c0_45 = arith.constant 0 : index
    %123 = vector.load %arg10[%c0_44, %c0_45] : memref<1x32xf32, #tpu.memory_space<vmem>>, vector<1x32xf32>
    %cst_46 = arith.constant dense<0.000000e+00> : vector<8xf32>
    %124 = vector.multi_reduction <add>, %121, %cst_46 [1] : vector<8x32xf32> to vector<8xf32>
    %125 = vector.shape_cast %124 : vector<8xf32> to vector<8x1xf32>
    %cst_47 = arith.constant 3.200000e+01 : f32
    %126 = vector.broadcast %cst_47 : f32 to vector<8x1xf32>
    %127 = arith.divf %125, %126 : vector<8x1xf32>
    %128 = vector.broadcast %127 : vector<8x1xf32> to vector<8x32xf32>
    %129 = arith.subf %121, %128 : vector<8x32xf32>
    %130 = arith.mulf %129, %129 : vector<8x32xf32>
    %cst_48 = arith.constant dense<0.000000e+00> : vector<8xf32>
    %131 = vector.multi_reduction <add>, %130, %cst_48 [1] : vector<8x32xf32> to vector<8xf32>
    %132 = vector.shape_cast %131 : vector<8xf32> to vector<8x1xf32>
    %cst_49 = arith.constant 3.200000e+01 : f32
    %133 = vector.broadcast %cst_49 : f32 to vector<8x1xf32>
    %134 = arith.divf %132, %133 : vector<8x1xf32>
    %135 = vector.broadcast %127 : vector<8x1xf32> to vector<8x32xf32>
    %136 = arith.subf %121, %135 : vector<8x32xf32>
    %cst_50 = arith.constant 9.99999974E-6 : f32
    %137 = vector.broadcast %cst_50 : f32 to vector<8x1xf32>
    %138 = arith.addf %134, %137 : vector<8x1xf32>
    %139 = math.rsqrt %138 : vector<8x1xf32>
    %140 = vector.broadcast %139 : vector<8x1xf32> to vector<8x32xf32>
    %141 = arith.mulf %136, %140 : vector<8x32xf32>
    %142 = vector.broadcast %122 : vector<1x32xf32> to vector<8x32xf32>
    %143 = arith.mulf %141, %142 : vector<8x32xf32>
    %144 = vector.broadcast %123 : vector<1x32xf32> to vector<8x32xf32>
    %145 = arith.addf %143, %144 : vector<8x32xf32>
    %c0_51 = arith.constant 0 : index
    %c0_52 = arith.constant 0 : index
    %146 = vector.load %arg11[%c0_51, %c0_52] : memref<32x96xbf16, #tpu.memory_space<vmem>>, vector<32x96xbf16>
    %c0_53 = arith.constant 0 : index
    %c0_54 = arith.constant 0 : index
    %147 = vector.load %arg12[%c0_53, %c0_54] : memref<1x96xf32, #tpu.memory_space<vmem>>, vector<1x96xf32>
    %148 = arith.truncf %145 : vector<8x32xf32> to vector<8x32xbf16>
    %cst_55 = arith.constant dense<0.000000e+00> : vector<8x96xf32>
    %149 = tpu.matmul %148, %146, %cst_55 {dimension_numbers = #tpu.dot_dimension_numbers<[1], [0], [0], [1], [0, 0, 1, 1], [], []>} : vector<8x32xbf16>, vector<32x96xbf16>, vector<8x96xf32> -> vector<8x96xf32>
    %150 = vector.broadcast %147 : vector<1x96xf32> to vector<8x96xf32>
    %151 = arith.addf %149, %150 : vector<8x96xf32>
    %152 = vector.extract_strided_slice %151 {offsets = [0, 0], sizes = [8, 32], strides = [1, 1]} : vector<8x96xf32> to vector<8x32xf32>
    %153 = vector.extract_strided_slice %151 {offsets = [0, 32], sizes = [8, 32], strides = [1, 1]} : vector<8x96xf32> to vector<8x32xf32>
    %154 = vector.extract_strided_slice %151 {offsets = [0, 64], sizes = [8, 32], strides = [1, 1]} : vector<8x96xf32> to vector<8x32xf32>
    %c0_56 = arith.constant 0 : index
    %c0_57 = arith.constant 0 : index
    %155 = vector.load %arg13[%c0_56, %c0_57] : memref<32x32xbf16, #tpu.memory_space<vmem>>, vector<32x32xbf16>
    %c0_58 = arith.constant 0 : index
    %c0_59 = arith.constant 0 : index
    %156 = vector.load %arg14[%c0_58, %c0_59] : memref<1x32xf32, #tpu.memory_space<vmem>>, vector<1x32xf32>
    %cst_60 = arith.constant 0.000000e+00 : f32
    %157 = vector.broadcast %cst_60 : f32 to vector<8x32xf32>
    %158 = vector.broadcast %156 : vector<1x32xf32> to vector<8x32xf32>
    %159 = arith.addf %157, %158 : vector<8x32xf32>
    %160 = vector.extract_strided_slice %152 {offsets = [0, 0], sizes = [8, 8], strides = [1, 1]} : vector<8x32xf32> to vector<8x8xf32>
    %161 = arith.truncf %160 : vector<8x8xf32> to vector<8x8xbf16>
    %162 = vector.extract_strided_slice %153 {offsets = [0, 0], sizes = [8, 8], strides = [1, 1]} : vector<8x32xf32> to vector<8x8xf32>
    %163 = arith.truncf %162 : vector<8x8xf32> to vector<8x8xbf16>
    %cst_61 = arith.constant dense<0.000000e+00> : vector<8x8xf32>
    %164 = tpu.matmul %161, %163, %cst_61 {dimension_numbers = #tpu.dot_dimension_numbers<[1], [1], [0], [0], [0, 0, 1, 0], [], []>} : vector<8x8xbf16>, vector<8x8xbf16>, vector<8x8xf32> -> vector<8x8xf32>
    %cst_62 = arith.constant 0.353553385 : f32
    %165 = vector.broadcast %cst_62 : f32 to vector<8x8xf32>
    %166 = arith.mulf %164, %165 : vector<8x8xf32>
    %cst_63 = arith.constant dense<0xFF800000> : vector<8xf32>
    %167 = vector.multi_reduction <maximumf>, %166, %cst_63 [1] : vector<8x8xf32> to vector<8xf32>
    %168 = vector.shape_cast %167 : vector<8xf32> to vector<8x1xf32>
    %169 = vector.broadcast %168 : vector<8x1xf32> to vector<8x8xf32>
    %170 = arith.subf %166, %169 : vector<8x8xf32>
    %171 = math.exp %170 : vector<8x8xf32>
    %cst_64 = arith.constant dense<0.000000e+00> : vector<8xf32>
    %172 = vector.multi_reduction <add>, %171, %cst_64 [1] : vector<8x8xf32> to vector<8xf32>
    %173 = vector.shape_cast %172 : vector<8xf32> to vector<8x1xf32>
    %174 = tpu.reciprocal %173 {approx = true} : vector<8x1xf32> -> vector<8x1xf32>
    %175 = vector.broadcast %174 : vector<8x1xf32> to vector<8x8xf32>
    %176 = arith.mulf %171, %175 : vector<8x8xf32>
    %177 = arith.truncf %176 : vector<8x8xf32> to vector<8x8xbf16>
    %178 = vector.extract_strided_slice %154 {offsets = [0, 0], sizes = [8, 8], strides = [1, 1]} : vector<8x32xf32> to vector<8x8xf32>
    %179 = arith.truncf %178 : vector<8x8xf32> to vector<8x8xbf16>
    %cst_65 = arith.constant dense<0.000000e+00> : vector<8x8xf32>
    %180 = tpu.matmul %177, %179, %cst_65 {dimension_numbers = #tpu.dot_dimension_numbers<[1], [0], [0], [1], [0, 0, 1, 1], [], []>} : vector<8x8xbf16>, vector<8x8xbf16>, vector<8x8xf32> -> vector<8x8xf32>
    %181 = arith.truncf %180 : vector<8x8xf32> to vector<8x8xbf16>
    %182 = vector.extract_strided_slice %155 {offsets = [0, 0], sizes = [8, 32], strides = [1, 1]} : vector<32x32xbf16> to vector<8x32xbf16>
    %cst_66 = arith.constant dense<0.000000e+00> : vector<8x32xf32>
    %183 = tpu.matmul %181, %182, %cst_66 {dimension_numbers = #tpu.dot_dimension_numbers<[1], [0], [0], [1], [0, 0, 1, 1], [], []>} : vector<8x8xbf16>, vector<8x32xbf16>, vector<8x32xf32> -> vector<8x32xf32>
    %184 = arith.addf %159, %183 : vector<8x32xf32>
    %185 = vector.extract_strided_slice %152 {offsets = [0, 8], sizes = [8, 8], strides = [1, 1]} : vector<8x32xf32> to vector<8x8xf32>
    %186 = arith.truncf %185 : vector<8x8xf32> to vector<8x8xbf16>
    %187 = vector.extract_strided_slice %153 {offsets = [0, 8], sizes = [8, 8], strides = [1, 1]} : vector<8x32xf32> to vector<8x8xf32>
    %188 = arith.truncf %187 : vector<8x8xf32> to vector<8x8xbf16>
    %cst_67 = arith.constant dense<0.000000e+00> : vector<8x8xf32>
    %189 = tpu.matmul %186, %188, %cst_67 {dimension_numbers = #tpu.dot_dimension_numbers<[1], [1], [0], [0], [0, 0, 1, 0], [], []>} : vector<8x8xbf16>, vector<8x8xbf16>, vector<8x8xf32> -> vector<8x8xf32>
    %cst_68 = arith.constant 0.353553385 : f32
    %190 = vector.broadcast %cst_68 : f32 to vector<8x8xf32>
    %191 = arith.mulf %189, %190 : vector<8x8xf32>
    %cst_69 = arith.constant dense<0xFF800000> : vector<8xf32>
    %192 = vector.multi_reduction <maximumf>, %191, %cst_69 [1] : vector<8x8xf32> to vector<8xf32>
    %193 = vector.shape_cast %192 : vector<8xf32> to vector<8x1xf32>
    %194 = vector.broadcast %193 : vector<8x1xf32> to vector<8x8xf32>
    %195 = arith.subf %191, %194 : vector<8x8xf32>
    %196 = math.exp %195 : vector<8x8xf32>
    %cst_70 = arith.constant dense<0.000000e+00> : vector<8xf32>
    %197 = vector.multi_reduction <add>, %196, %cst_70 [1] : vector<8x8xf32> to vector<8xf32>
    %198 = vector.shape_cast %197 : vector<8xf32> to vector<8x1xf32>
    %199 = tpu.reciprocal %198 {approx = true} : vector<8x1xf32> -> vector<8x1xf32>
    %200 = vector.broadcast %199 : vector<8x1xf32> to vector<8x8xf32>
    %201 = arith.mulf %196, %200 : vector<8x8xf32>
    %202 = arith.truncf %201 : vector<8x8xf32> to vector<8x8xbf16>
    %203 = vector.extract_strided_slice %154 {offsets = [0, 8], sizes = [8, 8], strides = [1, 1]} : vector<8x32xf32> to vector<8x8xf32>
    %204 = arith.truncf %203 : vector<8x8xf32> to vector<8x8xbf16>
    %cst_71 = arith.constant dense<0.000000e+00> : vector<8x8xf32>
    %205 = tpu.matmul %202, %204, %cst_71 {dimension_numbers = #tpu.dot_dimension_numbers<[1], [0], [0], [1], [0, 0, 1, 1], [], []>} : vector<8x8xbf16>, vector<8x8xbf16>, vector<8x8xf32> -> vector<8x8xf32>
    %206 = arith.truncf %205 : vector<8x8xf32> to vector<8x8xbf16>
    %207 = vector.extract_strided_slice %155 {offsets = [8, 0], sizes = [8, 32], strides = [1, 1]} : vector<32x32xbf16> to vector<8x32xbf16>
    %cst_72 = arith.constant dense<0.000000e+00> : vector<8x32xf32>
    %208 = tpu.matmul %206, %207, %cst_72 {dimension_numbers = #tpu.dot_dimension_numbers<[1], [0], [0], [1], [0, 0, 1, 1], [], []>} : vector<8x8xbf16>, vector<8x32xbf16>, vector<8x32xf32> -> vector<8x32xf32>
    %209 = arith.addf %184, %208 : vector<8x32xf32>
    %210 = vector.extract_strided_slice %152 {offsets = [0, 16], sizes = [8, 8], strides = [1, 1]} : vector<8x32xf32> to vector<8x8xf32>
    %211 = arith.truncf %210 : vector<8x8xf32> to vector<8x8xbf16>
    %212 = vector.extract_strided_slice %153 {offsets = [0, 16], sizes = [8, 8], strides = [1, 1]} : vector<8x32xf32> to vector<8x8xf32>
    %213 = arith.truncf %212 : vector<8x8xf32> to vector<8x8xbf16>
    %cst_73 = arith.constant dense<0.000000e+00> : vector<8x8xf32>
    %214 = tpu.matmul %211, %213, %cst_73 {dimension_numbers = #tpu.dot_dimension_numbers<[1], [1], [0], [0], [0, 0, 1, 0], [], []>} : vector<8x8xbf16>, vector<8x8xbf16>, vector<8x8xf32> -> vector<8x8xf32>
    %cst_74 = arith.constant 0.353553385 : f32
    %215 = vector.broadcast %cst_74 : f32 to vector<8x8xf32>
    %216 = arith.mulf %214, %215 : vector<8x8xf32>
    %cst_75 = arith.constant dense<0xFF800000> : vector<8xf32>
    %217 = vector.multi_reduction <maximumf>, %216, %cst_75 [1] : vector<8x8xf32> to vector<8xf32>
    %218 = vector.shape_cast %217 : vector<8xf32> to vector<8x1xf32>
    %219 = vector.broadcast %218 : vector<8x1xf32> to vector<8x8xf32>
    %220 = arith.subf %216, %219 : vector<8x8xf32>
    %221 = math.exp %220 : vector<8x8xf32>
    %cst_76 = arith.constant dense<0.000000e+00> : vector<8xf32>
    %222 = vector.multi_reduction <add>, %221, %cst_76 [1] : vector<8x8xf32> to vector<8xf32>
    %223 = vector.shape_cast %222 : vector<8xf32> to vector<8x1xf32>
    %224 = tpu.reciprocal %223 {approx = true} : vector<8x1xf32> -> vector<8x1xf32>
    %225 = vector.broadcast %224 : vector<8x1xf32> to vector<8x8xf32>
    %226 = arith.mulf %221, %225 : vector<8x8xf32>
    %227 = arith.truncf %226 : vector<8x8xf32> to vector<8x8xbf16>
    %228 = vector.extract_strided_slice %154 {offsets = [0, 16], sizes = [8, 8], strides = [1, 1]} : vector<8x32xf32> to vector<8x8xf32>
    %229 = arith.truncf %228 : vector<8x8xf32> to vector<8x8xbf16>
    %cst_77 = arith.constant dense<0.000000e+00> : vector<8x8xf32>
    %230 = tpu.matmul %227, %229, %cst_77 {dimension_numbers = #tpu.dot_dimension_numbers<[1], [0], [0], [1], [0, 0, 1, 1], [], []>} : vector<8x8xbf16>, vector<8x8xbf16>, vector<8x8xf32> -> vector<8x8xf32>
    %231 = arith.truncf %230 : vector<8x8xf32> to vector<8x8xbf16>
    %232 = vector.extract_strided_slice %155 {offsets = [16, 0], sizes = [8, 32], strides = [1, 1]} : vector<32x32xbf16> to vector<8x32xbf16>
    %cst_78 = arith.constant dense<0.000000e+00> : vector<8x32xf32>
    %233 = tpu.matmul %231, %232, %cst_78 {dimension_numbers = #tpu.dot_dimension_numbers<[1], [0], [0], [1], [0, 0, 1, 1], [], []>} : vector<8x8xbf16>, vector<8x32xbf16>, vector<8x32xf32> -> vector<8x32xf32>
    %234 = arith.addf %209, %233 : vector<8x32xf32>
    %235 = vector.extract_strided_slice %152 {offsets = [0, 24], sizes = [8, 8], strides = [1, 1]} : vector<8x32xf32> to vector<8x8xf32>
    %236 = arith.truncf %235 : vector<8x8xf32> to vector<8x8xbf16>
    %237 = vector.extract_strided_slice %153 {offsets = [0, 24], sizes = [8, 8], strides = [1, 1]} : vector<8x32xf32> to vector<8x8xf32>
    %238 = arith.truncf %237 : vector<8x8xf32> to vector<8x8xbf16>
    %cst_79 = arith.constant dense<0.000000e+00> : vector<8x8xf32>
    %239 = tpu.matmul %236, %238, %cst_79 {dimension_numbers = #tpu.dot_dimension_numbers<[1], [1], [0], [0], [0, 0, 1, 0], [], []>} : vector<8x8xbf16>, vector<8x8xbf16>, vector<8x8xf32> -> vector<8x8xf32>
    %cst_80 = arith.constant 0.353553385 : f32
    %240 = vector.broadcast %cst_80 : f32 to vector<8x8xf32>
    %241 = arith.mulf %239, %240 : vector<8x8xf32>
    %cst_81 = arith.constant dense<0xFF800000> : vector<8xf32>
    %242 = vector.multi_reduction <maximumf>, %241, %cst_81 [1] : vector<8x8xf32> to vector<8xf32>
    %243 = vector.shape_cast %242 : vector<8xf32> to vector<8x1xf32>
    %244 = vector.broadcast %243 : vector<8x1xf32> to vector<8x8xf32>
    %245 = arith.subf %241, %244 : vector<8x8xf32>
    %246 = math.exp %245 : vector<8x8xf32>
    %cst_82 = arith.constant dense<0.000000e+00> : vector<8xf32>
    %247 = vector.multi_reduction <add>, %246, %cst_82 [1] : vector<8x8xf32> to vector<8xf32>
    %248 = vector.shape_cast %247 : vector<8xf32> to vector<8x1xf32>
    %249 = tpu.reciprocal %248 {approx = true} : vector<8x1xf32> -> vector<8x1xf32>
    %250 = vector.broadcast %249 : vector<8x1xf32> to vector<8x8xf32>
    %251 = arith.mulf %246, %250 : vector<8x8xf32>
    %252 = arith.truncf %251 : vector<8x8xf32> to vector<8x8xbf16>
    %253 = vector.extract_strided_slice %154 {offsets = [0, 24], sizes = [8, 8], strides = [1, 1]} : vector<8x32xf32> to vector<8x8xf32>
    %254 = arith.truncf %253 : vector<8x8xf32> to vector<8x8xbf16>
    %cst_83 = arith.constant dense<0.000000e+00> : vector<8x8xf32>
    %255 = tpu.matmul %252, %254, %cst_83 {dimension_numbers = #tpu.dot_dimension_numbers<[1], [0], [0], [1], [0, 0, 1, 1], [], []>} : vector<8x8xbf16>, vector<8x8xbf16>, vector<8x8xf32> -> vector<8x8xf32>
    %256 = arith.truncf %255 : vector<8x8xf32> to vector<8x8xbf16>
    %257 = vector.extract_strided_slice %155 {offsets = [24, 0], sizes = [8, 32], strides = [1, 1]} : vector<32x32xbf16> to vector<8x32xbf16>
    %cst_84 = arith.constant dense<0.000000e+00> : vector<8x32xf32>
    %258 = tpu.matmul %256, %257, %cst_84 {dimension_numbers = #tpu.dot_dimension_numbers<[1], [0], [0], [1], [0, 0, 1, 1], [], []>} : vector<8x8xbf16>, vector<8x32xbf16>, vector<8x32xf32> -> vector<8x32xf32>
    %259 = arith.addf %234, %258 : vector<8x32xf32>
    %260 = arith.addf %145, %259 : vector<8x32xf32>
    %c0_85 = arith.constant 0 : index
    %c0_86 = arith.constant 0 : index
    %261 = vector.load %arg15[%c0_85, %c0_86] : memref<1x32xf32, #tpu.memory_space<vmem>>, vector<1x32xf32>
    %c0_87 = arith.constant 0 : index
    %c0_88 = arith.constant 0 : index
    %262 = vector.load %arg16[%c0_87, %c0_88] : memref<1x32xf32, #tpu.memory_space<vmem>>, vector<1x32xf32>
    %cst_89 = arith.constant dense<0.000000e+00> : vector<8xf32>
    %263 = vector.multi_reduction <add>, %260, %cst_89 [1] : vector<8x32xf32> to vector<8xf32>
    %264 = vector.shape_cast %263 : vector<8xf32> to vector<8x1xf32>
    %cst_90 = arith.constant 3.200000e+01 : f32
    %265 = vector.broadcast %cst_90 : f32 to vector<8x1xf32>
    %266 = arith.divf %264, %265 : vector<8x1xf32>
    %267 = vector.broadcast %266 : vector<8x1xf32> to vector<8x32xf32>
    %268 = arith.subf %260, %267 : vector<8x32xf32>
    %269 = arith.mulf %268, %268 : vector<8x32xf32>
    %cst_91 = arith.constant dense<0.000000e+00> : vector<8xf32>
    %270 = vector.multi_reduction <add>, %269, %cst_91 [1] : vector<8x32xf32> to vector<8xf32>
    %271 = vector.shape_cast %270 : vector<8xf32> to vector<8x1xf32>
    %cst_92 = arith.constant 3.200000e+01 : f32
    %272 = vector.broadcast %cst_92 : f32 to vector<8x1xf32>
    %273 = arith.divf %271, %272 : vector<8x1xf32>
    %274 = vector.broadcast %266 : vector<8x1xf32> to vector<8x32xf32>
    %275 = arith.subf %260, %274 : vector<8x32xf32>
    %cst_93 = arith.constant 9.99999974E-6 : f32
    %276 = vector.broadcast %cst_93 : f32 to vector<8x1xf32>
    %277 = arith.addf %273, %276 : vector<8x1xf32>
    %278 = math.rsqrt %277 : vector<8x1xf32>
    %279 = vector.broadcast %278 : vector<8x1xf32> to vector<8x32xf32>
    %280 = arith.mulf %275, %279 : vector<8x32xf32>
    %281 = vector.broadcast %261 : vector<1x32xf32> to vector<8x32xf32>
    %282 = arith.mulf %280, %281 : vector<8x32xf32>
    %283 = vector.broadcast %262 : vector<1x32xf32> to vector<8x32xf32>
    %284 = arith.addf %282, %283 : vector<8x32xf32>
    %c0_94 = arith.constant 0 : index
    %c0_95 = arith.constant 0 : index
    %285 = vector.load %arg17[%c0_94, %c0_95] : memref<32x64xbf16, #tpu.memory_space<vmem>>, vector<32x64xbf16>
    %c0_96 = arith.constant 0 : index
    %c0_97 = arith.constant 0 : index
    %286 = vector.load %arg18[%c0_96, %c0_97] : memref<1x64xf32, #tpu.memory_space<vmem>>, vector<1x64xf32>
    %287 = arith.truncf %284 : vector<8x32xf32> to vector<8x32xbf16>
    %cst_98 = arith.constant dense<0.000000e+00> : vector<8x64xf32>
    %288 = tpu.matmul %287, %285, %cst_98 {dimension_numbers = #tpu.dot_dimension_numbers<[1], [0], [0], [1], [0, 0, 1, 1], [], []>} : vector<8x32xbf16>, vector<32x64xbf16>, vector<8x64xf32> -> vector<8x64xf32>
    %289 = vector.broadcast %286 : vector<1x64xf32> to vector<8x64xf32>
    %290 = arith.addf %288, %289 : vector<8x64xf32>
    %cst_99 = arith.constant 0.000000e+00 : f32
    %291 = vector.broadcast %cst_99 : f32 to vector<8x64xf32>
    %292 = arith.maximumf %290, %291 : vector<8x64xf32>
    %c0_100 = arith.constant 0 : index
    %c0_101 = arith.constant 0 : index
    %293 = vector.load %arg19[%c0_100, %c0_101] : memref<64x32xbf16, #tpu.memory_space<vmem>>, vector<64x32xbf16>
    %c0_102 = arith.constant 0 : index
    %c0_103 = arith.constant 0 : index
    %294 = vector.load %arg20[%c0_102, %c0_103] : memref<1x32xf32, #tpu.memory_space<vmem>>, vector<1x32xf32>
    %295 = arith.truncf %292 : vector<8x64xf32> to vector<8x64xbf16>
    %cst_104 = arith.constant dense<0.000000e+00> : vector<8x32xf32>
    %296 = tpu.matmul %295, %293, %cst_104 {dimension_numbers = #tpu.dot_dimension_numbers<[1], [0], [0], [1], [0, 0, 1, 1], [], []>} : vector<8x64xbf16>, vector<64x32xbf16>, vector<8x32xf32> -> vector<8x32xf32>
    %297 = vector.broadcast %294 : vector<1x32xf32> to vector<8x32xf32>
    %298 = arith.addf %296, %297 : vector<8x32xf32>
    %299 = arith.addf %284, %298 : vector<8x32xf32>
    %c0_105 = arith.constant 0 : index
    %c0_106 = arith.constant 0 : index
    %300 = vector.load %arg21[%c0_105, %c0_106] : memref<1x32xf32, #tpu.memory_space<vmem>>, vector<1x32xf32>
    %c0_107 = arith.constant 0 : index
    %c0_108 = arith.constant 0 : index
    %301 = vector.load %arg22[%c0_107, %c0_108] : memref<1x32xf32, #tpu.memory_space<vmem>>, vector<1x32xf32>
    %cst_109 = arith.constant dense<0.000000e+00> : vector<8xf32>
    %302 = vector.multi_reduction <add>, %299, %cst_109 [1] : vector<8x32xf32> to vector<8xf32>
    %303 = vector.shape_cast %302 : vector<8xf32> to vector<8x1xf32>
    %cst_110 = arith.constant 3.200000e+01 : f32
    %304 = vector.broadcast %cst_110 : f32 to vector<8x1xf32>
    %305 = arith.divf %303, %304 : vector<8x1xf32>
    %306 = vector.broadcast %305 : vector<8x1xf32> to vector<8x32xf32>
    %307 = arith.subf %299, %306 : vector<8x32xf32>
    %308 = arith.mulf %307, %307 : vector<8x32xf32>
    %cst_111 = arith.constant dense<0.000000e+00> : vector<8xf32>
    %309 = vector.multi_reduction <add>, %308, %cst_111 [1] : vector<8x32xf32> to vector<8xf32>
    %310 = vector.shape_cast %309 : vector<8xf32> to vector<8x1xf32>
    %cst_112 = arith.constant 3.200000e+01 : f32
    %311 = vector.broadcast %cst_112 : f32 to vector<8x1xf32>
    %312 = arith.divf %310, %311 : vector<8x1xf32>
    %313 = vector.broadcast %305 : vector<8x1xf32> to vector<8x32xf32>
    %314 = arith.subf %299, %313 : vector<8x32xf32>
    %cst_113 = arith.constant 9.99999974E-6 : f32
    %315 = vector.broadcast %cst_113 : f32 to vector<8x1xf32>
    %316 = arith.addf %312, %315 : vector<8x1xf32>
    %317 = math.rsqrt %316 : vector<8x1xf32>
    %318 = vector.broadcast %317 : vector<8x1xf32> to vector<8x32xf32>
    %319 = arith.mulf %314, %318 : vector<8x32xf32>
    %320 = vector.broadcast %300 : vector<1x32xf32> to vector<8x32xf32>
    %321 = arith.mulf %319, %320 : vector<8x32xf32>
    %322 = vector.broadcast %301 : vector<1x32xf32> to vector<8x32xf32>
    %323 = arith.addf %321, %322 : vector<8x32xf32>
    %c0_114 = arith.constant 0 : index
    %c0_115 = arith.constant 0 : index
    %324 = vector.load %arg23[%c0_114, %c0_115] : memref<32x128xbf16, #tpu.memory_space<vmem>>, vector<32x128xbf16>
    %c0_116 = arith.constant 0 : index
    %c0_117 = arith.constant 0 : index
    %325 = vector.load %arg24[%c0_116, %c0_117] : memref<1x128xf32, #tpu.memory_space<vmem>>, vector<1x128xf32>
    %326 = arith.truncf %323 : vector<8x32xf32> to vector<8x32xbf16>
    %cst_118 = arith.constant dense<0.000000e+00> : vector<8x128xf32>
    %327 = tpu.matmul %326, %324, %cst_118 {dimension_numbers = #tpu.dot_dimension_numbers<[1], [0], [0], [1], [0, 0, 1, 1], [], []>} : vector<8x32xbf16>, vector<32x128xbf16>, vector<8x128xf32> -> vector<8x128xf32>
    %328 = vector.broadcast %325 : vector<1x128xf32> to vector<8x128xf32>
    %329 = arith.addf %327, %328 : vector<8x128xf32>
    %c0_119 = arith.constant 0 : index
    %c0_120 = arith.constant 0 : index
    %c0_121 = arith.constant 0 : index
    %330 = vector.load %arg29[%c0_119, %c0_120, %c0_121] : memref<1x8x128xf32, #tpu.memory_space<vmem>>, vector<1x8x128xf32>
    %331 = vector.shape_cast %330 : vector<1x8x128xf32> to vector<8x128xf32>
    %332 = vector.shape_cast %329 : vector<8x128xf32> to vector<1x8x128xf32>
    tpu.vector_store %arg29[%c0_119, %c0_120, %c0_121], %332 {strides = array<i32>} : memref<1x8x128xf32, #tpu.memory_space<vmem>>, vector<1x8x128xf32>,
    %c0_122 = arith.constant 0 : index
    %c0_123 = arith.constant 0 : index
    %333 = vector.load %arg25[%c0_122, %c0_123] : memref<32x32xbf16, #tpu.memory_space<vmem>>, vector<32x32xbf16>
    %c0_124 = arith.constant 0 : index
    %c0_125 = arith.constant 0 : index
    %334 = vector.load %arg26[%c0_124, %c0_125] : memref<1x32xf32, #tpu.memory_space<vmem>>, vector<1x32xf32>
    %335 = arith.truncf %323 : vector<8x32xf32> to vector<8x32xbf16>
    %cst_126 = arith.constant dense<0.000000e+00> : vector<8x32xf32>
    %336 = tpu.matmul %335, %333, %cst_126 {dimension_numbers = #tpu.dot_dimension_numbers<[1], [0], [0], [1], [0, 0, 1, 1], [], []>} : vector<8x32xbf16>, vector<32x32xbf16>, vector<8x32xf32> -> vector<8x32xf32>
    %337 = vector.broadcast %334 : vector<1x32xf32> to vector<8x32xf32>
    %338 = arith.addf %336, %337 : vector<8x32xf32>
    %cst_127 = arith.constant 0.000000e+00 : f32
    %339 = vector.broadcast %cst_127 : f32 to vector<8x32xf32>
    %340 = arith.maximumf %338, %339 : vector<8x32xf32>
    %c0_128 = arith.constant 0 : index
    %c0_129 = arith.constant 0 : index
    %341 = vector.load %arg27[%c0_128, %c0_129] : memref<32x32xbf16, #tpu.memory_space<vmem>>, vector<32x32xbf16>
    %c0_130 = arith.constant 0 : index
    %c0_131 = arith.constant 0 : index
    %342 = vector.load %arg28[%c0_130, %c0_131] : memref<1x32xf32, #tpu.memory_space<vmem>>, vector<1x32xf32>
    %343 = arith.truncf %340 : vector<8x32xf32> to vector<8x32xbf16>
    %cst_132 = arith.constant dense<0.000000e+00> : vector<8x32xf32>
    %344 = tpu.matmul %343, %341, %cst_132 {dimension_numbers = #tpu.dot_dimension_numbers<[1], [0], [0], [1], [0, 0, 1, 1], [], []>} : vector<8x32xbf16>, vector<32x32xbf16>, vector<8x32xf32> -> vector<8x32xf32>
    %345 = vector.broadcast %342 : vector<1x32xf32> to vector<8x32xf32>
    %346 = arith.addf %344, %345 : vector<8x32xf32>
    %c0_133 = arith.constant 0 : index
    %c0_134 = arith.constant 0 : index
    %c0_135 = arith.constant 0 : index
    %347 = vector.load %arg30[%c0_133, %c0_134, %c0_135] : memref<1x8x32xf32, #tpu.memory_space<vmem>>, vector<1x8x32xf32>
    %348 = vector.shape_cast %347 : vector<1x8x32xf32> to vector<8x32xf32>
    %349 = vector.shape_cast %346 : vector<8x32xf32> to vector<1x8x32xf32>
    tpu.vector_store %arg30[%c0_133, %c0_134, %c0_135], %349 {strides = array<i32>} : memref<1x8x32xf32, #tpu.memory_space<vmem>>, vector<1x8x32xf32>,
    return
  }
  func.func @transform_0(%arg0: i32) -> (i32, i32, i32) {
    %c0_i32 = arith.constant 0 : i32
    %c0_i32_0 = arith.constant 0 : i32
    %c0_i32_1 = arith.constant 0 : i32
    return %arg0, %c0_i32, %c0_i32_0 : i32, i32, i32
  }
  func.func @transform_1(%arg0: i32) -> (i32, i32) {
    %c0_i32 = arith.constant 0 : i32
    %c0_i32_0 = arith.constant 0 : i32
    %c0_i32_1 = arith.constant 0 : i32
    return %c0_i32, %c0_i32_0 : i32, i32
  }
  func.func @transform_2(%arg0: i32) -> (i32, i32) {
    %c0_i32 = arith.constant 0 : i32
    %c0_i32_0 = arith.constant 0 : i32
    %c0_i32_1 = arith.constant 0 : i32
    return %c0_i32, %c0_i32_0 : i32, i32
  }
  func.func @transform_3(%arg0: i32) -> (i32, i32) {
    %c0_i32 = arith.constant 0 : i32
    %c0_i32_0 = arith.constant 0 : i32
    %c0_i32_1 = arith.constant 0 : i32
    return %c0_i32, %c0_i32_0 : i32, i32
  }
  func.func @transform_4(%arg0: i32) -> (i32, i32) {
    %c0_i32 = arith.constant 0 : i32
    %c0_i32_0 = arith.constant 0 : i32
    %c0_i32_1 = arith.constant 0 : i32
    return %c0_i32, %c0_i32_0 : i32, i32
  }
  func.func @transform_5(%arg0: i32) -> (i32, i32) {
    %c0_i32 = arith.constant 0 : i32
    %c0_i32_0 = arith.constant 0 : i32
    %c0_i32_1 = arith.constant 0 : i32
    return %c0_i32, %c0_i32_0 : i32, i32
  }
  func.func @transform_6(%arg0: i32) -> (i32, i32) {
    %c0_i32 = arith.constant 0 : i32
    %c0_i32_0 = arith.constant 0 : i32
    %c0_i32_1 = arith.constant 0 : i32
    return %c0_i32, %c0_i32_0 : i32, i32
  }
  func.func @transform_7(%arg0: i32) -> (i32, i32) {
    %c0_i32 = arith.constant 0 : i32
    %c0_i32_0 = arith.constant 0 : i32
    %c0_i32_1 = arith.constant 0 : i32
    return %c0_i32, %c0_i32_0 : i32, i32
  }
  func.func @transform_8(%arg0: i32) -> (i32, i32) {
    %c0_i32 = arith.constant 0 : i32
    %c0_i32_0 = arith.constant 0 : i32
    %c0_i32_1 = arith.constant 0 : i32
    return %c0_i32, %c0_i32_0 : i32, i32
  }
  func.func @transform_9(%arg0: i32) -> (i32, i32) {
    %c0_i32 = arith.constant 0 : i32
    %c0_i32_0 = arith.constant 0 : i32
    %c0_i32_1 = arith.constant 0 : i32
    return %c0_i32, %c0_i32_0 : i32, i32
  }
  func.func @transform_10(%arg0: i32) -> (i32, i32) {
    %c0_i32 = arith.constant 0 : i32
    %c0_i32_0 = arith.constant 0 : i32
    %c0_i32_1 = arith.constant 0 : i32
    return %c0_i32, %c0_i32_0 : i32, i32
  }
  func.func @transform_11(%arg0: i32) -> (i32, i32) {
    %c0_i32 = arith.constant 0 : i32
    %c0_i32_0 = arith.constant 0 : i32
    %c0_i32_1 = arith.constant 0 : i32
    return %c0_i32, %c0_i32_0 : i32, i32
  }
  func.func @transform_12(%arg0: i32) -> (i32, i32) {
    %c0_i32 = arith.constant 0 : i32
    %c0_i32_0 = arith.constant 0 : i32
    %c0_i32_1 = arith.constant 0 : i32
    return %c0_i32, %c0_i32_0 : i32, i32
  }
  func.func @transform_13(%arg0: i32) -> (i32, i32) {
    %c0_i32 = arith.constant 0 : i32
    %c0_i32_0 = arith.constant 0 : i32
    %c0_i32_1 = arith.constant 0 : i32
    return %c0_i32, %c0_i32_0 : i32, i32
  }
  func.func @transform_14(%arg0: i32) -> (i32, i32) {
    %c0_i32 = arith.constant 0 : i32
    %c0_i32_0 = arith.constant 0 : i32
    %c0_i32_1 = arith.constant 0 : i32
    return %c0_i32, %c0_i32_0 : i32, i32
  }
  func.func @transform_15(%arg0: i32) -> (i32, i32) {
    %c0_i32 = arith.constant 0 : i32
    %c0_i32_0 = arith.constant 0 : i32
    %c0_i32_1 = arith.constant 0 : i32
    return %c0_i32, %c0_i32_0 : i32, i32
  }
  func.func @transform_16(%arg0: i32) -> (i32, i32) {
    %c0_i32 = arith.constant 0 : i32
    %c0_i32_0 = arith.constant 0 : i32
    %c0_i32_1 = arith.constant 0 : i32
    return %c0_i32, %c0_i32_0 : i32, i32
  }
  func.func @transform_17(%arg0: i32) -> (i32, i32) {
    %c0_i32 = arith.constant 0 : i32
    %c0_i32_0 = arith.constant 0 : i32
    %c0_i32_1 = arith.constant 0 : i32
    return %c0_i32, %c0_i32_0 : i32, i32
  }
  func.func @transform_18(%arg0: i32) -> (i32, i32) {
    %c0_i32 = arith.constant 0 : i32
    %c0_i32_0 = arith.constant 0 : i32
    %c0_i32_1 = arith.constant 0 : i32
    return %c0_i32, %c0_i32_0 : i32, i32
  }
  func.func @transform_19(%arg0: i32) -> (i32, i32) {
    %c0_i32 = arith.constant 0 : i32
    %c0_i32_0 = arith.constant 0 : i32
    %c0_i32_1 = arith.constant 0 : i32
    return %c0_i32, %c0_i32_0 : i32, i32
  }
  func.func @transform_20(%arg0: i32) -> (i32, i32) {
    %c0_i32 = arith.constant 0 : i32
    %c0_i32_0 = arith.constant 0 : i32
    %c0_i32_1 = arith.constant 0 : i32
    return %c0_i32, %c0_i32_0 : i32, i32
  }
  func.func @transform_21(%arg0: i32) -> (i32, i32) {
    %c0_i32 = arith.constant 0 : i32
    %c0_i32_0 = arith.constant 0 : i32
    %c0_i32_1 = arith.constant 0 : i32
    return %c0_i32, %c0_i32_0 : i32, i32
  }
  func.func @transform_22(%arg0: i32) -> (i32, i32) {
    %c0_i32 = arith.constant 0 : i32
    %c0_i32_0 = arith.constant 0 : i32
    %c0_i32_1 = arith.constant 0 : i32
    return %c0_i32, %c0_i32_0 : i32, i32
  }
  func.func @transform_23(%arg0: i32) -> (i32, i32) {
    %c0_i32 = arith.constant 0 : i32
    %c0_i32_0 = arith.constant 0 : i32
    %c0_i32_1 = arith.constant 0 : i32
    return %c0_i32, %c0_i32_0 : i32, i32
  }
  func.func @transform_24(%arg0: i32) -> (i32, i32) {
    %c0_i32 = arith.constant 0 : i32
    %c0_i32_0 = arith.constant 0 : i32
    %c0_i32_1 = arith.constant 0 : i32
    return %c0_i32, %c0_i32_0 : i32, i32
  }
  func.func @transform_25(%arg0: i32) -> (i32, i32) {
    %c0_i32 = arith.constant 0 : i32
    %c0_i32_0 = arith.constant 0 : i32
    %c0_i32_1 = arith.constant 0 : i32
    return %c0_i32, %c0_i32_0 : i32, i32
  }
  func.func @transform_26(%arg0: i32) -> (i32, i32) {
    %c0_i32 = arith.constant 0 : i32
    %c0_i32_0 = arith.constant 0 : i32
    %c0_i32_1 = arith.constant 0 : i32
    return %c0_i32, %c0_i32_0 : i32, i32
  }
  func.func @transform_27(%arg0: i32) -> (i32, i32) {
    %c0_i32 = arith.constant 0 : i32
    %c0_i32_0 = arith.constant 0 : i32
    %c0_i32_1 = arith.constant 0 : i32
    return %c0_i32, %c0_i32_0 : i32, i32
  }
  func.func @transform_28(%arg0: i32) -> (i32, i32, i32) {
    %c0_i32 = arith.constant 0 : i32
    %c0_i32_0 = arith.constant 0 : i32
    %c0_i32_1 = arith.constant 0 : i32
    return %arg0, %c0_i32, %c0_i32_0 : i32, i32, i32
  }
  func.func @transform_29(%arg0: i32) -> (i32, i32, i32) {
    %c0_i32 = arith.constant 0 : i32
    %c0_i32_0 = arith.constant 0 : i32
    %c0_i32_1 = arith.constant 0 : i32
    return %arg0, %c0_i32, %c0_i32_0 : i32, i32, i32
  }
}

module attributes {stable_mosaic.version = 11 : i64} {
  func.func @_mask_matmul_kernel(%arg0: i32, %arg1: i32, %arg2: memref<1x8x32xbf16, #tpu.memory_space<vmem>>, %arg3: memref<1x128x32xbf16, #tpu.memory_space<vmem>>, %arg4: memref<1x8x128xf32, #tpu.memory_space<vmem>>) attributes {dimension_semantics = [#tpu.dimension_semantics<parallel>, #tpu.dimension_semantics<parallel>], iteration_bounds = array<i64: 2, 1>, scalar_prefetch = 0 : i64, scratch_operands = 0 : i64, tpu.core_type = #tpu.core_type<tc>, window_params = [{transform_indices = @transform_0, window_bounds = array<i64: 1, 8, 32>}, {transform_indices = @transform_1, window_bounds = array<i64: 1, 128, 32>}, {transform_indices = @transform_2, window_bounds = array<i64: 1, 8, 128>}]} {
    %c0 = arith.constant 0 : index
    %c0_0 = arith.constant 0 : index
    %c0_1 = arith.constant 0 : index
    %0 = vector.load %arg2[%c0, %c0_0, %c0_1] : memref<1x8x32xbf16, #tpu.memory_space<vmem>>, vector<1x8x32xbf16>
    %1 = vector.shape_cast %0 : vector<1x8x32xbf16> to vector<8x32xbf16>
    %c0_2 = arith.constant 0 : index
    %c0_3 = arith.constant 0 : index
    %c0_4 = arith.constant 0 : index
    %2 = vector.load %arg3[%c0_2, %c0_3, %c0_4] : memref<1x128x32xbf16, #tpu.memory_space<vmem>>, vector<1x128x32xbf16>
    %3 = vector.shape_cast %2 : vector<1x128x32xbf16> to vector<128x32xbf16>
    %cst = arith.constant dense<0.000000e+00> : vector<8x128xf32>
    %4 = tpu.matmul %1, %3, %cst {dimension_numbers = #tpu.dot_dimension_numbers<[1], [1], [0], [0], [0, 0, 1, 0], [], []>} : vector<8x32xbf16>, vector<128x32xbf16>, vector<8x128xf32> -> vector<8x128xf32>
    %c0_5 = arith.constant 0 : index
    %c0_6 = arith.constant 0 : index
    %c0_7 = arith.constant 0 : index
    %5 = vector.load %arg4[%c0_5, %c0_6, %c0_7] : memref<1x8x128xf32, #tpu.memory_space<vmem>>, vector<1x8x128xf32>
    %6 = vector.shape_cast %5 : vector<1x8x128xf32> to vector<8x128xf32>
    %7 = vector.shape_cast %4 : vector<8x128xf32> to vector<1x8x128xf32>
    tpu.vector_store %arg4[%c0_5, %c0_6, %c0_7], %7 {strides = array<i32>} : memref<1x8x128xf32, #tpu.memory_space<vmem>>, vector<1x8x128xf32>,
    return
  }
  func.func @transform_0(%arg0: i32, %arg1: i32) -> (i32, i32, i32) {
    %c0_i32 = arith.constant 0 : i32
    %c0_i32_0 = arith.constant 0 : i32
    %c0_i32_1 = arith.constant 0 : i32
    return %arg0, %c0_i32, %c0_i32_0 : i32, i32, i32
  }
  func.func @transform_1(%arg0: i32, %arg1: i32) -> (i32, i32, i32) {
    %c0_i32 = arith.constant 0 : i32
    %c0_i32_0 = arith.constant 0 : i32
    return %arg0, %arg1, %c0_i32 : i32, i32, i32
  }
  func.func @transform_2(%arg0: i32, %arg1: i32) -> (i32, i32, i32) {
    %c0_i32 = arith.constant 0 : i32
    %c0_i32_0 = arith.constant 0 : i32
    return %arg0, %c0_i32, %arg1 : i32, i32, i32
  }
}

module attributes {stable_mosaic.version = 11 : i64} {
  func.func @_mm_bias_kernel(%arg0: i32, %arg1: i32, %arg2: i32, %arg3: memref<32x128xbf16, #tpu.memory_space<vmem>>, %arg4: memref<128x128xbf16, #tpu.memory_space<vmem>>, %arg5: memref<1x128xf32, #tpu.memory_space<vmem>>, %arg6: memref<32x128xf32, #tpu.memory_space<vmem>>, %arg7: memref<32x128xf32, #tpu.memory_space<vmem>>) attributes {dimension_semantics = [#tpu.dimension_semantics<parallel>, #tpu.dimension_semantics<parallel>, #tpu.dimension_semantics<arbitrary>], iteration_bounds = array<i64: 1, 1, 1>, scalar_prefetch = 0 : i64, scratch_operands = 1 : i64, tpu.core_type = #tpu.core_type<tc>, window_params = [{transform_indices = @transform_0, window_bounds = array<i64: 32, 128>}, {transform_indices = @transform_1, window_bounds = array<i64: 128, 128>}, {transform_indices = @transform_2, window_bounds = array<i64: 1, 128>}, {transform_indices = @transform_3, window_bounds = array<i64: 32, 128>}]} {
    %c0_i32 = arith.constant 0 : i32
    %0 = arith.cmpi eq, %arg2, %c0_i32 : i32
    %1 = arith.extui %0 : i1 to i32
    %c0_i32_0 = arith.constant 0 : i32
    %2 = arith.cmpi ne, %1, %c0_i32_0 : i32
    scf.if %2 {
      %cst_10 = arith.constant 0.000000e+00 : f32
      %12 = vector.broadcast %cst_10 : f32 to vector<32x128xf32>
      %c0_11 = arith.constant 0 : index
      %c0_12 = arith.constant 0 : index
      %13 = vector.load %arg7[%c0_11, %c0_12] : memref<32x128xf32, #tpu.memory_space<vmem>>, vector<32x128xf32>
      tpu.vector_store %arg7[%c0_11, %c0_12], %12 {strides = array<i32>} : memref<32x128xf32, #tpu.memory_space<vmem>>, vector<32x128xf32>,
    } else {
    }
    %c0 = arith.constant 0 : index
    %c0_1 = arith.constant 0 : index
    %3 = vector.load %arg7[%c0, %c0_1] : memref<32x128xf32, #tpu.memory_space<vmem>>, vector<32x128xf32>
    %c0_2 = arith.constant 0 : index
    %c0_3 = arith.constant 0 : index
    %4 = vector.load %arg3[%c0_2, %c0_3] : memref<32x128xbf16, #tpu.memory_space<vmem>>, vector<32x128xbf16>
    %c0_4 = arith.constant 0 : index
    %c0_5 = arith.constant 0 : index
    %5 = vector.load %arg4[%c0_4, %c0_5] : memref<128x128xbf16, #tpu.memory_space<vmem>>, vector<128x128xbf16>
    %cst = arith.constant dense<0.000000e+00> : vector<32x128xf32>
    %6 = tpu.matmul %4, %5, %cst {dimension_numbers = #tpu.dot_dimension_numbers<[1], [0], [0], [1], [0, 0, 1, 1], [], []>} : vector<32x128xbf16>, vector<128x128xbf16>, vector<32x128xf32> -> vector<32x128xf32>
    %7 = arith.addf %3, %6 : vector<32x128xf32>
    %c0_6 = arith.constant 0 : index
    %c0_7 = arith.constant 0 : index
    %8 = vector.load %arg7[%c0_6, %c0_7] : memref<32x128xf32, #tpu.memory_space<vmem>>, vector<32x128xf32>
    tpu.vector_store %arg7[%c0_6, %c0_7], %7 {strides = array<i32>} : memref<32x128xf32, #tpu.memory_space<vmem>>, vector<32x128xf32>,
    %c0_i32_8 = arith.constant 0 : i32
    %9 = arith.cmpi eq, %arg2, %c0_i32_8 : i32
    %10 = arith.extui %9 : i1 to i32
    %c0_i32_9 = arith.constant 0 : i32
    %11 = arith.cmpi ne, %10, %c0_i32_9 : i32
    scf.if %11 {
      %c0_10 = arith.constant 0 : index
      %c0_11 = arith.constant 0 : index
      %12 = vector.load %arg7[%c0_10, %c0_11] : memref<32x128xf32, #tpu.memory_space<vmem>>, vector<32x128xf32>
      %c0_12 = arith.constant 0 : index
      %c0_13 = arith.constant 0 : index
      %13 = vector.load %arg5[%c0_12, %c0_13] : memref<1x128xf32, #tpu.memory_space<vmem>>, vector<1x128xf32>
      %14 = vector.broadcast %13 : vector<1x128xf32> to vector<32x128xf32>
      %15 = arith.addf %12, %14 : vector<32x128xf32>
      %c0_14 = arith.constant 0 : index
      %c0_15 = arith.constant 0 : index
      %16 = vector.load %arg6[%c0_14, %c0_15] : memref<32x128xf32, #tpu.memory_space<vmem>>, vector<32x128xf32>
      tpu.vector_store %arg6[%c0_14, %c0_15], %15 {strides = array<i32>} : memref<32x128xf32, #tpu.memory_space<vmem>>, vector<32x128xf32>,
    } else {
    }
    return
  }
  func.func @transform_0(%arg0: i32, %arg1: i32, %arg2: i32) -> (i32, i32) {
    %c0_i32 = arith.constant 0 : i32
    return %arg0, %arg2 : i32, i32
  }
  func.func @transform_1(%arg0: i32, %arg1: i32, %arg2: i32) -> (i32, i32) {
    %c0_i32 = arith.constant 0 : i32
    return %arg2, %arg1 : i32, i32
  }
  func.func @transform_2(%arg0: i32, %arg1: i32, %arg2: i32) -> (i32, i32) {
    %c0_i32 = arith.constant 0 : i32
    %c0_i32_0 = arith.constant 0 : i32
    return %c0_i32, %arg1 : i32, i32
  }
  func.func @transform_3(%arg0: i32, %arg1: i32, %arg2: i32) -> (i32, i32) {
    %c0_i32 = arith.constant 0 : i32
    return %arg0, %arg1 : i32, i32
  }
}

</mosaic_0001>

<bundles_post_ra>
// kernel: extended_mask2former_forward.10
= control target key start
LH: loop header
LB: loop body
LE: loop exit
PB: predicated region body
PF: predicated region fallthrough
CT: control target
= control target key end

     0   :  { %s1499_s12 = smov 0   ;;  %s1501_s13 = smov 0   ;;  %s1636_s0 = inlined_call_operand.vmem [shape: bf16[512,128], index: 0, kind: input, shape index: {}]   ;;  %s1637_s1 = inlined_call_operand.vmem [shape: bf16[128,128], index: 1, kind: input, shape index: {}]   ;;  %s1638_s2 = inlined_call_operand.vmem [shape: f32[1,128], index: 2, kind: input, shape index: {}]   ;;  %s1639_s3 = inlined_call_operand.vmem [shape: bf16[512,128], index: 3, kind: output, shape index: {}]  }
   0x1   :  { %s1503_s14 = smov 0  }
   0x2 LB: > { %s32_s15 = sadd.s32 1, %s1473_s13  ;;  %p1128_p0 = scmp.ge.s32.totalorder %s1477_s14, 1  ;;  %s1477_s14 = sphi %s1503_s14, %s13_s14   ;;  %s1473_s13 = sphi %s1501_s13, %s1641_s13   ;;  %s1469_s12 = sphi %s1499_s12, %s1640_s12  }
   0x3   : > { %p34_p1 = scmp.ge.s32.totalorder %s32_s15, 2  ;;  %p188_p2 = scmp.lt.s32.totalorder %s1477_s14, 3 }
   0x5   : > { %s1643_s15 = smov (%p34_p1, %s32_s15), 0  ;;  %p189_p3 = pnand %p1128_p0, %p188_p2 }
   0x6   : > { %s1129_s18 = sshll.u32 (!%p189_p3), %s1469_s12, 5 }
   0x7   : > { %192 = sbr.rel (%p189_p3) target bundleno = 275 (0x113), region = 32  ;;  %p230_p4 = scmp.lt.s32.totalorder (!%p189_p3), %s1129_s18, 63 }
   0xc   : > { %v1431_v0 = vld [vmem:[%s1637_s1 + $0x38] sm:$0xff]   ;;  %v1432_v1 = vld [vmem:[%s1637_s1 + $0x30] sm:$0xff]   ;;  %s1645_s18 = smov (!%p230_p4, %s1129_s18), 63  ;;  %v1433_v2 = vld [vmem:[%s1637_s1 + $0x28] sm:$0xff]  }
   0xd   : > { %1343 = vmatprep.subr.bf16.mxu0 %v1431_v0  ;;  %1391 = vmatprep.subr.bf16.mxu1 %v1431_v0  ;;  %s1130_s23 = sshll.u32 %s1645_s18, 2  ;;  %v1434_v3 = vld [vmem:[%s1637_s1 + $0x20] sm:$0xff]   ;;  %v1435_v6 = vld [vmem:[%s1637_s1 + $0x18] sm:$0xff]   ;;  %v1436_v7 = vld [vmem:[%s1637_s1 + $0x10] sm:$0xff]  }
   0xe   : > { %1344 = vmatpush3.bf16.msra.mxu0 %v1431_v0  ;;  %1399 = vmatpush3.bf16.msra.mxu1 %v1431_v0  ;;  %s1534_s26 = scalar_lea.vmem %s1636_s0, %s1130_s23  ;;  %v1437_v8 = vld [vmem:[%s1637_s1 + $0x8] sm:$0xff]   ;;  %v1438_v9 = vld [vmem:[%s1637_s1] sm:$0xff]   ;;  %s1585_s17 = scalar_lea.vmem %s1639_s3, %s1130_s23 }
   0xf   : > { %1345 = vmatprep.subr.bf16.mxu0 %v1432_v1  ;;  %1392 = vmatprep.subr.bf16.mxu1 %v1432_v1  ;;  %v1439_v4 = vld [vmem:[%s1534_s26] sm:$0xff]   ;;  %v1441_v10 = vld [vmem:[%s1534_s26 + $0x8] sm:$0xff]   ;;  %v1443_v12 = vld [vmem:[%s1534_s26 + $0x10] sm:$0xff]  }
  0x10   : > { %v1440_v5 = vld [vmem:[%s1534_s26 + $0x40] sm:$0xff]   ;;  %1359 = vmatprep.mubr.bf16.mxu0 %v1439_v4  ;;  %v1442_v11 = vld [vmem:[%s1534_s26 + $0x48] sm:$0xff]   ;;  %v1444_v13 = vld [vmem:[%s1534_s26 + $0x50] sm:$0xff]  }
  0x11   : > { %1375 = vmatprep.mubr.bf16.mxu1 %v1440_v5  ;;  %v1445_v14 = vld [vmem:[%s1534_s26 + $0x18] sm:$0xff]   ;;  %v1447_v16 = vld [vmem:[%s1534_s26 + $0x20] sm:$0xff]   ;;  %v1449_v18 = vld [vmem:[%s1534_s26 + $0x28] sm:$0xff]  }
  0x12   : > { %1346 = vmatpush3.bf16.msra.mxu0 %v1432_v1  ;;  %1400 = vmatpush3.bf16.msra.mxu1 %v1432_v1  ;;  %v1446_v15 = vld [vmem:[%s1534_s26 + $0x58] sm:$0xff]   ;;  %v1448_v17 = vld [vmem:[%s1534_s26 + $0x60] sm:$0xff]   ;;  %v1450_v19 = vld [vmem:[%s1534_s26 + $0x68] sm:$0xff]  }
  0x13   : > { %1347 = vmatprep.subr.bf16.mxu0 %v1433_v2  ;;  %1393 = vmatprep.subr.bf16.mxu1 %v1433_v2  ;;  %v1451_v20 = vld [vmem:[%s1534_s26 + $0x30] sm:$0xff]   ;;  %v1453_v22 = vld [vmem:[%s1534_s26 + $0x38] sm:$0xff]   ;;  %v1570_v24 = vld [vmem:[%s1638_s2] ss:$0 sm:$0xff] }
  0x14   : > { %v1452_v21 = vld [vmem:[%s1534_s26 + $0x70] sm:$0xff]   ;;  %v1454_v23 = vld [vmem:[%s1534_s26 + $0x78] sm:$0xff]  }
  0x16   : > { %1348 = vmatpush3.bf16.msra.mxu0 %v1433_v2  ;;  %1401 = vmatpush3.bf16.msra.mxu1 %v1433_v2 }
  0x17   : > { %1349 = vmatprep.subr.bf16.mxu0 %v1434_v3  ;;  %1394 = vmatprep.subr.bf16.mxu1 %v1434_v3 }
  0x1a   : > { %1350 = vmatpush3.bf16.msra.mxu0 %v1434_v3  ;;  %1402 = vmatpush3.bf16.msra.mxu1 %v1434_v3 }
  0x1b   : > { %1351 = vmatprep.subr.bf16.mxu0 %v1435_v6  ;;  %1395 = vmatprep.subr.bf16.mxu1 %v1435_v6 }
  0x1e   : > { %1352 = vmatpush3.bf16.msra.mxu0 %v1435_v6  ;;  %1403 = vmatpush3.bf16.msra.mxu1 %v1435_v6 }
  0x1f   : > { %1353 = vmatprep.subr.bf16.mxu0 %v1436_v7  ;;  %1396 = vmatprep.subr.bf16.mxu1 %v1436_v7 }
  0x22   : > { %1354 = vmatpush3.bf16.msra.mxu0 %v1436_v7  ;;  %1404 = vmatpush3.bf16.msra.mxu1 %v1436_v7 }
  0x23   : > { %1355 = vmatprep.subr.bf16.mxu0 %v1437_v8  ;;  %1397 = vmatprep.subr.bf16.mxu1 %v1437_v8 }
  0x26   : > { %1356 = vmatpush3.bf16.msra.mxu0 %v1437_v8  ;;  %1405 = vmatpush3.bf16.msra.mxu1 %v1437_v8 }
  0x27   : > { %1357 = vmatprep.subr.bf16.mxu0 %v1438_v9  ;;  %1398 = vmatprep.subr.bf16.mxu1 %v1438_v9 }
  0x2a   : > { %1358 = vmatpush3.bf16.msra.mxu0 %v1438_v9  ;;  %1406 = vmatpush3.bf16.msra.mxu1 %v1438_v9 }
  0x2d   : > { %1360 = vmatmul.mubr.bf16.vlgmr.msra.gmra.mxu0 %v1441_v10  ;;  %1376 = vmatmul.mubr.bf16.vlgmr.msra.gmra.mxu1 %v1442_v11 }
  0x2e   : > { %1363 = vmatprep.mubr.bf16.mxu0 %v1443_v12  ;;  %1379 = vmatprep.mubr.bf16.mxu1 %v1444_v13 }
  0x35   : > { %1364 = vmatmul.mubr.bf16.gmra.mxu0 %v1445_v14  ;;  %1380 = vmatmul.mubr.bf16.gmra.mxu1 %v1446_v15 }
  0x36   : > { %1367 = vmatprep.mubr.bf16.mxu0 %v1447_v16  ;;  %1383 = vmatprep.mubr.bf16.mxu1 %v1448_v17 }
  0x3d   : > { %1368 = vmatmul.mubr.bf16.gmra.mxu0 %v1449_v18  ;;  %1384 = vmatmul.mubr.bf16.gmra.mxu1 %v1450_v19 }
  0x3e   : > { %1371 = vmatprep.mubr.bf16.mxu0 %v1451_v20  ;;  %1387 = vmatprep.mubr.bf16.mxu1 %v1452_v21 }
  0x45   : > { %1372 = vmatmul.mubr.bf16.gmra.mxu0 %v1453_v22  ;;  %1388 = vmatmul.mubr.bf16.gmra.mxu1 %v1454_v23 }
  0xed   : > { %v1361_v25 = vpop.f32.mrf.mxu0  ;;  %v1377_v26 = vpop.f32.mrf.mxu1 }
  0xee   : > { %v789_v27 = vadd.f32 %v1361_v25, %v1570_v24  ;;  %v805_v28 = vadd.f32 %v1377_v26, %v1570_v24 }
  0xef   : > { %v554_v29 = vpop.f32.mrf.mxu0  ;;  %v618_v30 = vpop.f32.mrf.mxu1 }
  0xf0   : > { %v787_v31 = vadd.f32 %v1570_v24, %v554_v29  ;;  %v803_v32 = vadd.f32 %v1570_v24, %v618_v30  ;;  %v821_v37 = vmax.f32 %v789_v27, 0.0  ;;  %v837_v38 = vmax.f32 %v805_v28, 0.0 }
  0xf1   : > { %v1362_v33 = vpop.f32.mrf.mxu0  ;;  %v1378_v34 = vpop.f32.mrf.mxu1 }
  0xf2   : > { %v790_v35 = vadd.f32 %v1362_v33, %v1570_v24  ;;  %v806_v36 = vadd.f32 %v1378_v34, %v1570_v24  ;;  %v819_v45 = vmax.f32 %v787_v31, 0.0  ;;  %v835_v46 = vmax.f32 %v803_v32, 0.0 }
  0xf3   : > { %v557_v39 = vpop.f32.mrf.mxu0  ;;  %v621_v40 = vpop.f32.mrf.mxu1 }
  0xf4   : > { %v822_v41 = vmax.f32 %v790_v35, 0.0  ;;  %v838_v42 = vmax.f32 %v806_v36, 0.0  ;;  %v788_v43 = vadd.f32 %v1570_v24, %v557_v39  ;;  %v804_v44 = vadd.f32 %v1570_v24, %v621_v40 }
  0xf5   : > { %v1365_v47 = vpop.f32.mrf.mxu0  ;;  %v1381_v48 = vpop.f32.mrf.mxu1 }
  0xf6   : > { %v1232_v49 = vpack.c.bf16 %v822_v41, %v821_v37  ;;  %v1272_v50 = vpack.c.bf16 %v838_v42, %v837_v38  ;;  %v820_v51 = vmax.f32 %v788_v43, 0.0  ;;  %v836_v52 = vmax.f32 %v804_v44, 0.0 }
  0xf7   : > { %v793_v53 = vadd.f32 %v1365_v47, %v1570_v24  ;;  %v809_v54 = vadd.f32 %v1381_v48, %v1570_v24  ;;  %v570_v55 = vpop.f32.mrf.mxu0  ;;  %v634_v56 = vpop.f32.mrf.mxu1 }
  0xf8   : > { %1304 = vst [vmem:[%s1585_s17 + $0x8] sm:$0xff] %v1232_v49   ;;  %1312 = vst [vmem:[%s1585_s17 + $0x48] sm:$0xff] %v1272_v50   ;;  %v1227_v57 = vpack.c.bf16 %v820_v51, %v819_v45  ;;  %v1267_v58 = vpack.c.bf16 %v836_v52, %v835_v46  ;;  %v791_v59 = vadd.f32 %v1570_v24, %v570_v55 }
  0xf9   : > { %v807_v60 = vadd.f32 %v1570_v24, %v634_v56  ;;  %v1366_v61 = vpop.f32.mrf.mxu0  ;;  %v1382_v62 = vpop.f32.mrf.mxu1  ;;  %v825_v1 = vmax.f32 %v793_v53, 0.0  ;;  %v841_v2 = vmax.f32 %v809_v54, 0.0 }
  0xfa   : > { %1228 = vst [vmem:[%s1585_s17] sm:$0xff] %v1227_v57   ;;  %1311 = vst [vmem:[%s1585_s17 + $0x40] sm:$0xff] %v1267_v58   ;;  %v794_v63 = vadd.f32 %v1366_v61, %v1570_v24  ;;  %v810_v0 = vadd.f32 %v1382_v62, %v1570_v24  ;;  %v823_v9 = vmax.f32 %v791_v59, 0.0 }
  0xfb   : > { %v573_v3 = vpop.f32.mrf.mxu0  ;;  %v637_v4 = vpop.f32.mrf.mxu1  ;;  %v839_v10 = vmax.f32 %v807_v60, 0.0 }
  0xfc   : > { %v826_v5 = vmax.f32 %v794_v63, 0.0  ;;  %v842_v6 = vmax.f32 %v810_v0, 0.0  ;;  %v792_v7 = vadd.f32 %v1570_v24, %v573_v3  ;;  %v808_v8 = vadd.f32 %v1570_v24, %v637_v4 }
  0xfd   : > { %v1369_v11 = vpop.f32.mrf.mxu0  ;;  %v1385_v12 = vpop.f32.mrf.mxu1 }
  0xfe   : > { %v1242_v13 = vpack.c.bf16 %v826_v5, %v825_v1  ;;  %v1282_v14 = vpack.c.bf16 %v842_v6, %v841_v2  ;;  %v824_v15 = vmax.f32 %v792_v7, 0.0  ;;  %v840_v16 = vmax.f32 %v808_v8, 0.0 }
  0xff   : > { %v797_v17 = vadd.f32 %v1369_v11, %v1570_v24  ;;  %v813_v18 = vadd.f32 %v1385_v12, %v1570_v24  ;;  %v586_v19 = vpop.f32.mrf.mxu0  ;;  %v650_v20 = vpop.f32.mrf.mxu1 }
 0x100   : > { %1306 = vst [vmem:[%s1585_s17 + $0x18] sm:$0xff] %v1242_v13   ;;  %1314 = vst [vmem:[%s1585_s17 + $0x58] sm:$0xff] %v1282_v14   ;;  %v1237_v21 = vpack.c.bf16 %v824_v15, %v823_v9  ;;  %v1277_v22 = vpack.c.bf16 %v840_v16, %v839_v10  ;;  %v795_v23 = vadd.f32 %v1570_v24, %v586_v19 }
 0x101   : > { %v811_v25 = vadd.f32 %v1570_v24, %v650_v20  ;;  %v1370_v26 = vpop.f32.mrf.mxu0  ;;  %v1386_v27 = vpop.f32.mrf.mxu1  ;;  %v829_v30 = vmax.f32 %v797_v17, 0.0  ;;  %v845_v31 = vmax.f32 %v813_v18, 0.0 }
 0x102   : > { %1305 = vst [vmem:[%s1585_s17 + $0x10] sm:$0xff] %v1237_v21   ;;  %1313 = vst [vmem:[%s1585_s17 + $0x50] sm:$0xff] %v1277_v22   ;;  %v798_v28 = vadd.f32 %v1370_v26, %v1570_v24  ;;  %v814_v29 = vadd.f32 %v1386_v27, %v1570_v24  ;;  %v827_v38 = vmax.f32 %v795_v23, 0.0 }
 0x103   : > { %v589_v32 = vpop.f32.mrf.mxu0  ;;  %v653_v33 = vpop.f32.mrf.mxu1  ;;  %v843_v39 = vmax.f32 %v811_v25, 0.0 }
 0x104   : > { %v830_v34 = vmax.f32 %v798_v28, 0.0  ;;  %v846_v35 = vmax.f32 %v814_v29, 0.0  ;;  %v796_v36 = vadd.f32 %v1570_v24, %v589_v32  ;;  %v812_v37 = vadd.f32 %v1570_v24, %v653_v33 }
 0x105   : > { %v1373_v40 = vpop.f32.mrf.mxu0  ;;  %v1389_v41 = vpop.f32.mrf.mxu1 }
 0x106   : > { %v1252_v42 = vpack.c.bf16 %v830_v34, %v829_v30  ;;  %v1292_v43 = vpack.c.bf16 %v846_v35, %v845_v31  ;;  %v828_v44 = vmax.f32 %v796_v36, 0.0  ;;  %v844_v45 = vmax.f32 %v812_v37, 0.0 }
 0x107   : > { %v801_v46 = vadd.f32 %v1373_v40, %v1570_v24  ;;  %v817_v47 = vadd.f32 %v1389_v41, %v1570_v24  ;;  %v602_v48 = vpop.f32.mrf.mxu0  ;;  %v666_v49 = vpop.f32.mrf.mxu1 }
 0x108   : > { %1308 = vst [vmem:[%s1585_s17 + $0x28] sm:$0xff] %v1252_v42   ;;  %1316 = vst [vmem:[%s1585_s17 + $0x68] sm:$0xff] %v1292_v43   ;;  %v1247_v50 = vpack.c.bf16 %v828_v44, %v827_v38  ;;  %v1287_v51 = vpack.c.bf16 %v844_v45, %v843_v39  ;;  %v799_v52 = vadd.f32 %v1570_v24, %v602_v48 }
 0x109   : > { %v815_v53 = vadd.f32 %v1570_v24, %v666_v49  ;;  %v1374_v54 = vpop.f32.mrf.mxu0  ;;  %v1390_v55 = vpop.f32.mrf.mxu1  ;;  %v833_v58 = vmax.f32 %v801_v46, 0.0  ;;  %v849_v59 = vmax.f32 %v817_v47, 0.0 }
 0x10a   : > { %1307 = vst [vmem:[%s1585_s17 + $0x20] sm:$0xff] %v1247_v50   ;;  %1315 = vst [vmem:[%s1585_s17 + $0x60] sm:$0xff] %v1287_v51   ;;  %v802_v56 = vadd.f32 %v1374_v54, %v1570_v24  ;;  %v818_v57 = vadd.f32 %v1390_v55, %v1570_v24  ;;  %v831_v2 = vmax.f32 %v799_v52, 0.0 }
 0x10b   : > { %v605_v60 = vpop.f32.mrf.mxu0  ;;  %v669_v61 = vpop.f32.mrf.mxu1  ;;  %v847_v3 = vmax.f32 %v815_v53, 0.0 }
 0x10c   : > { %v834_v62 = vmax.f32 %v802_v56, 0.0  ;;  %v850_v63 = vmax.f32 %v818_v57, 0.0  ;;  %v800_v0 = vadd.f32 %v1570_v24, %v605_v60  ;;  %v816_v1 = vadd.f32 %v1570_v24, %v669_v61 }
 0x10e   : > { %v1262_v4 = vpack.c.bf16 %v834_v62, %v833_v58  ;;  %v1302_v5 = vpack.c.bf16 %v850_v63, %v849_v59  ;;  %v832_v6 = vmax.f32 %v800_v0, 0.0  ;;  %v848_v7 = vmax.f32 %v816_v1, 0.0 }
 0x110   : > { %1310 = vst [vmem:[%s1585_s17 + $0x38] sm:$0xff] %v1262_v4   ;;  %1318 = vst [vmem:[%s1585_s17 + $0x78] sm:$0xff] %v1302_v5   ;;  %v1257_v8 = vpack.c.bf16 %v832_v6, %v831_v2  ;;  %v1297_v9 = vpack.c.bf16 %v848_v7, %v847_v3 }
 0x112   : > { %1309 = vst [vmem:[%s1585_s17 + $0x30] sm:$0xff] %v1257_v8   ;;  %1317 = vst [vmem:[%s1585_s17 + $0x70] sm:$0xff] %v1297_v9  }
 0x113 PF: > { %s13_s14 = sadd.s32 1, %s1477_s14   ;;  %s1640_s12 = smov %s1473_s13 }
 0x114   : > { %p10_p5 = scmp.ge.s32.totalorder %s13_s14, 4   ;;  %s1641_s13 = smov %s1643_s15 }
 0x116   :  { %12 = sbr.rel (!%p10_p5) target bundleno = 2 (0x2), region = 76 }

// kernel: extended_mask2former_forward.11
= control target key start
LH: loop header
LB: loop body
LE: loop exit
PB: predicated region body
PF: predicated region fallthrough
CT: control target
= control target key end

     0   :  { %s939_s1 = inlined_call_operand.vmem [shape: bf16[256,128], index: 1, kind: input, shape index: {}]   ;;  %s940_s0 = inlined_call_operand.vmem [shape: bf16[128,256], index: 0, kind: input, shape index: {}]   ;;  %s941_s2 = inlined_call_operand.vmem [shape: f32[1,128], index: 2, kind: input, shape index: {}]   ;;  %s942_s3 = inlined_call_operand.vmem [shape: bf16[128,128], index: 3, kind: output, shape index: {}]  }
   0x1   :  { %v738_v0 = vld [vmem:[%s939_s1 + $0x78] sm:$0xff]   ;;  %v740_v2 = vld [vmem:[%s939_s1 + $0x70] sm:$0xff]   ;;  %v742_v4 = vld [vmem:[%s939_s1 + $0x68] sm:$0xff]  }
   0x2   :  { %v739_v1 = vld [vmem:[%s939_s1 + $0x38] sm:$0xff]   ;;  %658 = vmatprep.subr.bf16.mxu0 %v738_v0  ;;  %722 = vmatprep.subr.bf16.mxu1 %v738_v0  ;;  %v741_v3 = vld [vmem:[%s939_s1 + $0x30] sm:$0xff]   ;;  %v743_v5 = vld [vmem:[%s939_s1 + $0x28] sm:$0xff]  }
   0x3   :  { %659 = vmatpush3.bf16.msra.mxu0 %v739_v1  ;;  %730 = vmatpush3.bf16.msra.mxu1 %v739_v1  ;;  %v744_v6 = vld [vmem:[%s939_s1 + $0x60] sm:$0xff]   ;;  %v746_v8 = vld [vmem:[%s939_s1 + $0x58] sm:$0xff]   ;;  %v748_v10 = vld [vmem:[%s939_s1 + $0x50] sm:$0xff]  }
   0x4   :  { %660 = vmatprep.subr.bf16.mxu0 %v740_v2  ;;  %723 = vmatprep.subr.bf16.mxu1 %v740_v2  ;;  %v745_v7 = vld [vmem:[%s939_s1 + $0x20] sm:$0xff]   ;;  %v747_v9 = vld [vmem:[%s939_s1 + $0x18] sm:$0xff]   ;;  %v749_v13 = vld [vmem:[%s939_s1 + $0x10] sm:$0xff]  }
   0x5   :  { %v756_v11 = vld [vmem:[%s940_s0 + $0x4] ss:$8 sps:$4 sm:$0xff]   ;;  %v754_v18 = vld [vmem:[%s940_s0] ss:$8 sps:$4 sm:$0xff]   ;;  %v760_v20 = vld [vmem:[%s940_s0 + $0x14] ss:$8 sps:$4 sm:$0xff]  }
   0x6   :  { %v759_v12 = vld [vmem:[%s940_s0 + $0x44] ss:$8 sps:$4 sm:$0xff]   ;;  %307 = vmatprep.mubr.bf16.mxu0 %v756_v11  ;;  %v757_v19 = vld [vmem:[%s940_s0 + $0x40] ss:$8 sps:$4 sm:$0xff]   ;;  %v762_v21 = vld [vmem:[%s940_s0 + $0x54] ss:$8 sps:$4 sm:$0xff]  }
   0x7   :  { %661 = vmatpush3.bf16.msra.mxu0 %v741_v3  ;;  %731 = vmatpush3.bf16.msra.mxu1 %v741_v3  ;;  %v750_v14 = vld [vmem:[%s939_s1 + $0x48] sm:$0xff]   ;;  %v752_v16 = vld [vmem:[%s939_s1 + $0x40] sm:$0xff]   ;;  %v764_v22 = vld [vmem:[%s940_s0 + $0x10] ss:$8 sps:$4 sm:$0xff]  }
   0x8   :  { %662 = vmatprep.subr.bf16.mxu0 %v742_v4  ;;  %724 = vmatprep.subr.bf16.mxu1 %v742_v4  ;;  %v751_v15 = vld [vmem:[%s939_s1 + $0x8] sm:$0xff]   ;;  %v753_v17 = vld [vmem:[%s939_s1] sm:$0xff]   ;;  %v765_v23 = vld [vmem:[%s940_s0 + $0x50] ss:$8 sps:$4 sm:$0xff]  }
   0x9   :  { %339 = vmatprep.mubr.bf16.mxu1 %v759_v12  ;;  %v766_v24 = vld [vmem:[%s940_s0 + $0x24] ss:$8 sps:$4 sm:$0xff]   ;;  %v770_v26 = vld [vmem:[%s940_s0 + $0x20] ss:$8 sps:$4 sm:$0xff]   ;;  %v772_v28 = vld [vmem:[%s940_s0 + $0x34] ss:$8 sps:$4 sm:$0xff]  }
   0xa   :  { %v768_v25 = vld [vmem:[%s940_s0 + $0x64] ss:$8 sps:$4 sm:$0xff]   ;;  %v771_v27 = vld [vmem:[%s940_s0 + $0x60] ss:$8 sps:$4 sm:$0xff]   ;;  %v774_v29 = vld [vmem:[%s940_s0 + $0x74] ss:$8 sps:$4 sm:$0xff]  }
   0xb   :  { %663 = vmatpush3.bf16.msra.mxu0 %v743_v5  ;;  %732 = vmatpush3.bf16.msra.mxu1 %v743_v5  ;;  %v776_v30 = vld [vmem:[%s940_s0 + $0x30] ss:$8 sps:$4 sm:$0xff]   ;;  %v897_v37 = vld [vmem:[%s941_s2] ss:$0 sm:$0xff] }
   0xc   :  { %664 = vmatprep.subr.bf16.mxu0 %v744_v6  ;;  %725 = vmatprep.subr.bf16.mxu1 %v744_v6  ;;  %v777_v31 = vld [vmem:[%s940_s0 + $0x70] ss:$8 sps:$4 sm:$0xff]  }
   0xf   :  { %665 = vmatpush3.bf16.msra.mxu0 %v745_v7  ;;  %733 = vmatpush3.bf16.msra.mxu1 %v745_v7 }
  0x10   :  { %666 = vmatprep.subr.bf16.mxu0 %v746_v8  ;;  %726 = vmatprep.subr.bf16.mxu1 %v746_v8 }
  0x13   :  { %667 = vmatpush3.bf16.msra.mxu0 %v747_v9  ;;  %734 = vmatpush3.bf16.msra.mxu1 %v747_v9 }
  0x14   :  { %668 = vmatprep.subr.bf16.mxu0 %v748_v10  ;;  %727 = vmatprep.subr.bf16.mxu1 %v748_v10 }
  0x17   :  { %669 = vmatpush3.bf16.msra.mxu0 %v749_v13  ;;  %735 = vmatpush3.bf16.msra.mxu1 %v749_v13 }
  0x18   :  { %670 = vmatprep.subr.bf16.mxu0 %v750_v14  ;;  %728 = vmatprep.subr.bf16.mxu1 %v750_v14 }
  0x1b   :  { %671 = vmatpush3.bf16.msra.mxu0 %v751_v15  ;;  %736 = vmatpush3.bf16.msra.mxu1 %v751_v15 }
  0x1c   :  { %672 = vmatprep.subr.bf16.mxu0 %v752_v16  ;;  %729 = vmatprep.subr.bf16.mxu1 %v752_v16 }
  0x1f   :  { %673 = vmatpush3.bf16.msra.mxu0 %v753_v17  ;;  %737 = vmatpush3.bf16.msra.mxu1 %v753_v17 }
  0x22   :  { %308 = vmatmul.mubr.bf16.vlgmr.msra.gmra.mxu0 %v754_v18  ;;  %340 = vmatmul.mubr.bf16.vlgmr.msra.gmra.mxu1 %v757_v19 }
  0x23   :  { %315 = vmatprep.mubr.bf16.mxu0 %v760_v20  ;;  %347 = vmatprep.mubr.bf16.mxu1 %v762_v21 }
  0x2a   :  { %316 = vmatmul.mubr.bf16.gmra.mxu0 %v764_v22  ;;  %348 = vmatmul.mubr.bf16.gmra.mxu1 %v765_v23 }
  0x2b   :  { %323 = vmatprep.mubr.bf16.mxu0 %v766_v24  ;;  %355 = vmatprep.mubr.bf16.mxu1 %v768_v25 }
  0x32   :  { %324 = vmatmul.mubr.bf16.gmra.mxu0 %v770_v26  ;;  %356 = vmatmul.mubr.bf16.gmra.mxu1 %v771_v27 }
  0x33   :  { %331 = vmatprep.mubr.bf16.mxu0 %v772_v28  ;;  %363 = vmatprep.mubr.bf16.mxu1 %v774_v29 }
  0x3a   :  { %332 = vmatmul.mubr.bf16.gmra.mxu0 %v776_v30  ;;  %364 = vmatmul.mubr.bf16.gmra.mxu1 %v777_v31 }
  0xe2   :  { %v674_v32 = vpop.f32.mrf.mxu0  ;;  %v698_v33 = vpop.f32.mrf.mxu1 }
  0xe4   :  { %v675_v34 = vpop.f32.mrf.mxu0  ;;  %v699_v35 = vpop.f32.mrf.mxu1 }
  0xe5   :  { %v676_v36 = vadd.f32 %v675_v34, %v674_v32  ;;  %v700_v38 = vadd.f32 %v699_v35, %v698_v33 }
  0xe6   :  { %v677_v39 = vpop.f32.mrf.mxu0  ;;  %v701_v40 = vpop.f32.mrf.mxu1 }
  0xe7   :  { %v430_v41 = vadd.f32 %v676_v36, %v897_v37  ;;  %v438_v42 = vadd.f32 %v700_v38, %v897_v37 }
  0xe8   :  { %v678_v43 = vpop.f32.mrf.mxu0  ;;  %v702_v44 = vpop.f32.mrf.mxu1 }
  0xe9   :  { %v679_v45 = vadd.f32 %v678_v43, %v677_v39  ;;  %v703_v46 = vadd.f32 %v702_v44, %v701_v40  ;;  %v446_v51 = vmax.f32 %v430_v41, 0.0  ;;  %v454_v52 = vmax.f32 %v438_v42, 0.0 }
  0xea   :  { %v680_v47 = vpop.f32.mrf.mxu0  ;;  %v704_v48 = vpop.f32.mrf.mxu1 }
  0xeb   :  { %v431_v49 = vadd.f32 %v679_v45, %v897_v37  ;;  %v439_v50 = vadd.f32 %v703_v46, %v897_v37 }
  0xec   :  { %v681_v53 = vpop.f32.mrf.mxu0  ;;  %v705_v54 = vpop.f32.mrf.mxu1 }
  0xed   :  { %v447_v55 = vmax.f32 %v431_v49, 0.0  ;;  %v455_v56 = vmax.f32 %v439_v50, 0.0  ;;  %v682_v57 = vadd.f32 %v681_v53, %v680_v47  ;;  %v706_v58 = vadd.f32 %v705_v54, %v704_v48 }
  0xee   :  { %v683_v59 = vpop.f32.mrf.mxu0  ;;  %v707_v60 = vpop.f32.mrf.mxu1 }
  0xef   :  { %v614_v61 = vpack.c.bf16 %v447_v55, %v446_v51  ;;  %v634_v62 = vpack.c.bf16 %v455_v56, %v454_v52  ;;  %v432_v63 = vadd.f32 %v682_v57, %v897_v37  ;;  %v440_v0 = vadd.f32 %v706_v58, %v897_v37 }
  0xf0   :  { %v684_v1 = vpop.f32.mrf.mxu0  ;;  %v708_v2 = vpop.f32.mrf.mxu1 }
  0xf1   :  { %615 = vst [vmem:[%s942_s3] sm:$0xff] %v614_v61   ;;  %654 = vst [vmem:[%s942_s3 + $0x20] sm:$0xff] %v634_v62   ;;  %v685_v3 = vadd.f32 %v684_v1, %v683_v59  ;;  %v709_v4 = vadd.f32 %v708_v2, %v707_v60  ;;  %v448_v9 = vmax.f32 %v432_v63, 0.0  ;;  %v456_v10 = vmax.f32 %v440_v0, 0.0 }
  0xf2   :  { %v686_v5 = vpop.f32.mrf.mxu0  ;;  %v710_v6 = vpop.f32.mrf.mxu1 }
  0xf3   :  { %v433_v7 = vadd.f32 %v685_v3, %v897_v37  ;;  %v441_v8 = vadd.f32 %v709_v4, %v897_v37 }
  0xf4   :  { %v687_v11 = vpop.f32.mrf.mxu0  ;;  %v711_v12 = vpop.f32.mrf.mxu1 }
  0xf5   :  { %v449_v13 = vmax.f32 %v433_v7, 0.0  ;;  %v457_v14 = vmax.f32 %v441_v8, 0.0  ;;  %v688_v15 = vadd.f32 %v687_v11, %v686_v5  ;;  %v712_v16 = vadd.f32 %v711_v12, %v710_v6 }
  0xf6   :  { %v689_v17 = vpop.f32.mrf.mxu0  ;;  %v713_v18 = vpop.f32.mrf.mxu1 }
  0xf7   :  { %v619_v19 = vpack.c.bf16 %v449_v13, %v448_v9  ;;  %v639_v20 = vpack.c.bf16 %v457_v14, %v456_v10  ;;  %v434_v21 = vadd.f32 %v688_v15, %v897_v37  ;;  %v442_v22 = vadd.f32 %v712_v16, %v897_v37 }
  0xf8   :  { %v690_v23 = vpop.f32.mrf.mxu0  ;;  %v714_v24 = vpop.f32.mrf.mxu1 }
  0xf9   :  { %651 = vst [vmem:[%s942_s3 + $0x8] sm:$0xff] %v619_v19   ;;  %655 = vst [vmem:[%s942_s3 + $0x28] sm:$0xff] %v639_v20   ;;  %v691_v25 = vadd.f32 %v690_v23, %v689_v17  ;;  %v715_v26 = vadd.f32 %v714_v24, %v713_v18  ;;  %v450_v31 = vmax.f32 %v434_v21, 0.0  ;;  %v458_v32 = vmax.f32 %v442_v22, 0.0 }
  0xfa   :  { %v692_v27 = vpop.f32.mrf.mxu0  ;;  %v716_v28 = vpop.f32.mrf.mxu1 }
  0xfb   :  { %v435_v29 = vadd.f32 %v691_v25, %v897_v37  ;;  %v443_v30 = vadd.f32 %v715_v26, %v897_v37 }
  0xfc   :  { %v693_v33 = vpop.f32.mrf.mxu0  ;;  %v717_v34 = vpop.f32.mrf.mxu1 }
  0xfd   :  { %v451_v35 = vmax.f32 %v435_v29, 0.0  ;;  %v459_v36 = vmax.f32 %v443_v30, 0.0  ;;  %v694_v38 = vadd.f32 %v693_v33, %v692_v27  ;;  %v718_v39 = vadd.f32 %v717_v34, %v716_v28 }
  0xfe   :  { %v695_v40 = vpop.f32.mrf.mxu0  ;;  %v719_v41 = vpop.f32.mrf.mxu1 }
  0xff   :  { %v624_v42 = vpack.c.bf16 %v451_v35, %v450_v31  ;;  %v644_v43 = vpack.c.bf16 %v459_v36, %v458_v32  ;;  %v436_v46 = vadd.f32 %v694_v38, %v897_v37  ;;  %v444_v47 = vadd.f32 %v718_v39, %v897_v37 }
 0x100   :  { %v696_v44 = vpop.f32.mrf.mxu0  ;;  %v720_v45 = vpop.f32.mrf.mxu1 }
 0x101   :  { %652 = vst [vmem:[%s942_s3 + $0x10] sm:$0xff] %v624_v42   ;;  %656 = vst [vmem:[%s942_s3 + $0x30] sm:$0xff] %v644_v43   ;;  %v697_v48 = vadd.f32 %v696_v44, %v695_v40  ;;  %v721_v49 = vadd.f32 %v720_v45, %v719_v41  ;;  %v452_v52 = vmax.f32 %v436_v46, 0.0  ;;  %v460_v53 = vmax.f32 %v444_v47, 0.0 }
 0x103   :  { %v437_v50 = vadd.f32 %v697_v48, %v897_v37  ;;  %v445_v51 = vadd.f32 %v721_v49, %v897_v37 }
 0x105   :  { %v453_v54 = vmax.f32 %v437_v50, 0.0  ;;  %v461_v55 = vmax.f32 %v445_v51, 0.0 }
 0x107   :  { %v629_v56 = vpack.c.bf16 %v453_v54, %v452_v52  ;;  %v649_v57 = vpack.c.bf16 %v461_v55, %v460_v53 }
 0x109   :  { %653 = vst [vmem:[%s942_s3 + $0x18] sm:$0xff] %v629_v56   ;;  %657 = vst [vmem:[%s942_s3 + $0x38] sm:$0xff] %v649_v57  }

// kernel: extended_mask2former_forward.12
= control target key start
LH: loop header
LB: loop body
LE: loop exit
PB: predicated region body
PF: predicated region fallthrough
CT: control target
= control target key end

     0   :  { %s670_s1 = inlined_call_operand.vmem [shape: bf16[384,128], index: 1, kind: input, shape index: {}]   ;;  %s671_s0 = inlined_call_operand.vmem [shape: bf16[32,384], index: 0, kind: input, shape index: {}]   ;;  %s672_s2 = inlined_call_operand.vmem [shape: f32[1,128], index: 2, kind: input, shape index: {}]   ;;  %s673_s3 = inlined_call_operand.vmem [shape: bf16[32,128], index: 3, kind: output, shape index: {}]  }
   0x1   :  { %v519_v0 = vld [vmem:[%s670_s1 + $0x78] sm:$0xff]   ;;  %v522_v3 = vld [vmem:[%s670_s1 + $0x70] sm:$0xff]   ;;  %v525_v6 = vld [vmem:[%s670_s1 + $0x68] sm:$0xff]  }
   0x2   :  { %v520_v1 = vld [vmem:[%s670_s1 + $0x38] sm:$0xff]   ;;  %461 = vmatprep.subr.bf16.mxu0 %v519_v0  ;;  %v523_v4 = vld [vmem:[%s670_s1 + $0x30] sm:$0xff]   ;;  %v526_v7 = vld [vmem:[%s670_s1 + $0x28] sm:$0xff]  }
   0x3   :  { %v521_v2 = vld [vmem:[%s670_s1 + $0xb8] sm:$0xff]   ;;  %462 = vmatpush3.bf16.msra.mxu0 %v520_v1  ;;  %v524_v5 = vld [vmem:[%s670_s1 + $0xb0] sm:$0xff]   ;;  %v527_v8 = vld [vmem:[%s670_s1 + $0xa8] sm:$0xff]  }
   0x4   :  { %499 = vmatprep.subr.bf16.mxu1 %v521_v2  ;;  %463 = vmatprep.subr.bf16.mxu0 %v522_v3  ;;  %v528_v9 = vld [vmem:[%s670_s1 + $0x60] sm:$0xff]   ;;  %v531_v12 = vld [vmem:[%s670_s1 + $0x58] sm:$0xff]   ;;  %v534_v15 = vld [vmem:[%s670_s1 + $0x50] sm:$0xff]  }
   0x5   :  { %500 = vmatpush3.bf16.msra.mxu1 %v521_v2  ;;  %v529_v10 = vld [vmem:[%s670_s1 + $0x20] sm:$0xff]   ;;  %v533_v13 = vld [vmem:[%s670_s1 + $0x98] sm:$0xff]   ;;  %v536_v16 = vld [vmem:[%s670_s1 + $0x90] sm:$0xff]  }
   0x6   :  { %501 = vmatprep.subr.bf16.mxu1 %v524_v5  ;;  %v530_v11 = vld [vmem:[%s670_s1 + $0xa0] sm:$0xff]   ;;  %v532_v14 = vld [vmem:[%s670_s1 + $0x18] sm:$0xff]   ;;  %v535_v17 = vld [vmem:[%s670_s1 + $0x10] sm:$0xff]  }
   0x7   :  { %464 = vmatpush3.bf16.msra.mxu0 %v523_v4  ;;  %v537_v18 = vld [vmem:[%s670_s1 + $0x48] sm:$0xff]   ;;  %v540_v21 = vld [vmem:[%s670_s1 + $0x40] sm:$0xff]  }
   0x8   :  { %465 = vmatprep.subr.bf16.mxu0 %v525_v6  ;;  %v538_v19 = vld [vmem:[%s670_s1 + $0x8] sm:$0xff]   ;;  %v542_v22 = vld [vmem:[%s670_s1 + $0x80] sm:$0xff]  }
   0x9   :  { %502 = vmatpush3.bf16.msra.mxu1 %v524_v5  ;;  %v539_v20 = vld [vmem:[%s670_s1 + $0x88] sm:$0xff]   ;;  %v545_v23 = vld [vmem:[%s671_s0 + $0x4] ss:$12 sps:$4 sm:$0xff]   ;;  %v441_v37 = vld [vmem:[%s672_s2] ss:$0 sm:$0xff] }
   0xa   :  { %503 = vmatprep.subr.bf16.mxu1 %v527_v8  ;;  %v546_v24 = vld [vmem:[%s671_s0 + $0x8] ss:$12 sps:$4 sm:$0xff]   ;;  %v541_v25 = vld [vmem:[%s670_s1] sm:$0xff]   ;;  %291 = vmatprep.mubr.bf16.mxu0 %v545_v23 }
   0xb   :  { %466 = vmatpush3.bf16.msra.mxu0 %v526_v7  ;;  %515 = vmatprep.mubr.bf16.mxu1 %v546_v24  ;;  %v543_v26 = vld [vmem:[%s671_s0] ss:$12 sps:$4 sm:$0xff]   ;;  %v548_v27 = vld [vmem:[%s671_s0 + $0x1c] ss:$12 sps:$4 sm:$0xff]   ;;  %v550_v29 = vld [vmem:[%s671_s0 + $0x18] ss:$12 sps:$4 sm:$0xff]  }
   0xc   :  { %467 = vmatprep.subr.bf16.mxu0 %v528_v9  ;;  %v547_v28 = vld [vmem:[%s671_s0 + $0x20] ss:$12 sps:$4 sm:$0xff]  }
   0xd   :  { %504 = vmatpush3.bf16.msra.mxu1 %v527_v8 }
   0xe   :  { %505 = vmatprep.subr.bf16.mxu1 %v530_v11 }
   0xf   :  { %468 = vmatpush3.bf16.msra.mxu0 %v529_v10 }
  0x10   :  { %469 = vmatprep.subr.bf16.mxu0 %v531_v12 }
  0x11   :  { %506 = vmatpush3.bf16.msra.mxu1 %v530_v11 }
  0x12   :  { %507 = vmatprep.subr.bf16.mxu1 %v533_v13 }
  0x13   :  { %470 = vmatpush3.bf16.msra.mxu0 %v532_v14 }
  0x14   :  { %471 = vmatprep.subr.bf16.mxu0 %v534_v15 }
  0x15   :  { %508 = vmatpush3.bf16.msra.mxu1 %v533_v13 }
  0x16   :  { %509 = vmatprep.subr.bf16.mxu1 %v536_v16 }
  0x17   :  { %472 = vmatpush3.bf16.msra.mxu0 %v535_v17 }
  0x18   :  { %473 = vmatprep.subr.bf16.mxu0 %v537_v18 }
  0x19   :  { %510 = vmatpush3.bf16.msra.mxu1 %v536_v16 }
  0x1a   :  { %511 = vmatprep.subr.bf16.mxu1 %v539_v20 }
  0x1b   :  { %474 = vmatpush3.bf16.msra.mxu0 %v538_v19 }
  0x1c   :  { %475 = vmatprep.subr.bf16.mxu0 %v540_v21 }
  0x1d   :  { %512 = vmatpush3.bf16.msra.mxu1 %v539_v20 }
  0x1e   :  { %513 = vmatprep.subr.bf16.mxu1 %v542_v22 }
  0x1f   :  { %476 = vmatpush3.bf16.msra.mxu0 %v541_v25 }
  0x21   :  { %514 = vmatpush3.bf16.msra.mxu1 %v542_v22 }
  0x22   :  { %292 = vmatmul.mubr.bf16.vlgmr.msra.gmra.mxu0 %v543_v26 }
  0x23   :  { %299 = vmatprep.mubr.bf16.mxu0 %v548_v27 }
  0x24   :  { %516 = vmatmul.mubr.bf16.vlgmr.msra.gmra.mxu1 %v547_v28 }
  0x2a   :  { %300 = vmatmul.mubr.bf16.gmra.mxu0 %v550_v29 }
  0xe2   :  { %v477_v30 = vpop.f32.mrf.mxu0 }
  0xe4   :  { %v478_v31 = vpop.f32.mrf.mxu0  ;;  %v517_v32 = vpop.f32.mrf.mxu1 }
  0xe5   :  { %v479_v33 = vadd.f32 %v478_v31, %v477_v30 }
  0xe6   :  { %v480_v34 = vpop.f32.mrf.mxu0  ;;  %v342_v35 = vpop.f32.mrf.mxu1 }
  0xe7   :  { %v343_v36 = vadd.f32 %v479_v33, %v342_v35 }
  0xe8   :  { %v481_v38 = vpop.f32.mrf.mxu0  ;;  %v518_v39 = vpop.f32.mrf.mxu1 }
  0xe9   :  { %v482_v40 = vadd.f32 %v481_v38, %v480_v34  ;;  %v379_v43 = vadd.f32 %v441_v37, %v343_v36 }
  0xea   :  { %v483_v41 = vpop.f32.mrf.mxu0  ;;  %v345_v42 = vpop.f32.mrf.mxu1 }
  0xeb   :  { %v346_v44 = vadd.f32 %v482_v40, %v345_v42  ;;  %v383_v49 = vmax.f32 %v379_v43, 0.0 }
  0xec   :  { %v484_v45 = vpop.f32.mrf.mxu0 }
  0xed   :  { %v380_v46 = vadd.f32 %v441_v37, %v346_v44  ;;  %v485_v47 = vadd.f32 %v484_v45, %v483_v41 }
  0xee   :  { %v486_v48 = vpop.f32.mrf.mxu0 }
  0xef   :  { %v384_v50 = vmax.f32 %v380_v46, 0.0  ;;  %v351_v51 = vadd.f32 %v517_v32, %v485_v47 }
  0xf0   :  { %v487_v52 = vpop.f32.mrf.mxu0 }
  0xf1   :  { %v453_v53 = vpack.c.bf16 %v384_v50, %v383_v49  ;;  %v488_v54 = vadd.f32 %v487_v52, %v486_v48  ;;  %v381_v55 = vadd.f32 %v441_v37, %v351_v51 }
  0xf3   :  { %454 = vst [vmem:[%s673_s3] sm:$0xff] %v453_v53   ;;  %v354_v56 = vadd.f32 %v518_v39, %v488_v54  ;;  %v385_v58 = vmax.f32 %v381_v55, 0.0 }
  0xf5   :  { %v382_v57 = vadd.f32 %v441_v37, %v354_v56 }
  0xf7   :  { %v386_v59 = vmax.f32 %v382_v57, 0.0 }
  0xf9   :  { %v458_v60 = vpack.c.bf16 %v386_v59, %v385_v58 }
  0xfb   :  { %460 = vst [vmem:[%s673_s3 + $0x8] sm:$0xff] %v458_v60  }

// kernel: extended_mask2former_forward.13
= control target key start
LH: loop header
LB: loop body
LE: loop exit
PB: predicated region body
PF: predicated region fallthrough
CT: control target
= control target key end

     0   :  { %s335_s1 = inlined_call_operand.vmem [shape: bf16[128,128], index: 1, kind: input, shape index: {}]   ;;  %s336_s0 = inlined_call_operand.vmem [shape: bf16[32,128], index: 0, kind: input, shape index: {}]   ;;  %s337_s2 = inlined_call_operand.vmem [shape: f32[1,128], index: 2, kind: input, shape index: {}]   ;;  %s338_s3 = inlined_call_operand.vmem [shape: bf16[32,128], index: 3, kind: output, shape index: {}]  }
   0x1   :  { %v266_v0 = vld [vmem:[%s335_s1 + $0x38] sm:$0xff]   ;;  %v267_v1 = vld [vmem:[%s335_s1 + $0x30] sm:$0xff]   ;;  %v268_v2 = vld [vmem:[%s335_s1 + $0x28] sm:$0xff]  }
   0x2   :  { %246 = vmatprep.subr.bf16.mxu0 %v266_v0  ;;  %v269_v3 = vld [vmem:[%s335_s1 + $0x20] sm:$0xff]   ;;  %v270_v5 = vld [vmem:[%s335_s1 + $0x18] sm:$0xff]   ;;  %v271_v6 = vld [vmem:[%s335_s1 + $0x10] sm:$0xff]  }
   0x3   :  { %247 = vmatpush3.bf16.msra.mxu0 %v266_v0  ;;  %v274_v4 = vld [vmem:[%s336_s0] sm:$0xff]   ;;  %v272_v7 = vld [vmem:[%s335_s1 + $0x8] sm:$0xff]  }
   0x4   :  { %248 = vmatprep.subr.bf16.mxu0 %v267_v1  ;;  %262 = vmatprep.mubr.bf16.mxu0 %v274_v4  ;;  %v273_v8 = vld [vmem:[%s335_s1] sm:$0xff]   ;;  %v275_v9 = vld [vmem:[%s336_s0 + $0x8] sm:$0xff]  }
   0x5   :  { %v216_v11 = vld [vmem:[%s337_s2] ss:$0 sm:$0xff] }
   0x7   :  { %249 = vmatpush3.bf16.msra.mxu0 %v267_v1 }
   0x8   :  { %250 = vmatprep.subr.bf16.mxu0 %v268_v2 }
   0xb   :  { %251 = vmatpush3.bf16.msra.mxu0 %v268_v2 }
   0xc   :  { %252 = vmatprep.subr.bf16.mxu0 %v269_v3 }
   0xf   :  { %253 = vmatpush3.bf16.msra.mxu0 %v269_v3 }
  0x10   :  { %254 = vmatprep.subr.bf16.mxu0 %v270_v5 }
  0x13   :  { %255 = vmatpush3.bf16.msra.mxu0 %v270_v5 }
  0x14   :  { %256 = vmatprep.subr.bf16.mxu0 %v271_v6 }
  0x17   :  { %257 = vmatpush3.bf16.msra.mxu0 %v271_v6 }
  0x18   :  { %258 = vmatprep.subr.bf16.mxu0 %v272_v7 }
  0x1b   :  { %259 = vmatpush3.bf16.msra.mxu0 %v272_v7 }
  0x1c   :  { %260 = vmatprep.subr.bf16.mxu0 %v273_v8 }
  0x1f   :  { %261 = vmatpush3.bf16.msra.mxu0 %v273_v8 }
  0x22   :  { %263 = vmatmul.mubr.bf16.vlgmr.msra.gmra.mxu0 %v275_v9 }
  0xe2   :  { %v264_v10 = vpop.f32.mrf.mxu0 }
  0xe3   :  { %v180_v14 = vadd.f32 %v264_v10, %v216_v11 }
  0xe4   :  { %v141_v12 = vpop.f32.mrf.mxu0 }
  0xe5   :  { %v178_v17 = vadd.f32 %v216_v11, %v141_v12 }
  0xe6   :  { %v265_v13 = vpop.f32.mrf.mxu0 }
  0xe7   :  { %v181_v15 = vadd.f32 %v265_v13, %v216_v11 }
  0xe8   :  { %v144_v16 = vpop.f32.mrf.mxu0 }
  0xe9   :  { %v233_v18 = vpack.c.bf16 %v181_v15, %v180_v14  ;;  %v179_v19 = vadd.f32 %v216_v11, %v144_v16 }
  0xeb   :  { %235 = vst [vmem:[%s338_s3 + $0x8] sm:$0xff] %v233_v18   ;;  %v228_v20 = vpack.c.bf16 %v179_v19, %v178_v17 }
  0xed   :  { %229 = vst [vmem:[%s338_s3] sm:$0xff] %v228_v20  }

// kernel: extended_mask2former_forward.14
= control target key start
LH: loop header
LB: loop body
LE: loop exit
PB: predicated region body
PF: predicated region fallthrough
CT: control target
= control target key end

     0   :  { %s705_s1 = inlined_call_operand.vmem [shape: bf16[128,128], index: 1, kind: input, shape index: {}]   ;;  %s706_s0 = inlined_call_operand.vmem [shape: bf16[128,128], index: 0, kind: input, shape index: {}]   ;;  %s707_s2 = inlined_call_operand.vmem [shape: f32[1,128], index: 2, kind: input, shape index: {}]   ;;  %s708_s3 = inlined_call_operand.vmem [shape: bf16[128,128], index: 3, kind: output, shape index: {}]  }
   0x1   :  { %v594_v0 = vld [vmem:[%s705_s1 + $0x38] sm:$0xff]   ;;  %v595_v1 = vld [vmem:[%s705_s1 + $0x30] sm:$0xff]   ;;  %v596_v2 = vld [vmem:[%s705_s1 + $0x28] sm:$0xff]  }
   0x2   :  { %546 = vmatprep.subr.bf16.mxu0 %v594_v0  ;;  %578 = vmatprep.subr.bf16.mxu1 %v594_v0  ;;  %v597_v3 = vld [vmem:[%s705_s1 + $0x20] sm:$0xff]   ;;  %v598_v6 = vld [vmem:[%s705_s1 + $0x18] sm:$0xff]   ;;  %v599_v7 = vld [vmem:[%s705_s1 + $0x10] sm:$0xff]  }
   0x3   :  { %547 = vmatpush3.bf16.msra.mxu0 %v594_v0  ;;  %586 = vmatpush3.bf16.msra.mxu1 %v594_v0  ;;  %v602_v4 = vld [vmem:[%s706_s0] sm:$0xff]   ;;  %v600_v8 = vld [vmem:[%s705_s1 + $0x8] sm:$0xff]   ;;  %v606_v12 = vld [vmem:[%s706_s0 + $0x10] sm:$0xff]  }
   0x4   :  { %548 = vmatprep.subr.bf16.mxu0 %v595_v1  ;;  %579 = vmatprep.subr.bf16.mxu1 %v595_v1  ;;  %v603_v5 = vld [vmem:[%s706_s0 + $0x20] sm:$0xff]   ;;  %v604_v10 = vld [vmem:[%s706_s0 + $0x8] sm:$0xff]   ;;  %v607_v13 = vld [vmem:[%s706_s0 + $0x30] sm:$0xff]  }
   0x5   :  { %562 = vmatprep.mubr.bf16.mxu0 %v602_v4  ;;  %570 = vmatprep.mubr.bf16.mxu1 %v603_v5  ;;  %v601_v9 = vld [vmem:[%s705_s1] sm:$0xff]   ;;  %v605_v11 = vld [vmem:[%s706_s0 + $0x28] sm:$0xff]   ;;  %v608_v14 = vld [vmem:[%s706_s0 + $0x18] sm:$0xff]  }
   0x6   :  { %v609_v15 = vld [vmem:[%s706_s0 + $0x38] sm:$0xff]   ;;  %v450_v18 = vld [vmem:[%s707_s2] ss:$0 sm:$0xff] }
   0x7   :  { %549 = vmatpush3.bf16.msra.mxu0 %v595_v1  ;;  %587 = vmatpush3.bf16.msra.mxu1 %v595_v1 }
   0x8   :  { %550 = vmatprep.subr.bf16.mxu0 %v596_v2  ;;  %580 = vmatprep.subr.bf16.mxu1 %v596_v2 }
   0xb   :  { %551 = vmatpush3.bf16.msra.mxu0 %v596_v2  ;;  %588 = vmatpush3.bf16.msra.mxu1 %v596_v2 }
   0xc   :  { %552 = vmatprep.subr.bf16.mxu0 %v597_v3  ;;  %581 = vmatprep.subr.bf16.mxu1 %v597_v3 }
   0xf   :  { %553 = vmatpush3.bf16.msra.mxu0 %v597_v3  ;;  %589 = vmatpush3.bf16.msra.mxu1 %v597_v3 }
  0x10   :  { %554 = vmatprep.subr.bf16.mxu0 %v598_v6  ;;  %582 = vmatprep.subr.bf16.mxu1 %v598_v6 }
  0x13   :  { %555 = vmatpush3.bf16.msra.mxu0 %v598_v6  ;;  %590 = vmatpush3.bf16.msra.mxu1 %v598_v6 }
  0x14   :  { %556 = vmatprep.subr.bf16.mxu0 %v599_v7  ;;  %583 = vmatprep.subr.bf16.mxu1 %v599_v7 }
  0x17   :  { %557 = vmatpush3.bf16.msra.mxu0 %v599_v7  ;;  %591 = vmatpush3.bf16.msra.mxu1 %v599_v7 }
  0x18   :  { %558 = vmatprep.subr.bf16.mxu0 %v600_v8  ;;  %584 = vmatprep.subr.bf16.mxu1 %v600_v8 }
  0x1b   :  { %559 = vmatpush3.bf16.msra.mxu0 %v600_v8  ;;  %592 = vmatpush3.bf16.msra.mxu1 %v600_v8 }
  0x1c   :  { %560 = vmatprep.subr.bf16.mxu0 %v601_v9  ;;  %585 = vmatprep.subr.bf16.mxu1 %v601_v9 }
  0x1f   :  { %561 = vmatpush3.bf16.msra.mxu0 %v601_v9  ;;  %593 = vmatpush3.bf16.msra.mxu1 %v601_v9 }
  0x22   :  { %563 = vmatmul.mubr.bf16.vlgmr.msra.gmra.mxu0 %v604_v10  ;;  %571 = vmatmul.mubr.bf16.vlgmr.msra.gmra.mxu1 %v605_v11 }
  0x23   :  { %566 = vmatprep.mubr.bf16.mxu0 %v606_v12  ;;  %574 = vmatprep.mubr.bf16.mxu1 %v607_v13 }
  0x2a   :  { %567 = vmatmul.mubr.bf16.gmra.mxu0 %v608_v14  ;;  %575 = vmatmul.mubr.bf16.gmra.mxu1 %v609_v15 }
  0xe2   :  { %v564_v16 = vpop.f32.mrf.mxu0  ;;  %v572_v17 = vpop.f32.mrf.mxu1 }
  0xe3   :  { %v336_v23 = vadd.f32 %v564_v16, %v450_v18  ;;  %v344_v24 = vadd.f32 %v572_v17, %v450_v18 }
  0xe4   :  { %v213_v19 = vpop.f32.mrf.mxu0  ;;  %v245_v20 = vpop.f32.mrf.mxu1 }
  0xe5   :  { %v334_v27 = vadd.f32 %v450_v18, %v213_v19  ;;  %v342_v28 = vadd.f32 %v450_v18, %v245_v20 }
  0xe6   :  { %v565_v21 = vpop.f32.mrf.mxu0  ;;  %v573_v22 = vpop.f32.mrf.mxu1 }
  0xe7   :  { %v337_v25 = vadd.f32 %v565_v21, %v450_v18  ;;  %v345_v26 = vadd.f32 %v573_v22, %v450_v18 }
  0xe8   :  { %v216_v29 = vpop.f32.mrf.mxu0  ;;  %v248_v30 = vpop.f32.mrf.mxu1 }
  0xe9   :  { %v491_v31 = vpack.c.bf16 %v337_v25, %v336_v23  ;;  %v511_v32 = vpack.c.bf16 %v345_v26, %v344_v24  ;;  %v335_v33 = vadd.f32 %v450_v18, %v216_v29  ;;  %v343_v34 = vadd.f32 %v450_v18, %v248_v30 }
  0xea   :  { %v568_v35 = vpop.f32.mrf.mxu0  ;;  %v576_v36 = vpop.f32.mrf.mxu1 }
  0xeb   :  { %523 = vst [vmem:[%s708_s3 + $0x8] sm:$0xff] %v491_v31   ;;  %527 = vst [vmem:[%s708_s3 + $0x28] sm:$0xff] %v511_v32   ;;  %v486_v37 = vpack.c.bf16 %v335_v33, %v334_v27  ;;  %v506_v38 = vpack.c.bf16 %v343_v34, %v342_v28  ;;  %v340_v43 = vadd.f32 %v568_v35, %v450_v18 }
  0xec   :  { %v229_v39 = vpop.f32.mrf.mxu0  ;;  %v261_v40 = vpop.f32.mrf.mxu1  ;;  %v348_v44 = vadd.f32 %v576_v36, %v450_v18 }
  0xed   :  { %487 = vst [vmem:[%s708_s3] sm:$0xff] %v486_v37   ;;  %526 = vst [vmem:[%s708_s3 + $0x20] sm:$0xff] %v506_v38   ;;  %v338_v47 = vadd.f32 %v450_v18, %v229_v39  ;;  %v346_v48 = vadd.f32 %v450_v18, %v261_v40 }
  0xee   :  { %v569_v41 = vpop.f32.mrf.mxu0  ;;  %v577_v42 = vpop.f32.mrf.mxu1 }
  0xef   :  { %v341_v45 = vadd.f32 %v569_v41, %v450_v18  ;;  %v349_v46 = vadd.f32 %v577_v42, %v450_v18 }
  0xf0   :  { %v232_v49 = vpop.f32.mrf.mxu0  ;;  %v264_v50 = vpop.f32.mrf.mxu1 }
  0xf1   :  { %v501_v51 = vpack.c.bf16 %v341_v45, %v340_v43  ;;  %v521_v52 = vpack.c.bf16 %v349_v46, %v348_v44  ;;  %v339_v53 = vadd.f32 %v450_v18, %v232_v49  ;;  %v347_v54 = vadd.f32 %v450_v18, %v264_v50 }
  0xf3   :  { %525 = vst [vmem:[%s708_s3 + $0x18] sm:$0xff] %v501_v51   ;;  %529 = vst [vmem:[%s708_s3 + $0x38] sm:$0xff] %v521_v52   ;;  %v496_v55 = vpack.c.bf16 %v339_v53, %v338_v47  ;;  %v516_v56 = vpack.c.bf16 %v347_v54, %v346_v48 }
  0xf5   :  { %524 = vst [vmem:[%s708_s3 + $0x10] sm:$0xff] %v496_v55   ;;  %528 = vst [vmem:[%s708_s3 + $0x30] sm:$0xff] %v516_v56  }

// kernel: extended_mask2former_forward.15
= control target key start
LH: loop header
LB: loop body
LE: loop exit
PB: predicated region body
PF: predicated region fallthrough
CT: control target
= control target key end

     0   :  { %s1260_s1 = inlined_call_operand.vmem [shape: bf16[384,128], index: 1, kind: input, shape index: {}]   ;;  %s1261_s0 = inlined_call_operand.vmem [shape: bf16[128,384], index: 0, kind: input, shape index: {}]   ;;  %s1262_s2 = inlined_call_operand.vmem [shape: f32[1,128], index: 2, kind: input, shape index: {}]   ;;  %s1263_s3 = inlined_call_operand.vmem [shape: bf16[128,128], index: 3, kind: output, shape index: {}]  }
   0x1   :  { %v995_v0 = vld [vmem:[%s1260_s1 + $0x78] sm:$0xff]   ;;  %v998_v3 = vld [vmem:[%s1260_s1 + $0x70] sm:$0xff]   ;;  %v1001_v6 = vld [vmem:[%s1260_s1 + $0x68] sm:$0xff]  }
   0x2   :  { %v996_v1 = vld [vmem:[%s1260_s1 + $0x38] sm:$0xff]   ;;  %883 = vmatprep.subr.bf16.mxu0 %v995_v0  ;;  %v999_v4 = vld [vmem:[%s1260_s1 + $0x30] sm:$0xff]   ;;  %v1002_v7 = vld [vmem:[%s1260_s1 + $0x28] sm:$0xff]  }
   0x3   :  { %v997_v2 = vld [vmem:[%s1260_s1 + $0xb8] sm:$0xff]   ;;  %884 = vmatpush3.bf16.msra.mxu0 %v996_v1  ;;  %v1000_v5 = vld [vmem:[%s1260_s1 + $0xb0] sm:$0xff]   ;;  %v1003_v8 = vld [vmem:[%s1260_s1 + $0xa8] sm:$0xff]  }
   0x4   :  { %963 = vmatprep.subr.bf16.mxu1 %v997_v2  ;;  %885 = vmatprep.subr.bf16.mxu0 %v998_v3  ;;  %v1004_v9 = vld [vmem:[%s1260_s1 + $0x60] sm:$0xff]   ;;  %v1007_v12 = vld [vmem:[%s1260_s1 + $0x58] sm:$0xff]   ;;  %v1010_v15 = vld [vmem:[%s1260_s1 + $0x50] sm:$0xff]  }
   0x5   :  { %964 = vmatpush3.bf16.msra.mxu1 %v997_v2  ;;  %v1005_v10 = vld [vmem:[%s1260_s1 + $0x20] sm:$0xff]   ;;  %v1009_v13 = vld [vmem:[%s1260_s1 + $0x98] sm:$0xff]   ;;  %v1012_v16 = vld [vmem:[%s1260_s1 + $0x90] sm:$0xff]  }
   0x6   :  { %965 = vmatprep.subr.bf16.mxu1 %v1000_v5  ;;  %v1006_v11 = vld [vmem:[%s1260_s1 + $0xa0] sm:$0xff]   ;;  %v1008_v14 = vld [vmem:[%s1260_s1 + $0x18] sm:$0xff]   ;;  %v1011_v17 = vld [vmem:[%s1260_s1 + $0x10] sm:$0xff]  }
   0x7   :  { %886 = vmatpush3.bf16.msra.mxu0 %v999_v4  ;;  %v1013_v18 = vld [vmem:[%s1260_s1 + $0x48] sm:$0xff]   ;;  %v1016_v21 = vld [vmem:[%s1260_s1 + $0x40] sm:$0xff]   ;;  %v1031_v32 = vld [vmem:[%s1261_s0 + $0x50] ss:$12 sps:$4 sm:$0xff]  }
   0x8   :  { %887 = vmatprep.subr.bf16.mxu0 %v1001_v6  ;;  %v1014_v19 = vld [vmem:[%s1260_s1 + $0x8] sm:$0xff]   ;;  %v1018_v22 = vld [vmem:[%s1260_s1 + $0x80] sm:$0xff]   ;;  %v1029_v34 = vld [vmem:[%s1261_s0 + $0x30] ss:$12 sps:$4 sm:$0xff]  }
   0x9   :  { %966 = vmatpush3.bf16.msra.mxu1 %v1000_v5  ;;  %v1015_v20 = vld [vmem:[%s1260_s1 + $0x88] sm:$0xff]   ;;  %v1021_v23 = vld [vmem:[%s1261_s0 + $0x4] ss:$12 sps:$4 sm:$0xff]   ;;  %v1027_v31 = vld [vmem:[%s1261_s0 + $0x34] ss:$12 sps:$4 sm:$0xff]  }
   0xa   :  { %967 = vmatprep.subr.bf16.mxu1 %v1003_v8  ;;  %v1022_v24 = vld [vmem:[%s1261_s0 + $0x8] ss:$12 sps:$4 sm:$0xff]   ;;  %v1017_v25 = vld [vmem:[%s1260_s1] sm:$0xff]   ;;  %435 = vmatprep.mubr.bf16.mxu0 %v1021_v23  ;;  %v1032_v35 = vld [vmem:[%s1261_s0 + $0x4c] ss:$12 sps:$4 sm:$0xff]  }
   0xb   :  { %888 = vmatpush3.bf16.msra.mxu0 %v1002_v7  ;;  %979 = vmatprep.mubr.bf16.mxu1 %v1022_v24  ;;  %v1019_v26 = vld [vmem:[%s1261_s0] ss:$12 sps:$4 sm:$0xff]   ;;  %v1024_v27 = vld [vmem:[%s1261_s0 + $0x1c] ss:$12 sps:$4 sm:$0xff]   ;;  %v1030_v29 = vld [vmem:[%s1261_s0 + $0x38] ss:$12 sps:$4 sm:$0xff]  }
   0xc   :  { %889 = vmatprep.subr.bf16.mxu0 %v1004_v9  ;;  %v1023_v28 = vld [vmem:[%s1261_s0 + $0x20] ss:$12 sps:$4 sm:$0xff]   ;;  %v1026_v30 = vld [vmem:[%s1261_s0 + $0x18] ss:$12 sps:$4 sm:$0xff]   ;;  %v1038_v33 = vld [vmem:[%s1261_s0 + $0x68] ss:$12 sps:$4 sm:$0xff]  }
   0xd   :  { %968 = vmatpush3.bf16.msra.mxu1 %v1003_v8  ;;  %v1039_v36 = vld [vmem:[%s1261_s0 + $0x80] ss:$12 sps:$4 sm:$0xff]   ;;  %v1046_v37 = vld [vmem:[%s1261_s0 + $0x98] ss:$12 sps:$4 sm:$0xff]   ;;  %v1034_v38 = vld [vmem:[%s1261_s0 + $0x48] ss:$12 sps:$4 sm:$0xff]  }
   0xe   :  { %969 = vmatprep.subr.bf16.mxu1 %v1006_v11  ;;  %v1035_v39 = vld [vmem:[%s1261_s0 + $0x64] ss:$12 sps:$4 sm:$0xff]   ;;  %v1037_v41 = vld [vmem:[%s1261_s0 + $0x60] ss:$12 sps:$4 sm:$0xff]   ;;  %v1040_v42 = vld [vmem:[%s1261_s0 + $0x7c] ss:$12 sps:$4 sm:$0xff]  }
   0xf   :  { %890 = vmatpush3.bf16.msra.mxu0 %v1005_v10  ;;  %v1047_v40 = vld [vmem:[%s1261_s0 + $0xb0] ss:$12 sps:$4 sm:$0xff]   ;;  %v1042_v43 = vld [vmem:[%s1261_s0 + $0x78] ss:$12 sps:$4 sm:$0xff]   ;;  %v1043_v44 = vld [vmem:[%s1261_s0 + $0x94] ss:$12 sps:$4 sm:$0xff]  }
  0x10   :  { %891 = vmatprep.subr.bf16.mxu0 %v1007_v12  ;;  %v1045_v45 = vld [vmem:[%s1261_s0 + $0x90] ss:$12 sps:$4 sm:$0xff]   ;;  %v1048_v46 = vld [vmem:[%s1261_s0 + $0xac] ss:$12 sps:$4 sm:$0xff]   ;;  %v1050_v47 = vld [vmem:[%s1261_s0 + $0xa8] ss:$12 sps:$4 sm:$0xff]  }
  0x11   :  { %970 = vmatpush3.bf16.msra.mxu1 %v1006_v11  ;;  %v1218_v58 = vld [vmem:[%s1262_s2] ss:$0 sm:$0xff] }
  0x12   :  { %971 = vmatprep.subr.bf16.mxu1 %v1009_v13 }
  0x13   :  { %892 = vmatpush3.bf16.msra.mxu0 %v1008_v14 }
  0x14   :  { %893 = vmatprep.subr.bf16.mxu0 %v1010_v15 }
  0x15   :  { %972 = vmatpush3.bf16.msra.mxu1 %v1009_v13 }
  0x16   :  { %973 = vmatprep.subr.bf16.mxu1 %v1012_v16 }
  0x17   :  { %894 = vmatpush3.bf16.msra.mxu0 %v1011_v17 }
  0x18   :  { %895 = vmatprep.subr.bf16.mxu0 %v1013_v18 }
  0x19   :  { %974 = vmatpush3.bf16.msra.mxu1 %v1012_v16 }
  0x1a   :  { %975 = vmatprep.subr.bf16.mxu1 %v1015_v20 }
  0x1b   :  { %896 = vmatpush3.bf16.msra.mxu0 %v1014_v19 }
  0x1c   :  { %897 = vmatprep.subr.bf16.mxu0 %v1016_v21 }
  0x1d   :  { %976 = vmatpush3.bf16.msra.mxu1 %v1015_v20 }
  0x1e   :  { %977 = vmatprep.subr.bf16.mxu1 %v1018_v22 }
  0x1f   :  { %898 = vmatpush3.bf16.msra.mxu0 %v1017_v25 }
  0x21   :  { %978 = vmatpush3.bf16.msra.mxu1 %v1018_v22 }
  0x22   :  { %436 = vmatmul.mubr.bf16.vlgmr.msra.gmra.mxu0 %v1019_v26 }
  0x23   :  { %443 = vmatprep.mubr.bf16.mxu0 %v1024_v27 }
  0x24   :  { %980 = vmatmul.mubr.bf16.vlgmr.msra.gmra.mxu1 %v1023_v28 }
  0x25   :  { %983 = vmatprep.mubr.bf16.mxu1 %v1030_v29 }
  0x2a   :  { %444 = vmatmul.mubr.bf16.gmra.mxu0 %v1026_v30 }
  0x2b   :  { %451 = vmatprep.mubr.bf16.mxu0 %v1027_v31 }
  0x2c   :  { %984 = vmatmul.mubr.bf16.gmra.mxu1 %v1031_v32 }
  0x2d   :  { %987 = vmatprep.mubr.bf16.mxu1 %v1038_v33 }
  0x32   :  { %452 = vmatmul.mubr.bf16.gmra.mxu0 %v1029_v34 }
  0x33   :  { %459 = vmatprep.mubr.bf16.mxu0 %v1032_v35 }
  0x34   :  { %988 = vmatmul.mubr.bf16.gmra.mxu1 %v1039_v36 }
  0x35   :  { %991 = vmatprep.mubr.bf16.mxu1 %v1046_v37 }
  0x3a   :  { %460 = vmatmul.mubr.bf16.gmra.mxu0 %v1034_v38 }
  0x3b   :  { %467 = vmatprep.mubr.bf16.mxu0 %v1035_v39 }
  0x3c   :  { %992 = vmatmul.mubr.bf16.gmra.mxu1 %v1047_v40 }
  0x42   :  { %468 = vmatmul.mubr.bf16.gmra.mxu0 %v1037_v41 }
  0x43   :  { %475 = vmatprep.mubr.bf16.mxu0 %v1040_v42 }
  0x4a   :  { %476 = vmatmul.mubr.bf16.gmra.mxu0 %v1042_v43 }
  0x4b   :  { %483 = vmatprep.mubr.bf16.mxu0 %v1043_v44 }
  0x52   :  { %484 = vmatmul.mubr.bf16.gmra.mxu0 %v1045_v45 }
  0x53   :  { %491 = vmatprep.mubr.bf16.mxu0 %v1048_v46 }
  0x5a   :  { %492 = vmatmul.mubr.bf16.gmra.mxu0 %v1050_v47 }
  0xe2   :  { %v899_v48 = vpop.f32.mrf.mxu0 }
  0xe4   :  { %v900_v49 = vpop.f32.mrf.mxu0  ;;  %v981_v50 = vpop.f32.mrf.mxu1 }
  0xe5   :  { %v901_v51 = vadd.f32 %v900_v49, %v899_v48 }
  0xe6   :  { %v902_v52 = vpop.f32.mrf.mxu0  ;;  %v534_v53 = vpop.f32.mrf.mxu1 }
  0xe7   :  { %v535_v56 = vadd.f32 %v901_v51, %v534_v53 }
  0xe8   :  { %v903_v54 = vpop.f32.mrf.mxu0  ;;  %v982_v55 = vpop.f32.mrf.mxu1 }
  0xe9   :  { %v904_v57 = vadd.f32 %v903_v54, %v902_v52  ;;  %v655_v0 = vadd.f32 %v1218_v58, %v535_v56 }
  0xea   :  { %v905_v59 = vpop.f32.mrf.mxu0  ;;  %v537_v60 = vpop.f32.mrf.mxu1 }
  0xeb   :  { %v538_v61 = vadd.f32 %v904_v57, %v537_v60 }
  0xec   :  { %v906_v62 = vpop.f32.mrf.mxu0  ;;  %v985_v63 = vpop.f32.mrf.mxu1 }
  0xed   :  { %v656_v1 = vadd.f32 %v1218_v58, %v538_v61  ;;  %v907_v2 = vadd.f32 %v906_v62, %v905_v59 }
  0xee   :  { %v908_v3 = vpop.f32.mrf.mxu0  ;;  %v550_v6 = vpop.f32.mrf.mxu1 }
  0xef   :  { %v839_v4 = vpack.c.bf16 %v656_v1, %v655_v0  ;;  %v543_v7 = vadd.f32 %v981_v50, %v907_v2 }
  0xf0   :  { %v909_v5 = vpop.f32.mrf.mxu0  ;;  %v986_v12 = vpop.f32.mrf.mxu1 }
  0xf1   :  { %840 = vst [vmem:[%s1263_s3] sm:$0xff] %v839_v4   ;;  %v910_v8 = vadd.f32 %v909_v5, %v908_v3  ;;  %v657_v13 = vadd.f32 %v1218_v58, %v543_v7 }
  0xf2   :  { %v911_v9 = vpop.f32.mrf.mxu0  ;;  %v553_v19 = vpop.f32.mrf.mxu1 }
  0xf3   :  { %v546_v10 = vadd.f32 %v982_v55, %v910_v8 }
  0xf4   :  { %v912_v11 = vpop.f32.mrf.mxu0  ;;  %v989_v25 = vpop.f32.mrf.mxu1 }
  0xf5   :  { %v658_v14 = vadd.f32 %v1218_v58, %v546_v10  ;;  %v913_v15 = vadd.f32 %v912_v11, %v911_v9 }
  0xf6   :  { %v914_v16 = vpop.f32.mrf.mxu0  ;;  %v566_v32 = vpop.f32.mrf.mxu1 }
  0xf7   :  { %v844_v17 = vpack.c.bf16 %v658_v14, %v657_v13  ;;  %v551_v20 = vadd.f32 %v913_v15, %v550_v6 }
  0xf8   :  { %v915_v18 = vpop.f32.mrf.mxu0  ;;  %v990_v38 = vpop.f32.mrf.mxu1 }
  0xf9   :  { %876 = vst [vmem:[%s1263_s3 + $0x8] sm:$0xff] %v844_v17   ;;  %v916_v21 = vadd.f32 %v915_v18, %v914_v16  ;;  %v659_v26 = vadd.f32 %v1218_v58, %v551_v20 }
  0xfa   :  { %v917_v22 = vpop.f32.mrf.mxu0  ;;  %v569_v45 = vpop.f32.mrf.mxu1 }
  0xfb   :  { %v554_v23 = vadd.f32 %v916_v21, %v553_v19 }
  0xfc   :  { %v918_v24 = vpop.f32.mrf.mxu0  ;;  %v993_v51 = vpop.f32.mrf.mxu1 }
  0xfd   :  { %v660_v27 = vadd.f32 %v1218_v58, %v554_v23  ;;  %v919_v28 = vadd.f32 %v918_v24, %v917_v22 }
  0xfe   :  { %v920_v29 = vpop.f32.mrf.mxu0  ;;  %v582_v59 = vpop.f32.mrf.mxu1 }
  0xff   :  { %v849_v30 = vpack.c.bf16 %v660_v27, %v659_v26  ;;  %v559_v33 = vadd.f32 %v985_v63, %v919_v28 }
 0x100   :  { %v921_v31 = vpop.f32.mrf.mxu0  ;;  %v994_v1 = vpop.f32.mrf.mxu1 }
 0x101   :  { %877 = vst [vmem:[%s1263_s3 + $0x10] sm:$0xff] %v849_v30   ;;  %v922_v34 = vadd.f32 %v921_v31, %v920_v29  ;;  %v661_v39 = vadd.f32 %v1218_v58, %v559_v33 }
 0x102   :  { %v923_v35 = vpop.f32.mrf.mxu0  ;;  %v585_v8 = vpop.f32.mrf.mxu1 }
 0x103   :  { %v562_v36 = vadd.f32 %v986_v12, %v922_v34 }
 0x104   :  { %v924_v37 = vpop.f32.mrf.mxu0 }
 0x105   :  { %v662_v40 = vadd.f32 %v1218_v58, %v562_v36  ;;  %v925_v41 = vadd.f32 %v924_v37, %v923_v35 }
 0x106   :  { %v926_v42 = vpop.f32.mrf.mxu0 }
 0x107   :  { %v854_v43 = vpack.c.bf16 %v662_v40, %v661_v39  ;;  %v567_v46 = vadd.f32 %v925_v41, %v566_v32 }
 0x108   :  { %v927_v44 = vpop.f32.mrf.mxu0 }
 0x109   :  { %878 = vst [vmem:[%s1263_s3 + $0x18] sm:$0xff] %v854_v43   ;;  %v928_v47 = vadd.f32 %v927_v44, %v926_v42  ;;  %v663_v52 = vadd.f32 %v1218_v58, %v567_v46 }
 0x10a   :  { %v929_v48 = vpop.f32.mrf.mxu0 }
 0x10b   :  { %v570_v49 = vadd.f32 %v928_v47, %v569_v45 }
 0x10c   :  { %v930_v50 = vpop.f32.mrf.mxu0 }
 0x10d   :  { %v664_v53 = vadd.f32 %v1218_v58, %v570_v49  ;;  %v931_v54 = vadd.f32 %v930_v50, %v929_v48 }
 0x10e   :  { %v932_v55 = vpop.f32.mrf.mxu0 }
 0x10f   :  { %v859_v56 = vpack.c.bf16 %v664_v53, %v663_v52  ;;  %v575_v60 = vadd.f32 %v989_v25, %v931_v54 }
 0x110   :  { %v933_v57 = vpop.f32.mrf.mxu0 }
 0x111   :  { %879 = vst [vmem:[%s1263_s3 + $0x20] sm:$0xff] %v859_v56   ;;  %v934_v61 = vadd.f32 %v933_v57, %v932_v55  ;;  %v665_v2 = vadd.f32 %v1218_v58, %v575_v60 }
 0x112   :  { %v935_v62 = vpop.f32.mrf.mxu0 }
 0x113   :  { %v578_v63 = vadd.f32 %v990_v38, %v934_v61 }
 0x114   :  { %v936_v0 = vpop.f32.mrf.mxu0 }
 0x115   :  { %v666_v3 = vadd.f32 %v1218_v58, %v578_v63  ;;  %v937_v4 = vadd.f32 %v936_v0, %v935_v62 }
 0x116   :  { %v938_v5 = vpop.f32.mrf.mxu0 }
 0x117   :  { %v864_v6 = vpack.c.bf16 %v666_v3, %v665_v2  ;;  %v583_v9 = vadd.f32 %v937_v4, %v582_v59 }
 0x118   :  { %v939_v7 = vpop.f32.mrf.mxu0 }
 0x119   :  { %880 = vst [vmem:[%s1263_s3 + $0x28] sm:$0xff] %v864_v6   ;;  %v940_v10 = vadd.f32 %v939_v7, %v938_v5  ;;  %v667_v14 = vadd.f32 %v1218_v58, %v583_v9 }
 0x11a   :  { %v941_v11 = vpop.f32.mrf.mxu0 }
 0x11b   :  { %v586_v12 = vadd.f32 %v940_v10, %v585_v8 }
 0x11c   :  { %v942_v13 = vpop.f32.mrf.mxu0 }
 0x11d   :  { %v668_v15 = vadd.f32 %v1218_v58, %v586_v12  ;;  %v943_v16 = vadd.f32 %v942_v13, %v941_v11 }
 0x11e   :  { %v944_v17 = vpop.f32.mrf.mxu0 }
 0x11f   :  { %v869_v18 = vpack.c.bf16 %v668_v15, %v667_v14  ;;  %v591_v20 = vadd.f32 %v993_v51, %v943_v16 }
 0x120   :  { %v945_v19 = vpop.f32.mrf.mxu0 }
 0x121   :  { %881 = vst [vmem:[%s1263_s3 + $0x30] sm:$0xff] %v869_v18   ;;  %v946_v21 = vadd.f32 %v945_v19, %v944_v17  ;;  %v669_v23 = vadd.f32 %v1218_v58, %v591_v20 }
 0x123   :  { %v594_v22 = vadd.f32 %v994_v1, %v946_v21 }
 0x125   :  { %v670_v24 = vadd.f32 %v1218_v58, %v594_v22 }
 0x127   :  { %v874_v25 = vpack.c.bf16 %v670_v24, %v669_v23 }
 0x129   :  { %882 = vst [vmem:[%s1263_s3 + $0x38] sm:$0xff] %v874_v25  }

// kernel: extended_mask2former_forward.16
= control target key start
LH: loop header
LB: loop body
LE: loop exit
PB: predicated region body
PF: predicated region fallthrough
CT: control target
= control target key end

     0   :  { %s666_s1 = inlined_call_operand.vmem [shape: bf16[384,128], index: 1, kind: input, shape index: {}]   ;;  %s667_s0 = inlined_call_operand.vmem [shape: bf16[32,384], index: 0, kind: input, shape index: {}]   ;;  %s668_s2 = inlined_call_operand.vmem [shape: f32[1,128], index: 2, kind: input, shape index: {}]   ;;  %s669_s3 = inlined_call_operand.vmem [shape: bf16[32,128], index: 3, kind: output, shape index: {}]  }
   0x1   :  { %v515_v0 = vld [vmem:[%s666_s1 + $0x78] sm:$0xff]   ;;  %v518_v3 = vld [vmem:[%s666_s1 + $0x70] sm:$0xff]   ;;  %v521_v6 = vld [vmem:[%s666_s1 + $0x68] sm:$0xff]  }
   0x2   :  { %v516_v1 = vld [vmem:[%s666_s1 + $0x38] sm:$0xff]   ;;  %457 = vmatprep.subr.bf16.mxu0 %v515_v0  ;;  %v519_v4 = vld [vmem:[%s666_s1 + $0x30] sm:$0xff]   ;;  %v522_v7 = vld [vmem:[%s666_s1 + $0x28] sm:$0xff]  }
   0x3   :  { %v517_v2 = vld [vmem:[%s666_s1 + $0xb8] sm:$0xff]   ;;  %458 = vmatpush3.bf16.msra.mxu0 %v516_v1  ;;  %v520_v5 = vld [vmem:[%s666_s1 + $0xb0] sm:$0xff]   ;;  %v523_v8 = vld [vmem:[%s666_s1 + $0xa8] sm:$0xff]  }
   0x4   :  { %495 = vmatprep.subr.bf16.mxu1 %v517_v2  ;;  %459 = vmatprep.subr.bf16.mxu0 %v518_v3  ;;  %v524_v9 = vld [vmem:[%s666_s1 + $0x60] sm:$0xff]   ;;  %v527_v12 = vld [vmem:[%s666_s1 + $0x58] sm:$0xff]   ;;  %v530_v15 = vld [vmem:[%s666_s1 + $0x50] sm:$0xff]  }
   0x5   :  { %496 = vmatpush3.bf16.msra.mxu1 %v517_v2  ;;  %v525_v10 = vld [vmem:[%s666_s1 + $0x20] sm:$0xff]   ;;  %v529_v13 = vld [vmem:[%s666_s1 + $0x98] sm:$0xff]   ;;  %v532_v16 = vld [vmem:[%s666_s1 + $0x90] sm:$0xff]  }
   0x6   :  { %497 = vmatprep.subr.bf16.mxu1 %v520_v5  ;;  %v526_v11 = vld [vmem:[%s666_s1 + $0xa0] sm:$0xff]   ;;  %v528_v14 = vld [vmem:[%s666_s1 + $0x18] sm:$0xff]   ;;  %v531_v17 = vld [vmem:[%s666_s1 + $0x10] sm:$0xff]  }
   0x7   :  { %460 = vmatpush3.bf16.msra.mxu0 %v519_v4  ;;  %v533_v18 = vld [vmem:[%s666_s1 + $0x48] sm:$0xff]   ;;  %v536_v21 = vld [vmem:[%s666_s1 + $0x40] sm:$0xff]  }
   0x8   :  { %461 = vmatprep.subr.bf16.mxu0 %v521_v6  ;;  %v534_v19 = vld [vmem:[%s666_s1 + $0x8] sm:$0xff]   ;;  %v538_v22 = vld [vmem:[%s666_s1 + $0x80] sm:$0xff]  }
   0x9   :  { %498 = vmatpush3.bf16.msra.mxu1 %v520_v5  ;;  %v535_v20 = vld [vmem:[%s666_s1 + $0x88] sm:$0xff]   ;;  %v541_v23 = vld [vmem:[%s667_s0 + $0x4] ss:$12 sps:$4 sm:$0xff]   ;;  %v437_v40 = vld [vmem:[%s668_s2] ss:$0 sm:$0xff] }
   0xa   :  { %499 = vmatprep.subr.bf16.mxu1 %v523_v8  ;;  %v542_v24 = vld [vmem:[%s667_s0 + $0x8] ss:$12 sps:$4 sm:$0xff]   ;;  %v537_v25 = vld [vmem:[%s666_s1] sm:$0xff]   ;;  %291 = vmatprep.mubr.bf16.mxu0 %v541_v23 }
   0xb   :  { %462 = vmatpush3.bf16.msra.mxu0 %v522_v7  ;;  %511 = vmatprep.mubr.bf16.mxu1 %v542_v24  ;;  %v539_v26 = vld [vmem:[%s667_s0] ss:$12 sps:$4 sm:$0xff]   ;;  %v544_v27 = vld [vmem:[%s667_s0 + $0x1c] ss:$12 sps:$4 sm:$0xff]   ;;  %v546_v29 = vld [vmem:[%s667_s0 + $0x18] ss:$12 sps:$4 sm:$0xff]  }
   0xc   :  { %463 = vmatprep.subr.bf16.mxu0 %v524_v9  ;;  %v543_v28 = vld [vmem:[%s667_s0 + $0x20] ss:$12 sps:$4 sm:$0xff]  }
   0xd   :  { %500 = vmatpush3.bf16.msra.mxu1 %v523_v8 }
   0xe   :  { %501 = vmatprep.subr.bf16.mxu1 %v526_v11 }
   0xf   :  { %464 = vmatpush3.bf16.msra.mxu0 %v525_v10 }
  0x10   :  { %465 = vmatprep.subr.bf16.mxu0 %v527_v12 }
  0x11   :  { %502 = vmatpush3.bf16.msra.mxu1 %v526_v11 }
  0x12   :  { %503 = vmatprep.subr.bf16.mxu1 %v529_v13 }
  0x13   :  { %466 = vmatpush3.bf16.msra.mxu0 %v528_v14 }
  0x14   :  { %467 = vmatprep.subr.bf16.mxu0 %v530_v15 }
  0x15   :  { %504 = vmatpush3.bf16.msra.mxu1 %v529_v13 }
  0x16   :  { %505 = vmatprep.subr.bf16.mxu1 %v532_v16 }
  0x17   :  { %468 = vmatpush3.bf16.msra.mxu0 %v531_v17 }
  0x18   :  { %469 = vmatprep.subr.bf16.mxu0 %v533_v18 }
  0x19   :  { %506 = vmatpush3.bf16.msra.mxu1 %v532_v16 }
  0x1a   :  { %507 = vmatprep.subr.bf16.mxu1 %v535_v20 }
  0x1b   :  { %470 = vmatpush3.bf16.msra.mxu0 %v534_v19 }
  0x1c   :  { %471 = vmatprep.subr.bf16.mxu0 %v536_v21 }
  0x1d   :  { %508 = vmatpush3.bf16.msra.mxu1 %v535_v20 }
  0x1e   :  { %509 = vmatprep.subr.bf16.mxu1 %v538_v22 }
  0x1f   :  { %472 = vmatpush3.bf16.msra.mxu0 %v537_v25 }
  0x21   :  { %510 = vmatpush3.bf16.msra.mxu1 %v538_v22 }
  0x22   :  { %292 = vmatmul.mubr.bf16.vlgmr.msra.gmra.mxu0 %v539_v26 }
  0x23   :  { %299 = vmatprep.mubr.bf16.mxu0 %v544_v27 }
  0x24   :  { %512 = vmatmul.mubr.bf16.vlgmr.msra.gmra.mxu1 %v543_v28 }
  0x2a   :  { %300 = vmatmul.mubr.bf16.gmra.mxu0 %v546_v29 }
  0xe2   :  { %v473_v30 = vpop.f32.mrf.mxu0 }
  0xe4   :  { %v474_v31 = vpop.f32.mrf.mxu0  ;;  %v513_v32 = vpop.f32.mrf.mxu1 }
  0xe5   :  { %v475_v33 = vadd.f32 %v474_v31, %v473_v30 }
  0xe6   :  { %v476_v34 = vpop.f32.mrf.mxu0  ;;  %v342_v35 = vpop.f32.mrf.mxu1 }
  0xe7   :  { %v343_v38 = vadd.f32 %v475_v33, %v342_v35 }
  0xe8   :  { %v477_v36 = vpop.f32.mrf.mxu0  ;;  %v514_v37 = vpop.f32.mrf.mxu1 }
  0xe9   :  { %v478_v39 = vadd.f32 %v477_v36, %v476_v34  ;;  %v379_v45 = vadd.f32 %v437_v40, %v343_v38 }
  0xea   :  { %v479_v41 = vpop.f32.mrf.mxu0  ;;  %v345_v42 = vpop.f32.mrf.mxu1 }
  0xeb   :  { %v346_v43 = vadd.f32 %v478_v39, %v345_v42 }
  0xec   :  { %v480_v44 = vpop.f32.mrf.mxu0 }
  0xed   :  { %v380_v46 = vadd.f32 %v437_v40, %v346_v43  ;;  %v481_v47 = vadd.f32 %v480_v44, %v479_v41 }
  0xee   :  { %v482_v48 = vpop.f32.mrf.mxu0 }
  0xef   :  { %v449_v49 = vpack.c.bf16 %v380_v46, %v379_v45  ;;  %v351_v51 = vadd.f32 %v513_v32, %v481_v47 }
  0xf0   :  { %v483_v50 = vpop.f32.mrf.mxu0 }
  0xf1   :  { %450 = vst [vmem:[%s669_s3] sm:$0xff] %v449_v49   ;;  %v484_v52 = vadd.f32 %v483_v50, %v482_v48  ;;  %v381_v54 = vadd.f32 %v437_v40, %v351_v51 }
  0xf3   :  { %v354_v53 = vadd.f32 %v514_v37, %v484_v52 }
  0xf5   :  { %v382_v55 = vadd.f32 %v437_v40, %v354_v53 }
  0xf7   :  { %v454_v56 = vpack.c.bf16 %v382_v55, %v381_v54 }
  0xf9   :  { %456 = vst [vmem:[%s669_s3 + $0x8] sm:$0xff] %v454_v56  }

// kernel: extended_mask2former_forward.19
= control target key start
LH: loop header
LB: loop body
LE: loop exit
PB: predicated region body
PF: predicated region fallthrough
CT: control target
= control target key end

     0   :  { %s536_s9 = smov 0   ;;  %s538_s10 = smov 0   ;;  %s586_s0 = inlined_call_operand.vmem [shape: bf16[2,8,32], index: 0, kind: input, shape index: {}]   ;;  %s587_s1 = inlined_call_operand.vmem [shape: bf16[2,128,32], index: 1, kind: input, shape index: {}]   ;;  %s588_s2 = inlined_call_operand.vmem [shape: f32[2,8,128], index: 2, kind: output, shape index: {}]  }
   0x1   :  { %s540_s11 = smov 0  }
   0x2 LB: > { %s24_s12 = sadd.s32 1, %s513_s10  ;;  %p415_p0 = scmp.ge.s32.totalorder %s517_s11, 1  ;;  %s517_s11 = sphi %s540_s11, %s12_s11   ;;  %s513_s10 = sphi %s538_s10, %s590_s10   ;;  %s509_s9 = sphi %s536_s9, %s589_s9  }
   0x3   : > { %p26_p1 = scmp.ge.s32.totalorder %s24_s12, 2  ;;  %p142_p2 = scmp.lt.s32.totalorder %s517_s11, 3 }
   0x5   : > { %s592_s12 = smov (%p26_p1, %s24_s12), 0  ;;  %p143_p3 = pnand %p415_p0, %p142_p2 }
   0x6   : > { %p174_p4 = scmp.lt.s32.totalorder (!%p143_p3), %s509_s9, 1 }
   0x7   : > { %146 = sbr.rel (%p143_p3) target bundleno = 279 (0x117), region = 28 }
   0xc   : > { %v519_v0 = vmov 0.0   ;;  %vm520_vm0 = vmmov 0   ;;  %s594_s9 = smov (!%p174_p4, %s509_s9), 1  ;;  %vm253_vm1 = vcmask 261120  }
   0xd   : > { %441 = vmatprep.subr.bf16.mxu0 %v519_v0  ;;  %457 = vmatprep.mubr.msk.bf16.mxu0 %vm520_vm0, %v519_v0  ;;  %s431_s13 = sshll.u32 %s594_s9, 6  ;;  %s416_s17 = sshll.u32 %s594_s9, 2 }
   0xe   : > { %s186_s16 = scalar_lea.vmem %s587_s1, %s431_s13  ;;  %s177_s20 = scalar_lea.vmem %s586_s0, %s416_s17 }
   0xf   : > { %v487_v1 = vld [vmem:[%s186_s16 + $0x38] sm:$0xff]   ;;  %v488_v3 = vld [vmem:[%s186_s16 + $0x30] sm:$0xff]   ;;  %v489_v5 = vld [vmem:[%s186_s16 + $0x28] sm:$0xff]   ;;  %s419_s21 = sshll.u32 %s594_s9, 3 }
  0x10   : > { %v279_v2 = vsel %vm253_vm1, %v487_v1, 0  ;;  %v276_v4 = vsel %vm253_vm1, %v488_v3, 0  ;;  %v273_v6 = vsel %vm253_vm1, %v489_v5, 0  ;;  %v490_v7 = vld [vmem:[%s186_s16 + $0x20] sm:$0xff]   ;;  %v491_v9 = vld [vmem:[%s186_s16 + $0x18] sm:$0xff]   ;;  %v492_v11 = vld [vmem:[%s186_s16 + $0x10] sm:$0xff]   ;;  %s194_s24 = scalar_lea.vmem %s588_s2, %s419_s21 }
  0x11   : > { %442 = vmatpush3.bf16.xpose.msra.mxu0 %v279_v2  ;;  %v270_v8 = vsel %vm253_vm1, %v490_v7, 0  ;;  %v267_v10 = vsel %vm253_vm1, %v491_v9, 0  ;;  %v264_v12 = vsel %vm253_vm1, %v492_v11, 0  ;;  %v493_v13 = vld [vmem:[%s186_s16 + $0x8] sm:$0xff]   ;;  %v494_v15 = vld [vmem:[%s186_s16] sm:$0xff]  }
  0x12   : > { %443 = vmatprep.subr.bf16.mxu0 %v519_v0  ;;  %v261_v14 = vsel %vm253_vm1, %v493_v13, 0  ;;  %v258_v16 = vsel %vm253_vm1, %v494_v15, 0  ;;  %v196_v17 = vld [vmem:[%s177_s20] sm:$0xf] }
  0x19   : > { %444 = vmatpush3.bf16.xpose.msra.mxu0 %v276_v4 }
  0x1a   : > { %445 = vmatprep.subr.bf16.mxu0 %v519_v0 }
  0x21   : > { %446 = vmatpush3.bf16.xpose.msra.mxu0 %v273_v6 }
  0x22   : > { %447 = vmatprep.subr.bf16.mxu0 %v519_v0 }
  0x29   : > { %448 = vmatpush3.bf16.xpose.msra.mxu0 %v270_v8 }
  0x2a   : > { %449 = vmatprep.subr.bf16.mxu0 %v519_v0 }
  0x31   : > { %450 = vmatpush3.bf16.xpose.msra.mxu0 %v267_v10 }
  0x32   : > { %451 = vmatprep.subr.bf16.mxu0 %v519_v0 }
  0x39   : > { %452 = vmatpush3.bf16.xpose.msra.mxu0 %v264_v12 }
  0x3a   : > { %453 = vmatprep.subr.bf16.mxu0 %v519_v0 }
  0x41   : > { %454 = vmatpush3.bf16.xpose.msra.mxu0 %v261_v14 }
  0x42   : > { %455 = vmatprep.subr.bf16.mxu0 %v519_v0 }
  0x49   : > { %456 = vmatpush3.bf16.xpose.msra.mxu0 %v258_v16 }
  0x50   : > { %458 = vmatmul.mubr.msk.bf16.vlgmr.msra.gmra.mxu0 %vm253_vm1, %v196_v17 }
 0x110   : > { %v315_v18 = vpop.f32.mrf.mxu0 }
 0x111   : > { %321 = vst [vmem:[%s194_s24] sm:$0xff] %v315_v18 }
 0x112   : > { %v459_v19 = vpop.f32.mrf.mxu0 }
 0x114   : > { %v318_v20 = vpop.f32.mrf.mxu0 }
 0x116   : > { %v460_v21 = vpop.f32.mrf.mxu0 }
 0x117 PF: > { %s12_s11 = sadd.s32 1, %s517_s11   ;;  %s589_s9 = smov %s513_s10 }
 0x118   : > { %p9_p5 = scmp.ge.s32.totalorder %s12_s11, 4   ;;  %s590_s10 = smov %s592_s12 }
 0x11a   :  { %11 = sbr.rel (!%p9_p5) target bundleno = 2 (0x2), region = 61 }

// kernel: extended_mask2former_forward.17
= control target key start
LH: loop header
LB: loop body
LE: loop exit
PB: predicated region body
PF: predicated region fallthrough
CT: control target
= control target key end

     0   :  { %s306_s1 = inlined_call_operand.vmem [shape: bf16[128,128], index: 1, kind: input, shape index: {}]   ;;  %s307_s0 = inlined_call_operand.vmem [shape: bf16[32,128], index: 0, kind: input, shape index: {}]   ;;  %s308_s2 = inlined_call_operand.vmem [shape: f32[1,128], index: 2, kind: input, shape index: {}]   ;;  %s309_s3 = inlined_call_operand.vmem [shape: f32[32,128], index: 3, kind: output, shape index: {}]  }
   0x1   :  { %v231_v0 = vld [vmem:[%s306_s1 + $0x38] sm:$0xff]   ;;  %v232_v1 = vld [vmem:[%s306_s1 + $0x30] sm:$0xff]   ;;  %v233_v2 = vld [vmem:[%s306_s1 + $0x28] sm:$0xff]  }
   0x2   :  { %211 = vmatprep.subr.bf16.mxu0 %v231_v0  ;;  %v234_v3 = vld [vmem:[%s306_s1 + $0x20] sm:$0xff]   ;;  %v235_v5 = vld [vmem:[%s306_s1 + $0x18] sm:$0xff]   ;;  %v236_v6 = vld [vmem:[%s306_s1 + $0x10] sm:$0xff]  }
   0x3   :  { %212 = vmatpush3.bf16.msra.mxu0 %v231_v0  ;;  %v239_v4 = vld [vmem:[%s307_s0] sm:$0xff]   ;;  %v237_v7 = vld [vmem:[%s306_s1 + $0x8] sm:$0xff]  }
   0x4   :  { %213 = vmatprep.subr.bf16.mxu0 %v232_v1  ;;  %227 = vmatprep.mubr.bf16.mxu0 %v239_v4  ;;  %v238_v8 = vld [vmem:[%s306_s1] sm:$0xff]   ;;  %v240_v9 = vld [vmem:[%s307_s0 + $0x8] sm:$0xff]  }
   0x5   :  { %v200_v10 = vld [vmem:[%s308_s2] ss:$0 sm:$0xff] }
   0x7   :  { %214 = vmatpush3.bf16.msra.mxu0 %v232_v1 }
   0x8   :  { %215 = vmatprep.subr.bf16.mxu0 %v233_v2 }
   0xb   :  { %216 = vmatpush3.bf16.msra.mxu0 %v233_v2 }
   0xc   :  { %217 = vmatprep.subr.bf16.mxu0 %v234_v3 }
   0xf   :  { %218 = vmatpush3.bf16.msra.mxu0 %v234_v3 }
  0x10   :  { %219 = vmatprep.subr.bf16.mxu0 %v235_v5 }
  0x13   :  { %220 = vmatpush3.bf16.msra.mxu0 %v235_v5 }
  0x14   :  { %221 = vmatprep.subr.bf16.mxu0 %v236_v6 }
  0x17   :  { %222 = vmatpush3.bf16.msra.mxu0 %v236_v6 }
  0x18   :  { %223 = vmatprep.subr.bf16.mxu0 %v237_v7 }
  0x1b   :  { %224 = vmatpush3.bf16.msra.mxu0 %v237_v7 }
  0x1c   :  { %225 = vmatprep.subr.bf16.mxu0 %v238_v8 }
  0x1f   :  { %226 = vmatpush3.bf16.msra.mxu0 %v238_v8 }
  0x22   :  { %228 = vmatmul.mubr.bf16.vlgmr.msra.gmra.mxu0 %v240_v9 }
  0xe2   :  { %v229_v11 = vpop.f32.mrf.mxu0 }
  0xe3   :  { %v180_v12 = vadd.f32 %v229_v11, %v200_v10 }
  0xe4   :  { %v141_v13 = vpop.f32.mrf.mxu0 }
  0xe5   :  { %184 = vst [vmem:[%s309_s3 + $0x10] sm:$0xff] %v180_v12  ;;  %v178_v14 = vadd.f32 %v200_v10, %v141_v13 }
  0xe6   :  { %v230_v15 = vpop.f32.mrf.mxu0 }
  0xe7   :  { %182 = vst [vmem:[%s309_s3] sm:$0xff] %v178_v14  ;;  %v181_v16 = vadd.f32 %v230_v15, %v200_v10 }
  0xe8   :  { %v144_v17 = vpop.f32.mrf.mxu0 }
  0xe9   :  { %185 = vst [vmem:[%s309_s3 + $0x18] sm:$0xff] %v181_v16  ;;  %v179_v18 = vadd.f32 %v200_v10, %v144_v17 }
  0xeb   :  { %183 = vst [vmem:[%s309_s3 + $0x8] sm:$0xff] %v179_v18 }

// kernel: extended_mask2former_forward.18
= control target key start
LH: loop header
LB: loop body
LE: loop exit
PB: predicated region body
PF: predicated region fallthrough
CT: control target
= control target key end

     0   :  { %s3450_s6 = smov 1   ;;  %s3451_s10 = smov 2   ;;  %s3946_s0 = inlined_call_operand.smem [shape: u32[30], index: -1, kind: input, shape index: {}] }
   0x1   :  { %s3500_s5 = sld [smem:[%s3946_s0]]   ;;  %s3452_s14 = smov 3  }
   0x2   :  { %s3505_s9 = sld [smem:[%s3946_s0 + %s3450_s6]]   ;;  %s3453_s18 = smov 4  }
   0x3   :  { %s3510_s13 = sld [smem:[%s3946_s0 + %s3451_s10]]   ;;  %s3454_s22 = smov 5  }
   0x4   :  { %s3515_s17 = sld [smem:[%s3946_s0 + %s3452_s14]]   ;;  %s3455_s26 = smov 6  }
   0x5   :  { %s3520_s21 = sld [smem:[%s3946_s0 + %s3453_s18]]   ;;  %s3456_s30 = smov 7  }
   0x6   :  { %s3525_s25 = sld [smem:[%s3946_s0 + %s3454_s22]]   ;;  %s3457_s4 = smov 8  }
   0x7   :  { %s3530_s29 = sld [smem:[%s3946_s0 + %s3455_s26]]   ;;  %s3458_s10 = smov 9  }
   0x8   :  { %s3535_s3 = sld [smem:[%s3946_s0 + %s3456_s30]]   ;;  %s3459_s15 = smov 10  }
   0x9   :  { %s3540_s8 = sld [smem:[%s3946_s0 + %s3457_s4]]   ;;  %s3460_s20 = smov 11  }
   0xa   :  { %s3545_s14 = sld [smem:[%s3946_s0 + %s3458_s10]]   ;;  %s3461_s26 = smov 12  }
   0xb   :  { %s3550_s19 = sld [smem:[%s3946_s0 + %s3459_s15]]   ;;  %s3462_s1 = smov 13  }
   0xc   :  { %s3555_s24 = sld [smem:[%s3946_s0 + %s3460_s20]]   ;;  %s3463_s7 = smov 14  }
   0xd   :  { %s3560_s30 = sld [smem:[%s3946_s0 + %s3461_s26]]   ;;  %s3464_s15 = smov 15  }
   0xe   :  { %s3565_s6 = sld [smem:[%s3946_s0 + %s3462_s1]]   ;;  %s3465_s22 = smov 16  }
   0xf   :  { %s3570_s12 = sld [smem:[%s3946_s0 + %s3463_s7]]   ;;  %s3466_s28 = smov 17  }
  0x10   :  { %s3575_s20 = sld [smem:[%s3946_s0 + %s3464_s15]]   ;;  %s3467_s7 = smov 18  }
  0x11   :  { %s3580_s27 = sld [smem:[%s3946_s0 + %s3465_s22]]   ;;  %s3468_s15 = smov 19  }
  0x12   :  { %s3585_s4 = sld [smem:[%s3946_s0 + %s3466_s28]]   ;;  %s3469_s22 = smov 20  }
  0x13   :  { %s3470_s28 = smov 21  }
  0x15   :  { %3951 = sst [smem:[#allocation2_spill]] %s3570_s12 }
  0x16   :  { %3952 = sst [smem:[#allocation3_spill]] %s3575_s20 }
  0x17   :  { %3953 = sst [smem:[#allocation4_spill]] %s3580_s27 }
  0x18   :  { %3954 = sst [smem:[#allocation5_spill]] %s3585_s4 }
  0x19   :  { %s3590_s12 = sld [smem:[%s3946_s0 + %s3467_s7]]   ;;  %s3471_s7 = smov 22  }
  0x1a   :  { %s3595_s20 = sld [smem:[%s3946_s0 + %s3468_s15]]   ;;  %s3472_s15 = smov 23  }
  0x1b   :  { %s3600_s27 = sld [smem:[%s3946_s0 + %s3469_s22]]   ;;  %s3473_s22 = smov 24  }
  0x1c   :  { %s3605_s4 = sld [smem:[%s3946_s0 + %s3470_s28]]   ;;  %s3474_s28 = smov 25  }
  0x1f   :  { %3955 = sst [smem:[#allocation6_spill]] %s3590_s12 }
  0x20   :  { %3956 = sst [smem:[#allocation7_spill]] %s3595_s20 }
  0x21   :  { %3957 = sst [smem:[#allocation8_spill]] %s3600_s27 }
  0x22   :  { %3958 = sst [smem:[#allocation9_spill]] %s3605_s4 }
  0x23   :  { %s3610_s12 = sld [smem:[%s3946_s0 + %s3471_s7]]   ;;  %s3475_s7 = smov 26  }
  0x24   :  { %s3615_s20 = sld [smem:[%s3946_s0 + %s3472_s15]]   ;;  %s3476_s15 = smov 27  }
  0x25   :  { %s3620_s27 = sld [smem:[%s3946_s0 + %s3473_s22]]   ;;  %s3477_s22 = smov 28  }
  0x26   :  { %s3625_s4 = sld [smem:[%s3946_s0 + %s3474_s28]]   ;;  %s3478_s28 = smov 29  }
  0x29   :  { %3959 = sst [smem:[#allocation10_spill]] %s3610_s12 }
  0x2a   :  { %3960 = sst [smem:[#allocation11_spill]] %s3615_s20 }
  0x2b   :  { %3961 = sst [smem:[#allocation12_spill]] %s3620_s27 }
  0x2c   :  { %3962 = sst [smem:[#allocation13_spill]] %s3625_s4 }
  0x2d   :  { %s3630_s12 = sld [smem:[%s3946_s0 + %s3475_s7]]   ;;  %s3647_s7 = smov 0  }
  0x2e   :  { %s3635_s20 = sld [smem:[%s3946_s0 + %s3476_s15]]  }
  0x2f   :  { %s3640_s27 = sld [smem:[%s3946_s0 + %s3477_s22]]  }
  0x30   :  { %s3645_s4 = sld [smem:[%s3946_s0 + %s3478_s28]]  }
  0x31 LB: > { %s2970_s10 = sadd.s32 4294967295, %s3448_s7   ;;  %p2974_p0 = scmp.ge.s32.totalorder %s3448_s7, 1  ;;  %s3448_s7 = sphi %s3647_s7, %s70_s7  }
  0x32   : > { %p820_p1 = scmp.lt.s32.totalorder %s3448_s7, 3 }
  0x34   : > { %p821_p2 = pnand %p2974_p0, %p820_p1 }
  0x35   : > { %p899_p3 = scmp.lt.s32.totalorder (!%p821_p2), %s2970_s10, 1  ;;  %s3481_s15 = smov (!%p821_p2), 96  }
  0x36   : > { %824 = sbr.rel (%p821_p2) target bundleno = 7233 (0x1c41), region = 132  ;;  %s3482_s16 = smov (!%p821_p2), 120  }
  0x37   : > { %s3483_s18 = smov (!%p821_p2), 88   ;;  %s3484_s22 = smov (!%p821_p2), 112  }
  0x38   : > { %s3485_s23 = smov (!%p821_p2), 80   ;;  %s3486_s26 = smov (!%p821_p2), 104  }
  0x39   : > { %s3487_s28 = smov (!%p821_p2), 72   ;;  %s3488_s1 = smov (!%p821_p2), 64  }
  0x3a   : > { %s3489_s2 = smov (!%p821_p2), 56  }
  0x3b   : > { %v3385_v0 = vld [vmem:[%s3520_s21 + $0x8] sm:$0xff]   ;;  %v3479_v1 = vmov 0.0   ;;  %v3386_v2 = vld [vmem:[%s3520_s21] sm:$0xff]   ;;  %vm3480_vm0 = vmmov 0   ;;  %s3976_s10 = smov (!%p899_p3, %s2970_s10), 1  ;;  %vm940_vm1 = vcmask 261120  }
  0x3c   : > { %3131 = vmatprep.subr.bf16.mxu1 %v3479_v1  ;;  %3123 = vmatprep.subr.bf16.mxu0 %v3479_v1  ;;  %v3387_v3 = vld [vmem:[%s3510_s13 + $0x8] sm:$0xff]   ;;  %v3389_v4 = vld [vmem:[%s3510_s13] sm:$0xff]   ;;  %s3670_s0 = sshll.u32 %s3976_s10, 3  ;;  %vm1070_vm2 = vcmask 64512   ;;  %vm1118_vm3 = vcmask 130048   ;;  %vm1182_vm4 = vcmask 1043456  }
  0x3d   : > { %3132 = vmatpush3.bf16.msra.mxu1 %v3385_v0  ;;  %3135 = vmatprep.mubr.msk.bf16.mxu1 %vm3480_vm0, %v3479_v1  ;;  %v3667_v5 = vld [vmem:[%s3505_s9] sm:$0xff]  ;;  %s903_s11 = scalar_lea.vmem %s3500_s5, %s3670_s0  ;;  %s3490_s10 = smov 48   ;;  %vm2583_vm5 = vcmask 523264  }
  0x3e   : > { %3133 = vmatprep.subr.bf16.mxu1 %v3479_v1  ;;  %3127 = vmatprep.mubr.msk.bf16.mxu0 %vm3480_vm0, %v3479_v1  ;;  %v921_v6 = vpack.c.bf16 %v3667_v5, %v3667_v5  ;;  %v3388_v7 = vld [vmem:[%s903_s11] sm:$0xff]   ;;  %s3491_s11 = smov 40  }
  0x3f   : > { %3124 = vmatpush3.bf16.msra.mxu0 %v3387_v3  ;;  %v2983_v10 = vld [vmem:[%s3525_s25] ss:$0 sm:$0xff] }
  0x40   : > { %3125 = vmatprep.subr.bf16.mxu0 %v3479_v1  ;;  %v2979_v17 = vld [vmem:[%s3515_s17] ss:$0 sm:$0xff] }
  0x41   : > { %3134 = vmatpush3.bf16.msra.mxu1 %v3386_v2  ;;  %v1056_v43 = vld [vmem:[%s3530_s29] sm:$0xf] }
  0x42   : > { %3145 = vmatprep.subr.bf16.mxu1 %v3479_v1  ;;  %v1184_v44 = vsel %vm1182_vm4, %v1056_v43, 0 }
  0x43   : > { %3126 = vmatpush3.bf16.msra.mxu0 %v3389_v4 }
  0x44   : > { %3139 = vmatprep.subr.bf16.mxu0 %v3479_v1  ;;  %3136 = vmatmul.mubr.msk.bf16.vlgmr.msra.gmra.mxu1 %vm940_vm1, %v3388_v7 }
  0x45   : > { %3147 = vmatprep.mubr.msk.bf16.mxu1 %vm3480_vm0, %v3479_v1 }
  0x46   : > { %3128 = vmatmul.mubr.msk.bf16.vlgmr.msra.gmra.mxu0 %vm940_vm1, %v921_v6 }
  0x47   : > { %3141 = vmatprep.mubr.msk.bf16.mxu0 %vm3480_vm0, %v3479_v1 }
 0x104   : > { %v1049_v8 = vpop.f32.mrf.mxu1 }
 0x105   : > { %v1050_v14 = vadd.f32 %v2983_v10, %v1049_v8 }
 0x106   : > { %v978_v9 = vpop.f32.mrf.mxu0  ;;  %v3137_v11 = vpop.f32.mrf.mxu1 }
 0x107   : > { %v979_v21 = vadd.f32 %v2979_v17, %v978_v9  ;;  %v1057_v11 = vld [vmem:[%s3530_s29 + $0x4] sm:$0xf] }
 0x108   : > { %v3129_v12 = vpop.f32.mrf.mxu0  ;;  %v1052_v13 = vpop.f32.mrf.mxu1 }
 0x109   : > { %v1053_v15 = vadd.f32 %v2983_v10, %v1052_v13  ;;  %v3693_v23 = vpack.c.bf16 %v979_v21, %v979_v21  ;;  %v1342_v12 = vsel %vm1182_vm4, %v1057_v11, 0 }
 0x10a   : > { %v981_v16 = vpop.f32.mrf.mxu0  ;;  %v3138_v18 = vpop.f32.mrf.mxu1 }
 0x10b   : > { %v3686_v19 = vpack.c.bf16 %v1053_v15, %v1050_v14 }
 0x10c   : > { %v3130_v20 = vpop.f32.mrf.mxu0 }
 0x10d   : > { %1132 = vrot.lane.b32.xlu1 %v3686_v19, %s3481_s15  ;;  %v1075_v22 = vsel %vm1070_vm2, %v3686_v19, 0 }
 0x10e   : > { %3140 = vmatpush3.bf16.xpose.msra.mxu0 %v1075_v22 }
 0x10f   : > { %3151 = vmatprep.subr.bf16.mxu0 %v3479_v1 }
 0x111   : > { %1230 = vrot.lane.b32.xlu1 %v3686_v19, %s3482_s16 }
 0x115   : > { %3142 = vmatmul.mubr.msk.bf16.vlgmr.msra.gmra.mxu0 %vm1070_vm2, %v3693_v23 }
 0x116   : > { %3153 = vmatprep.mubr.msk.bf16.mxu0 %vm3480_vm0, %v3479_v1  ;;  %3152 = vmatpush3.bf16.msra.mxu0 %v1184_v44 }
 0x117   : > { %3163 = vmatprep.subr.bf16.mxu0 %v3479_v1 }
 0x17f   : > { %v1133_v24 = vpop.permute.xlu1 %1132 }
 0x180   : > { %3146 = vmatpush3.bf16.msra.mxu1 %v1133_v24 }
 0x181   : > { %3157 = vmatprep.subr.bf16.mxu1 %v3479_v1 }
 0x183   : > { %v1231_v39 = vpop.permute.xlu1 %1230 }
 0x184   : > { %v1236_v41 = vsel %vm1070_vm2, %v1231_v39, 0 }
 0x1d5   : > { %v1111_v25 = vpop.f32.mrf.mxu0 }
 0x1d6   : > { %v1117_v26 = vmul.f32 0.35355338, %v1111_v25 }
 0x1d7   : > { %v3143_v27 = vpop.f32.mrf.mxu0 }
 0x1d8   : > { %v1119_v28 = vsel %vm1118_vm3, %v1117_v26, -inf }
 0x1d9   : > { %1120 = vmax.xlane.f32.xlu0 %v1119_v28  ;;  %v1114_v29 = vpop.f32.mrf.mxu0 }
 0x1db   : > { %v3144_v30 = vpop.f32.mrf.mxu0 }
 0x262   : > { %v1121_v31 = vpop.xlane.xlu0 %1120 }
 0x263   : > { %v1122_v32 = vsub.f32 %v1117_v26, %v1121_v31 }
 0x265   : > { %v1123_v33 = vmul.f32 1.442695, %v1122_v32  ;;  %v2988_v32 = vld [vmem:[%s3535_s3] ss:$0 sm:$0xff] }
 0x267   : > { %3404 = vpow2.f32 %v1123_v33 }
 0x274   : > { %v3405_v34 = vpop.eup %3404 }
 0x275   : > { %v1125_v35 = vsel %vm1118_vm3, %v3405_v34, 0.0 }
 0x276   : > { %1126 = vadd.xlane.f32.xlu0 %v1125_v35 }
 0x28c   : > { %1228 = vrot.lane.b32.xlu0 %v3693_v23, %s3482_s16 }
 0x2ff   : > { %v1127_v36 = vpop.xlane.xlu0 %1126 }
 0x300   : > { %3406 = vrcp.f32 %v1127_v36 }
 0x303   : > { %v1229_v42 = vpop.permute.xlu0 %1228 }
 0x30d   : > { %v3407_v37 = vpop.eup %3406 }
 0x30e   : > { %v1129_v38 = vmul.f32 %v3407_v37, %v3405_v34 }
 0x310   : > { %v1130_v40 = vpack.c.bf16 %v1129_v38, %v1129_v38 }
 0x312   : > { %3148 = vmatmul.mubr.msk.bf16.vlgmr.msra.gmra.mxu1 %vm1118_vm3, %v1130_v40 }
 0x313   : > { %3158 = vmatpush3.bf16.xpose.msra.mxu1 %v1236_v41  ;;  %3159 = vmatprep.mubr.msk.bf16.mxu1 %vm3480_vm0, %v3479_v1 }
 0x314   : > { %3169 = vmatprep.subr.bf16.mxu1 %v3479_v1 }
 0x31a   : > { %3160 = vmatmul.mubr.msk.bf16.vlgmr.msra.gmra.mxu1 %vm1070_vm2, %v1229_v42 }
 0x31b   : > { %3171 = vmatprep.mubr.msk.bf16.mxu1 %vm3480_vm0, %v3479_v1  ;;  %3170 = vmatpush3.bf16.msra.mxu1 %v1342_v12 }
 0x31c   : > { %3181 = vmatprep.subr.bf16.mxu1 %v3479_v1 }
 0x3d2   : > { %v1172_v45 = vpop.f32.mrf.mxu1 }
 0x3d3   : > { %v1178_v46 = vpack.c.bf16 %v1172_v45, %v1172_v45  ;;  %v1058_v45 = vld [vmem:[%s3530_s29 + $0x8] sm:$0xf] }
 0x3d4   : > { %v3149_v47 = vpop.f32.mrf.mxu1 }
 0x3d5   : > { %3154 = vmatmul.mubr.msk.bf16.vlgmr.msra.gmra.mxu0 %vm1070_vm2, %v1178_v46  ;;  %v1499_v46 = vsel %vm1182_vm4, %v1058_v45, 0 }
 0x3d6   : > { %v1175_v48 = vpop.f32.mrf.mxu1  ;;  %3165 = vmatprep.mubr.msk.bf16.mxu0 %vm3480_vm0, %v3479_v1 }
 0x3d8   : > { %v3150_v49 = vpop.f32.mrf.mxu1 }
 0x3da   : > { %v1272_v50 = vpop.f32.mrf.mxu1 }
 0x3db   : > { %v1278_v51 = vmul.f32 0.35355338, %v1272_v50 }
 0x3dc   : > { %v3161_v52 = vpop.f32.mrf.mxu1 }
 0x3dd   : > { %v1279_v53 = vsel %vm1118_vm3, %v1278_v51, -inf }
 0x3de   : > { %1280 = vmax.xlane.f32.xlu1 %v1279_v53  ;;  %v1275_v54 = vpop.f32.mrf.mxu1 }
 0x3e0   : > { %v3162_v55 = vpop.f32.mrf.mxu1 }
 0x3ef   : > { %1291 = vrot.lane.b32.xlu1 %v3686_v19, %s3483_s18 }
 0x3f3   : > { %1385 = vrot.lane.b32.xlu1 %v3693_v23, %s3484_s22 }
 0x467   : > { %v1281_v56 = vpop.xlane.xlu1 %1280 }
 0x468   : > { %v1282_v57 = vsub.f32 %v1278_v51, %v1281_v56 }
 0x46a   : > { %v1283_v58 = vmul.f32 1.442695, %v1282_v57 }
 0x46b   : > { %v1292_v59 = vpop.permute.xlu1 %1291 }
 0x46c   : > { %3408 = vpow2.f32 %v1283_v58  ;;  %3164 = vmatpush3.bf16.msra.mxu0 %v1292_v59 }
 0x46d   : > { %3175 = vmatprep.subr.bf16.mxu0 %v3479_v1 }
 0x46f   : > { %v1386_v10 = vpop.permute.xlu1 %1385 }
 0x479   : > { %v3409_v60 = vpop.eup %3408 }
 0x47a   : > { %v1285_v61 = vsel %vm1118_vm3, %v3409_v60, 0.0 }
 0x47b   : > { %1286 = vadd.xlane.f32.xlu0 %v1285_v61 }
 0x491   : > { %1387 = vrot.lane.b32.xlu0 %v3686_v19, %s3484_s22 }
 0x495   : > { %v1220_v62 = vpop.f32.mrf.mxu0 }
 0x496   : > { %v1226_v33 = vadd.f32 %v2988_v32, %v1220_v62  ;;  %v3391_v32 = vld [vmem:[%s3550_s19] sm:$0xff]  }
 0x497   : > { %v3155_v63 = vpop.f32.mrf.mxu0 }
 0x499   : > { %v1223_v0 = vpop.f32.mrf.mxu0 }
 0x49b   : > { %v3156_v2 = vpop.f32.mrf.mxu0 }
 0x504   : > { %v1287_v3 = vpop.xlane.xlu0 %1286 }
 0x505   : > { %3410 = vrcp.f32 %v1287_v3 }
 0x508   : > { %v1388_v7 = vpop.permute.xlu0 %1387 }
 0x509   : > { %v1393_v9 = vsel %vm1070_vm2, %v1388_v7, 0 }
 0x512   : > { %v3411_v4 = vpop.eup %3410 }
 0x513   : > { %v1289_v6 = vmul.f32 %v3411_v4, %v3409_v60  ;;  %v1059_v4 = vld [vmem:[%s3530_s29 + $0xc] sm:$0xf] }
 0x515   : > { %v1290_v8 = vpack.c.bf16 %v1289_v6, %v1289_v6  ;;  %v1656_v6 = vsel %vm1182_vm4, %v1059_v4, 0 }
 0x517   : > { %3166 = vmatmul.mubr.msk.bf16.vlgmr.msra.gmra.mxu0 %vm1118_vm3, %v1290_v8 }
 0x518   : > { %3176 = vmatpush3.bf16.xpose.msra.mxu0 %v1393_v9  ;;  %3177 = vmatprep.mubr.msk.bf16.mxu0 %vm3480_vm0, %v3479_v1 }
 0x519   : > { %3187 = vmatprep.subr.bf16.mxu0 %v3479_v1 }
 0x51f   : > { %3178 = vmatmul.mubr.msk.bf16.vlgmr.msra.gmra.mxu0 %vm1070_vm2, %v1386_v10 }
 0x520   : > { %3189 = vmatprep.mubr.msk.bf16.mxu0 %vm3480_vm0, %v3479_v1  ;;  %3188 = vmatpush3.bf16.msra.mxu0 %v1499_v46 }
 0x521   : > { %3199 = vmatprep.subr.bf16.mxu0 %v3479_v1 }
 0x5d7   : > { %v1331_v13 = vpop.f32.mrf.mxu0 }
 0x5d8   : > { %v1337_v14 = vpack.c.bf16 %v1331_v13, %v1331_v13 }
 0x5d9   : > { %v3167_v15 = vpop.f32.mrf.mxu0 }
 0x5da   : > { %3172 = vmatmul.mubr.msk.bf16.vlgmr.msra.gmra.mxu1 %vm1070_vm2, %v1337_v14 }
 0x5db   : > { %v1334_v16 = vpop.f32.mrf.mxu0  ;;  %3183 = vmatprep.mubr.msk.bf16.mxu1 %vm3480_vm0, %v3479_v1 }
 0x5dd   : > { %v3168_v17 = vpop.f32.mrf.mxu0 }
 0x5df   : > { %v1429_v18 = vpop.f32.mrf.mxu0 }
 0x5e0   : > { %v1435_v20 = vmul.f32 0.35355338, %v1429_v18 }
 0x5e1   : > { %v3179_v21 = vpop.f32.mrf.mxu0 }
 0x5e2   : > { %v1436_v22 = vsel %vm1118_vm3, %v1435_v20, -inf }
 0x5e3   : > { %1437 = vmax.xlane.f32.xlu1 %v1436_v22  ;;  %v1432_v24 = vpop.f32.mrf.mxu0 }
 0x5e5   : > { %v3180_v25 = vpop.f32.mrf.mxu0 }
 0x5f4   : > { %1448 = vrot.lane.b32.xlu1 %v3686_v19, %s3485_s23 }
 0x5f8   : > { %1542 = vrot.lane.b32.xlu1 %v3693_v23, %s3486_s26 }
 0x66c   : > { %v1438_v26 = vpop.xlane.xlu1 %1437 }
 0x66d   : > { %v1439_v27 = vsub.f32 %v1435_v20, %v1438_v26 }
 0x66f   : > { %v1440_v28 = vmul.f32 1.442695, %v1439_v27 }
 0x670   : > { %v1449_v29 = vpop.permute.xlu1 %1448 }
 0x671   : > { %3412 = vpow2.f32 %v1440_v28  ;;  %3182 = vmatpush3.bf16.msra.mxu1 %v1449_v29 }
 0x672   : > { %3193 = vmatprep.subr.bf16.mxu1 %v3479_v1 }
 0x674   : > { %v1543_v44 = vpop.permute.xlu1 %1542 }
 0x67e   : > { %v3413_v30 = vpop.eup %3412 }
 0x67f   : > { %v1442_v31 = vsel %vm1118_vm3, %v3413_v30, 0.0 }
 0x680   : > { %1443 = vadd.xlane.f32.xlu0 %v1442_v31  ;;  %v3390_v31 = vld [vmem:[%s3550_s19 + $0x8] sm:$0xff]  }
 0x696   : > { %1544 = vrot.lane.b32.xlu0 %v3686_v19, %s3486_s26 }
 0x69a   : > { %v1378_v34 = vpop.f32.mrf.mxu1 }
 0x69b   : > { %v1384_v35 = vadd.f32 %v1378_v34, %v1226_v33 }
 0x69c   : > { %v3173_v23 = vpop.f32.mrf.mxu1 }
 0x69d   : > { %v3001_v23 = vld [vmem:[%s3540_s8] ss:$0 sm:$0xff] }
 0x69e   : > { %v1381_v36 = vpop.f32.mrf.mxu1 }
 0x6a0   : > { %v3174_v37 = vpop.f32.mrf.mxu1 }
 0x6a1   : > { %v3002_v37 = vld [vmem:[%s3545_s14] ss:$0 sm:$0xff] }
 0x709   : > { %v1444_v38 = vpop.xlane.xlu0 %1443 }
 0x70a   : > { %3414 = vrcp.f32 %v1444_v38 }
 0x70d   : > { %v1545_v41 = vpop.permute.xlu0 %1544 }
 0x70e   : > { %v1550_v43 = vsel %vm1070_vm2, %v1545_v41, 0  ;;  %v3003_v41 = vld [vmem:[%s3555_s24] ss:$0 sm:$0xff] }
 0x717   : > { %v3415_v39 = vpop.eup %3414 }
 0x718   : > { %v1446_v40 = vmul.f32 %v3415_v39, %v3413_v30 }
 0x71a   : > { %v1447_v42 = vpack.c.bf16 %v1446_v40, %v1446_v40 }
 0x71c   : > { %3184 = vmatmul.mubr.msk.bf16.vlgmr.msra.gmra.mxu1 %vm1118_vm3, %v1447_v42 }
 0x71d   : > { %3194 = vmatpush3.bf16.xpose.msra.mxu1 %v1550_v43  ;;  %3195 = vmatprep.mubr.msk.bf16.mxu1 %vm3480_vm0, %v3479_v1 }
 0x71e   : > { %3205 = vmatprep.subr.bf16.mxu1 %v3479_v1 }
 0x724   : > { %3196 = vmatmul.mubr.msk.bf16.vlgmr.msra.gmra.mxu1 %vm1070_vm2, %v1543_v44 }
 0x725   : > { %3207 = vmatprep.mubr.msk.bf16.mxu1 %vm3480_vm0, %v3479_v1  ;;  %3206 = vmatpush3.bf16.msra.mxu1 %v1656_v6 }
 0x726   : > { %3219 = vmatprep.subr.bf16.mxu1 %v3479_v1 }
 0x7dc   : > { %v1488_v47 = vpop.f32.mrf.mxu1 }
 0x7dd   : > { %v1494_v48 = vpack.c.bf16 %v1488_v47, %v1488_v47 }
 0x7de   : > { %v3185_v49 = vpop.f32.mrf.mxu1 }
 0x7df   : > { %3190 = vmatmul.mubr.msk.bf16.vlgmr.msra.gmra.mxu0 %vm1070_vm2, %v1494_v48 }
 0x7e0   : > { %v1491_v50 = vpop.f32.mrf.mxu1  ;;  %3201 = vmatprep.mubr.msk.bf16.mxu0 %vm3480_vm0, %v3479_v1 }
 0x7e2   : > { %v3186_v51 = vpop.f32.mrf.mxu1 }
 0x7e4   : > { %v1586_v52 = vpop.f32.mrf.mxu1 }
 0x7e5   : > { %v1592_v53 = vmul.f32 0.35355338, %v1586_v52 }
 0x7e6   : > { %v3197_v54 = vpop.f32.mrf.mxu1 }
 0x7e7   : > { %v1593_v55 = vsel %vm1118_vm3, %v1592_v53, -inf }
 0x7e8   : > { %1594 = vmax.xlane.f32.xlu1 %v1593_v55  ;;  %v1589_v56 = vpop.f32.mrf.mxu1 }
 0x7ea   : > { %v3198_v57 = vpop.f32.mrf.mxu1 }
 0x7f9   : > { %1605 = vrot.lane.b32.xlu1 %v3686_v19, %s3487_s28 }
 0x871   : > { %v1595_v58 = vpop.xlane.xlu1 %1594 }
 0x872   : > { %v1596_v59 = vsub.f32 %v1592_v53, %v1595_v58 }
 0x874   : > { %v1597_v60 = vmul.f32 1.442695, %v1596_v59 }
 0x875   : > { %v1606_v61 = vpop.permute.xlu1 %1605 }
 0x876   : > { %3416 = vpow2.f32 %v1597_v60  ;;  %3200 = vmatpush3.bf16.msra.mxu0 %v1606_v61 }
 0x877   : > { %3211 = vmatprep.subr.bf16.mxu0 %v3479_v1 }
 0x883   : > { %v3417_v62 = vpop.eup %3416 }
 0x884   : > { %v1599_v63 = vsel %vm1118_vm3, %v3417_v62, 0.0 }
 0x885   : > { %1600 = vadd.xlane.f32.xlu0 %v1599_v63 }
 0x89f   : > { %v1535_v0 = vpop.f32.mrf.mxu0 }
 0x8a0   : > { %v1541_v2 = vadd.f32 %v1535_v0, %v1384_v35 }
 0x8a1   : > { %v3191_v3 = vpop.f32.mrf.mxu0 }
 0x8a3   : > { %v1538_v7 = vpop.f32.mrf.mxu0 }
 0x8a5   : > { %v3192_v19 = vpop.f32.mrf.mxu0 }
 0x8a6   : > { %v1797_v19 = vld [vmem:[%s3560_s30] sm:$0xf] }
 0x90e   : > { %v1601_v8 = vpop.xlane.xlu0 %1600 }
 0x90f   : > { %3418 = vrcp.f32 %v1601_v8  ;;  %v1925_v8 = vsel %vm1182_vm4, %v1797_v19, 0 }
 0x91c   : > { %v3419_v9 = vpop.eup %3418 }
 0x91d   : > { %v1603_v10 = vmul.f32 %v3419_v9, %v3417_v62 }
 0x91f   : > { %v1604_v11 = vpack.c.bf16 %v1603_v10, %v1603_v10 }
 0x921   : > { %3202 = vmatmul.mubr.msk.bf16.vlgmr.msra.gmra.mxu0 %vm1118_vm3, %v1604_v11 }
 0x922   : > { %3215 = vmatprep.mubr.msk.bf16.mxu0 %vm3480_vm0, %v3479_v1  ;;  %3212 = vmatpush3.bf16.msra.mxu0 %v3390_v31 }
 0x923   : > { %3213 = vmatprep.subr.bf16.mxu0 %v3479_v1 }
 0x926   : > { %3214 = vmatpush3.bf16.msra.mxu0 %v3391_v32 }
 0x927   : > { %3225 = vmatprep.subr.bf16.mxu0 %v3479_v1 }
 0x9e1   : > { %v1645_v12 = vpop.f32.mrf.mxu0 }
 0x9e2   : > { %v1651_v13 = vpack.c.bf16 %v1645_v12, %v1645_v12 }
 0x9e3   : > { %v3203_v14 = vpop.f32.mrf.mxu0 }
 0x9e4   : > { %3208 = vmatmul.mubr.msk.bf16.vlgmr.msra.gmra.mxu1 %vm1070_vm2, %v1651_v13 }
 0x9e5   : > { %v1648_v15 = vpop.f32.mrf.mxu0  ;;  %3221 = vmatprep.mubr.msk.bf16.mxu1 %vm3480_vm0, %v3479_v1 }
 0x9e7   : > { %v3204_v16 = vpop.f32.mrf.mxu0 }
 0xaa4   : > { %v1692_v17 = vpop.f32.mrf.mxu1 }
 0xaa5   : > { %v1698_v18 = vadd.f32 %v1692_v17, %v1541_v2 }
 0xaa6   : > { %v3209_v20 = vpop.f32.mrf.mxu1 }
 0xaa7   : > { %v1699_v21 = vadd.f32 %v1698_v18, %v3667_v5 }
 0xaa8   : > { %v1695_v22 = vpop.f32.mrf.mxu1 }
 0xaa9   : > { %v1702_v24 = vsel %vm940_vm1, %v1699_v21, 0.0 }
 0xaaa   : > { %1703 = vadd.xlane.f32.xlu0 %v1702_v24  ;;  %v3210_v25 = vpop.f32.mrf.mxu1 }
 0xb33   : > { %v1704_v26 = vpop.xlane.xlu0 %1703 }
 0xb34   : > { %v1706_v27 = vmul.f32 0.03125, %v1704_v26 }
 0xb36   : > { %v1707_v28 = vsub.f32 %v1699_v21, %v1706_v27 }
 0xb38   : > { %v1708_v29 = vmul.f32 %v1707_v28, %v1707_v28 }
 0xb3a   : > { %v1709_v30 = vsel %vm940_vm1, %v1708_v29, 0.0 }
 0xb3b   : > { %1710 = vadd.xlane.f32.xlu0 %v1709_v30 }
 0xbc4   : > { %v1711_v5 = vpop.xlane.xlu0 %1710 }
 0xbc5   : > { %v1712_v33 = vmul.f32 0.03125, %v1711_v5 }
 0xbc7   : > { %v1713_v34 = vadd.f32 1e-05, %v1712_v33 }
 0xbc9   : > { %3420 = vrsqrt.f32 %v1713_v34 }
 0xbd6   : > { %v3421_v35 = vpop.eup %3420 }
 0xbd7   : > { %v1715_v36 = vmul.f32 %v3421_v35, %v1707_v28 }
 0xbd9   : > { %v1722_v38 = vmul.f32 %v3001_v23, %v1715_v36 }
 0xbdb   : > { %v3790_v39 = vadd.f32 %v3002_v37, %v1722_v38  ;;  %v1798_v38 = vld [vmem:[%s3560_s30 + $0x4] sm:$0xf] }
 0xbdd   : > { %v1735_v40 = vpack.c.bf16 %v3790_v39, %v3790_v39 }
 0xbdf   : > { %3216 = vmatmul.mubr.msk.bf16.vlgmr.msra.gmra.mxu0 %vm940_vm1, %v1735_v40  ;;  %v2084_v40 = vsel %vm1182_vm4, %v1798_v38, 0 }
 0xbe0   : > { %3227 = vmatprep.mubr.msk.bf16.mxu0 %vm3480_vm0, %v3479_v1 }
 0xc9f   : > { %v1791_v42 = vpop.f32.mrf.mxu0 }
 0xca0   : > { %v1792_v43 = vadd.f32 %v3003_v41, %v1791_v42 }
 0xca1   : > { %v3217_v44 = vpop.f32.mrf.mxu0 }
 0xca2   : > { %v3798_v45 = vpack.c.bf16 %v1792_v43, %v1792_v43 }
 0xca3   : > { %v1794_v46 = vpop.f32.mrf.mxu0 }
 0xca4   : > { %1811 = vrot.lane.b32.xlu0 %v3798_v45, %s3481_s15  ;;  %s3963_s15 = sld [smem:[#allocation4_spill]] }
 0xca5   : > { %v3218_v47 = vpop.f32.mrf.mxu0 }
 0xd16   : > { %v1812_v48 = vpop.permute.xlu0 %1811 }
 0xd17   : > { %v1817_v49 = vsel %vm1070_vm2, %v1812_v48, 0 }
 0xd18   : > { %3220 = vmatpush3.bf16.xpose.msra.mxu1 %v1817_v49 }
 0xd19   : > { %3231 = vmatprep.subr.bf16.mxu1 %v3479_v1 }
 0xd1f   : > { %3222 = vmatmul.mubr.msk.bf16.vlgmr.msra.gmra.mxu1 %vm1070_vm2, %v3798_v45 }
 0xd20   : > { %3233 = vmatprep.mubr.msk.bf16.mxu1 %vm3480_vm0, %v3479_v1  ;;  %3232 = vmatpush3.bf16.msra.mxu1 %v1925_v8 }
 0xd21   : > { %3243 = vmatprep.subr.bf16.mxu1 %v3479_v1 }
 0xddf   : > { %v1853_v50 = vpop.f32.mrf.mxu1 }
 0xde0   : > { %v1859_v51 = vmul.f32 0.35355338, %v1853_v50 }
 0xde1   : > { %v3223_v52 = vpop.f32.mrf.mxu1 }
 0xde2   : > { %v1860_v53 = vsel %vm1070_vm2, %v1859_v51, -inf }
 0xde3   : > { %1861 = vmax.xlane.f32.xlu1 %v1860_v53  ;;  %v1856_v54 = vpop.f32.mrf.mxu1 }
 0xde5   : > { %v3224_v55 = vpop.f32.mrf.mxu1 }
 0xdf4   : > { %1872 = vrot.lane.b32.xlu1 %v3798_v45, %s3488_s1  ;;  %s3970_s1 = sld [smem:[#allocation8_spill]] }
 0xdf8   : > { %1968 = vrot.lane.b32.xlu1 %v3798_v45, %s3482_s16  ;;  %s3964_s16 = sld [smem:[#allocation6_spill]] }
 0xe6c   : > { %v1862_v56 = vpop.xlane.xlu1 %1861 }
 0xe6d   : > { %v1863_v57 = vsub.f32 %v1859_v51, %v1862_v56 }
 0xe6f   : > { %v1864_v58 = vmul.f32 1.442695, %v1863_v57 }
 0xe70   : > { %v1873_v59 = vpop.permute.xlu1 %1872 }
 0xe71   : > { %3422 = vpow2.f32 %v1864_v58  ;;  %v1878_v60 = vsel %vm1182_vm4, %v1873_v59, 0 }
 0xe72   : > { %3226 = vmatpush3.bf16.msra.mxu0 %v1878_v60  ;;  %v3007_v60 = vld [vmem:[%s3565_s6] ss:$0 sm:$0xff] }
 0xe73   : > { %3237 = vmatprep.subr.bf16.mxu0 %v3479_v1 }
 0xe74   : > { %v1969_v7 = vpop.permute.xlu1 %1968 }
 0xe7e   : > { %v3423_v61 = vpop.eup %3422 }
 0xe7f   : > { %v1866_v62 = vsel %vm1070_vm2, %v3423_v61, 0.0 }
 0xe80   : > { %1867 = vadd.xlane.f32.xlu0 %v1866_v62 }
 0xe96   : > { %1970 = vrot.lane.b32.xlu0 %v3798_v45, %s3483_s18  ;;  %s3965_s18 = sld [smem:[#allocation2_spill]] }
 0xf09   : > { %v1868_v63 = vpop.xlane.xlu0 %1867 }
 0xf0a   : > { %3424 = vrcp.f32 %v1868_v63 }
 0xf0d   : > { %v1971_v3 = vpop.permute.xlu0 %1970 }
 0xf0e   : > { %v1976_v6 = vsel %vm1070_vm2, %v1971_v3, 0 }
 0xf17   : > { %v3425_v0 = vpop.eup %3424 }
 0xf18   : > { %v1870_v2 = vmul.f32 %v3425_v0, %v3423_v61 }
 0xf1a   : > { %v1871_v4 = vpack.c.bf16 %v1870_v2, %v1870_v2 }
 0xf1c   : > { %3228 = vmatmul.mubr.msk.bf16.vlgmr.msra.gmra.mxu0 %vm1070_vm2, %v1871_v4 }
 0xf1d   : > { %3238 = vmatpush3.bf16.xpose.msra.mxu0 %v1976_v6  ;;  %3239 = vmatprep.mubr.msk.bf16.mxu0 %vm3480_vm0, %v3479_v1 }
 0xf1e   : > { %3249 = vmatprep.subr.bf16.mxu0 %v3479_v1 }
 0xf24   : > { %3240 = vmatmul.mubr.msk.bf16.vlgmr.msra.gmra.mxu0 %vm1070_vm2, %v1969_v7 }
 0xf25   : > { %3251 = vmatprep.mubr.msk.bf16.mxu0 %vm3480_vm0, %v3479_v1  ;;  %3250 = vmatpush3.bf16.msra.mxu0 %v2084_v40 }
 0xf26   : > { %3261 = vmatprep.subr.bf16.mxu0 %v3479_v1 }
 0xfdc   : > { %v1914_v9 = vpop.f32.mrf.mxu0 }
 0xfdd   : > { %v1920_v10 = vpack.c.bf16 %v1914_v9, %v1914_v9 }
 0xfde   : > { %v3229_v11 = vpop.f32.mrf.mxu0 }
 0xfdf   : > { %3234 = vmatmul.mubr.msk.bf16.vlgmr.msra.gmra.mxu1 %vm1070_vm2, %v1920_v10  ;;  %v1799_v11 = vld [vmem:[%s3560_s30 + $0x8] sm:$0xf] }
 0xfe0   : > { %v1917_v12 = vpop.f32.mrf.mxu0  ;;  %3245 = vmatprep.mubr.msk.bf16.mxu1 %vm3480_vm0, %v3479_v1 }
 0xfe1   : > { %v2243_v12 = vsel %vm1182_vm4, %v1799_v11, 0  ;;  %v3397_v11 = vld [vmem:[%s3964_s16] sm:$0xff]  }
 0xfe2   : > { %v3230_v13 = vpop.f32.mrf.mxu0 }
 0xfe4   : > { %v2012_v14 = vpop.f32.mrf.mxu0 }
 0xfe5   : > { %v2018_v15 = vmul.f32 0.35355338, %v2012_v14 }
 0xfe6   : > { %v3241_v16 = vpop.f32.mrf.mxu0 }
 0xfe7   : > { %v2019_v17 = vsel %vm1070_vm2, %v2018_v15, -inf }
 0xfe8   : > { %2020 = vmax.xlane.f32.xlu1 %v2019_v17  ;;  %v2015_v18 = vpop.f32.mrf.mxu0 }
 0xfea   : > { %v3242_v20 = vpop.f32.mrf.mxu0 }
 0xff9   : > { %2031 = vrot.lane.b32.xlu1 %v3798_v45, %s3489_s2  ;;  %s3971_s2 = sld [smem:[#allocation9_spill]] }
 0xffd   : > { %2127 = vrot.lane.b32.xlu1 %v3798_v45, %s3484_s22  ;;  %s3966_s22 = sld [smem:[#allocation3_spill]] }
0x1071   : > { %v2021_v21 = vpop.xlane.xlu1 %2020 }
0x1072   : > { %v2022_v22 = vsub.f32 %v2018_v15, %v2021_v21 }
0x1074   : > { %v2023_v24 = vmul.f32 1.442695, %v2022_v22 }
0x1075   : > { %v2032_v25 = vpop.permute.xlu1 %2031 }
0x1076   : > { %3426 = vpow2.f32 %v2023_v24  ;;  %v2037_v26 = vsel %vm1182_vm4, %v2032_v25, 0 }
0x1077   : > { %3244 = vmatpush3.bf16.msra.mxu1 %v2037_v26 }
0x1078   : > { %3255 = vmatprep.subr.bf16.mxu1 %v3479_v1 }
0x1079   : > { %v2128_v37 = vpop.permute.xlu1 %2127 }
0x1083   : > { %v3427_v27 = vpop.eup %3426 }
0x1084   : > { %v2025_v28 = vsel %vm1070_vm2, %v3427_v27, 0.0 }
0x1085   : > { %2026 = vadd.xlane.f32.xlu0 %v2025_v28 }
0x109b   : > { %2129 = vrot.lane.b32.xlu0 %v3798_v45, %s3485_s23  ;;  %s3967_s23 = sld [smem:[#allocation5_spill]] }
0x109f   : > { %v1961_v29 = vpop.f32.mrf.mxu1 }
0x10a0   : > { %v1967_v61 = vadd.f32 %v3007_v60, %v1961_v29  ;;  %v3392_v60 = vld [vmem:[%s3963_s15 + $0x8] sm:$0xff]  }
0x10a1   : > { %v3235_v30 = vpop.f32.mrf.mxu1 }
0x10a3   : > { %v1964_v31 = vpop.f32.mrf.mxu1 }
0x10a5   : > { %v3236_v32 = vpop.f32.mrf.mxu1 }
0x110e   : > { %v2027_v5 = vpop.xlane.xlu0 %2026 }
0x110f   : > { %3428 = vrcp.f32 %v2027_v5 }
0x1112   : > { %v2130_v35 = vpop.permute.xlu0 %2129 }
0x1113   : > { %v2135_v36 = vsel %vm1070_vm2, %v2130_v35, 0  ;;  %v1800_v35 = vld [vmem:[%s3560_s30 + $0xc] sm:$0xf] }
0x111c   : > { %v3429_v33 = vpop.eup %3428 }
0x111d   : > { %v2029_v34 = vmul.f32 %v3429_v33, %v3427_v27 }
0x111f   : > { %v2030_v23 = vpack.c.bf16 %v2029_v34, %v2029_v34 }
0x1121   : > { %3246 = vmatmul.mubr.msk.bf16.vlgmr.msra.gmra.mxu1 %vm1070_vm2, %v2030_v23 }
0x1122   : > { %3256 = vmatpush3.bf16.xpose.msra.mxu1 %v2135_v36  ;;  %3257 = vmatprep.mubr.msk.bf16.mxu1 %vm3480_vm0, %v3479_v1 }
0x1123   : > { %3267 = vmatprep.subr.bf16.mxu1 %v3479_v1 }
0x1129   : > { %3258 = vmatmul.mubr.msk.bf16.vlgmr.msra.gmra.mxu1 %vm1070_vm2, %v2128_v37 }
0x112a   : > { %3269 = vmatprep.mubr.msk.bf16.mxu1 %vm3480_vm0, %v3479_v1  ;;  %3268 = vmatpush3.bf16.msra.mxu1 %v2243_v12  ;;  %v3022_v12 = vld [vmem:[%s3967_s23] ss:$0 sm:$0xff]  ;;  %s911_s23 = scalar_lea.vmem %s3645_s4, %s3670_s0 }
0x112b   : > { %3279 = vmatprep.subr.bf16.mxu1 %v3479_v1 }
0x11e1   : > { %v2073_v41 = vpop.f32.mrf.mxu1 }
0x11e2   : > { %v2079_v42 = vpack.c.bf16 %v2073_v41, %v2073_v41 }
0x11e3   : > { %v3247_v43 = vpop.f32.mrf.mxu1 }
0x11e4   : > { %3252 = vmatmul.mubr.msk.bf16.vlgmr.msra.gmra.mxu0 %vm1070_vm2, %v2079_v42 }
0x11e5   : > { %v2076_v44 = vpop.f32.mrf.mxu1  ;;  %3263 = vmatprep.mubr.msk.bf16.mxu0 %vm3480_vm0, %v3479_v1 }
0x11e7   : > { %v3248_v46 = vpop.f32.mrf.mxu1 }
0x11e9   : > { %v2171_v47 = vpop.f32.mrf.mxu1 }
0x11ea   : > { %v2177_v48 = vmul.f32 0.35355338, %v2171_v47 }
0x11eb   : > { %v3259_v49 = vpop.f32.mrf.mxu1 }
0x11ec   : > { %v2178_v50 = vsel %vm1070_vm2, %v2177_v48, -inf }
0x11ed   : > { %2179 = vmax.xlane.f32.xlu1 %v2178_v50  ;;  %v2174_v51 = vpop.f32.mrf.mxu1 }
0x11ef   : > { %v3260_v52 = vpop.f32.mrf.mxu1 }
0x11fe   : > { %2190 = vrot.lane.b32.xlu1 %v3798_v45, %s3490_s10  ;;  %s3972_s10 = sld [smem:[#allocation12_spill]] }
0x1202   : > { %2286 = vrot.lane.b32.xlu1 %v3798_v45, %s3486_s26  ;;  %s3968_s26 = sld [smem:[#allocation7_spill]] }
0x1276   : > { %v2180_v53 = vpop.xlane.xlu1 %2179 }
0x1277   : > { %v2181_v54 = vsub.f32 %v2177_v48, %v2180_v53 }
0x1279   : > { %v2182_v55 = vmul.f32 1.442695, %v2181_v54 }
0x127a   : > { %v2191_v56 = vpop.permute.xlu1 %2190 }
0x127b   : > { %3430 = vpow2.f32 %v2182_v55  ;;  %v2196_v57 = vsel %vm1182_vm4, %v2191_v56, 0 }
0x127c   : > { %3262 = vmatpush3.bf16.msra.mxu0 %v2196_v57 }
0x127d   : > { %3273 = vmatprep.subr.bf16.mxu0 %v3479_v1 }
0x127e   : > { %v2287_v10 = vpop.permute.xlu1 %2286 }
0x1288   : > { %v3431_v58 = vpop.eup %3430 }
0x1289   : > { %v2184_v59 = vsel %vm1070_vm2, %v3431_v58, 0.0 }
0x128a   : > { %2185 = vadd.xlane.f32.xlu0 %v2184_v59 }
0x12a0   : > { %2288 = vrot.lane.b32.xlu0 %v3798_v45, %s3487_s28  ;;  %s3969_s28 = sld [smem:[#allocation10_spill]] }
0x12a4   : > { %v2120_v62 = vpop.f32.mrf.mxu0 }
0x12a5   : > { %v2126_v63 = vadd.f32 %v2120_v62, %v1967_v61  ;;  %v3393_v61 = vld [vmem:[%s3963_s15] sm:$0xff]   ;;  %v3395_v62 = vld [vmem:[%s3964_s16 + $0x10] sm:$0xff]  }
0x12a6   : > { %v3253_v0 = vpop.f32.mrf.mxu0 }
0x12a8   : > { %v2123_v2 = vpop.f32.mrf.mxu0 }
0x12aa   : > { %v3254_v3 = vpop.f32.mrf.mxu0 }
0x1313   : > { %v2186_v4 = vpop.xlane.xlu0 %2185 }
0x1314   : > { %3432 = vrcp.f32 %v2186_v4  ;;  %v3020_v4 = vld [vmem:[%s3965_s18] ss:$0 sm:$0xff]  ;;  %s3974_s18 = sld [smem:[#allocation13_spill]] }
0x1317   : > { %v2289_v19 = vpop.permute.xlu0 %2288 }
0x1318   : > { %v2294_v9 = vsel %vm1070_vm2, %v2289_v19, 0 }
0x1321   : > { %v3433_v6 = vpop.eup %3432 }
0x1322   : > { %v2188_v7 = vmul.f32 %v3433_v6, %v3431_v58 }
0x1324   : > { %v2189_v8 = vpack.c.bf16 %v2188_v7, %v2188_v7  ;;  %v3021_v7 = vld [vmem:[%s3966_s22] ss:$0 sm:$0xff]  ;;  %s907_s22 = scalar_lea.vmem %s3640_s27, %s3670_s0 }
0x1326   : > { %3264 = vmatmul.mubr.msk.bf16.vlgmr.msra.gmra.mxu0 %vm1070_vm2, %v2189_v8 }
0x1327   : > { %3274 = vmatpush3.bf16.xpose.msra.mxu0 %v2294_v9  ;;  %3275 = vmatprep.mubr.msk.bf16.mxu0 %vm3480_vm0, %v3479_v1 }
0x1328   : > { %3285 = vmatprep.subr.bf16.mxu0 %v3479_v1 }
0x132e   : > { %3276 = vmatmul.mubr.msk.bf16.vlgmr.msra.gmra.mxu0 %vm1070_vm2, %v2287_v10  ;;  %v3396_v10 = vld [vmem:[%s3964_s16 + $0x8] sm:$0xff]  }
0x132f   : > { %3287 = vmatprep.mubr.msk.bf16.mxu0 %vm3480_vm0, %v3479_v1 }
0x13e6   : > { %v2232_v13 = vpop.f32.mrf.mxu0 }
0x13e7   : > { %v2238_v14 = vpack.c.bf16 %v2232_v13, %v2232_v13 }
0x13e8   : > { %v3265_v15 = vpop.f32.mrf.mxu0 }
0x13e9   : > { %3270 = vmatmul.mubr.msk.bf16.vlgmr.msra.gmra.mxu1 %vm1070_vm2, %v2238_v14 }
0x13ea   : > { %v2235_v16 = vpop.f32.mrf.mxu0  ;;  %3281 = vmatprep.mubr.msk.bf16.mxu1 %vm3480_vm0, %v3479_v1 }
0x13ec   : > { %v3266_v17 = vpop.f32.mrf.mxu0 }
0x13ee   : > { %v2330_v18 = vpop.f32.mrf.mxu0 }
0x13ef   : > { %v2336_v20 = vmul.f32 0.35355338, %v2330_v18 }
0x13f0   : > { %v3277_v21 = vpop.f32.mrf.mxu0 }
0x13f1   : > { %v2337_v22 = vsel %vm1070_vm2, %v2336_v20, -inf  ;;  %v3026_v21 = vld [vmem:[%s3968_s26] ss:$0 sm:$0xff] }
0x13f2   : > { %2338 = vmax.xlane.f32.xlu1 %v2337_v22  ;;  %v2333_v24 = vpop.f32.mrf.mxu0 }
0x13f4   : > { %v3278_v25 = vpop.f32.mrf.mxu0 }
0x1403   : > { %2349 = vrot.lane.b32.xlu1 %v3798_v45, %s3491_s11  ;;  %v2402_v45 = vsel %vm1182_vm4, %v1800_v35, 0  ;;  %v3399_v35 = vld [vmem:[%s3969_s28] sm:$0xff]   ;;  %s3973_s11 = sld [smem:[#allocation11_spill]] }
0x1404   : > { %3286 = vmatpush3.bf16.msra.mxu0 %v2402_v45 }
0x1405   : > { %3299 = vmatprep.subr.bf16.mxu0 %v3479_v1 }
0x147b   : > { %v2339_v26 = vpop.xlane.xlu1 %2338 }
0x147c   : > { %v2340_v27 = vsub.f32 %v2336_v20, %v2339_v26 }
0x147e   : > { %v2341_v28 = vmul.f32 1.442695, %v2340_v27 }
0x147f   : > { %v2350_v29 = vpop.permute.xlu1 %2349 }
0x1480   : > { %3434 = vpow2.f32 %v2341_v28  ;;  %v2355_v30 = vsel %vm1182_vm4, %v2350_v29, 0 }
0x1481   : > { %3280 = vmatpush3.bf16.msra.mxu1 %v2355_v30 }
0x1482   : > { %3291 = vmatprep.subr.bf16.mxu1 %v3479_v1 }
0x148d   : > { %v3435_v31 = vpop.eup %3434 }
0x148e   : > { %v2343_v32 = vsel %vm1070_vm2, %v3435_v31, 0.0 }
0x148f   : > { %2344 = vadd.xlane.f32.xlu0 %v2343_v32 }
0x14a9   : > { %v2279_v5 = vpop.f32.mrf.mxu1 }
0x14aa   : > { %v2285_v33 = vadd.f32 %v2279_v5, %v2126_v63 }
0x14ab   : > { %v3271_v34 = vpop.f32.mrf.mxu1 }
0x14ac   : > { %v3398_v34 = vld [vmem:[%s3969_s28 + $0x8] sm:$0xff]  }
0x14ad   : > { %v2282_v23 = vpop.f32.mrf.mxu1 }
0x14af   : > { %v3272_v36 = vpop.f32.mrf.mxu1 }
0x1518   : > { %v2345_v37 = vpop.xlane.xlu0 %2344 }
0x1519   : > { %3436 = vrcp.f32 %v2345_v37 }
0x1526   : > { %v3437_v38 = vpop.eup %3436 }
0x1527   : > { %v2347_v40 = vmul.f32 %v3437_v38, %v3435_v31  ;;  %v3032_v38 = vld [vmem:[%s3970_s1] ss:$0 sm:$0xff] }
0x1529   : > { %v2348_v41 = vpack.c.bf16 %v2347_v40, %v2347_v40 }
0x152b   : > { %3282 = vmatmul.mubr.msk.bf16.vlgmr.msra.gmra.mxu1 %vm1070_vm2, %v2348_v41  ;;  %v3033_v41 = vld [vmem:[%s3971_s2] ss:$0 sm:$0xff] }
0x152c   : > { %3295 = vmatprep.mubr.msk.bf16.mxu1 %vm3480_vm0, %v3479_v1  ;;  %3292 = vmatpush3.bf16.msra.mxu1 %v3392_v60 }
0x152d   : > { %3293 = vmatprep.subr.bf16.mxu1 %v3479_v1 }
0x1530   : > { %3294 = vmatpush3.bf16.msra.mxu1 %v3393_v61 }
0x1531   : > { %3311 = vmatprep.subr.bf16.mxu1 %v3479_v1 }
0x15eb   : > { %v2391_v42 = vpop.f32.mrf.mxu1 }
0x15ec   : > { %v2397_v43 = vpack.c.bf16 %v2391_v42, %v2391_v42 }
0x15ed   : > { %v3283_v44 = vpop.f32.mrf.mxu1 }
0x15ee   : > { %3288 = vmatmul.mubr.msk.bf16.vlgmr.msra.gmra.mxu0 %vm1070_vm2, %v2397_v43  ;;  %v3400_v44 = vld [vmem:[%s3972_s10 + $0x8] sm:$0xff]  }
0x15ef   : > { %v2394_v46 = vpop.f32.mrf.mxu1  ;;  %3307 = vmatprep.mubr.msk.bf16.mxu0 %vm3480_vm0, %v3479_v1 }
0x15f1   : > { %v3284_v47 = vpop.f32.mrf.mxu1 }
0x15f2   : > { %v3401_v47 = vld [vmem:[%s3972_s10] sm:$0xff]  }
0x16ae   : > { %v2438_v48 = vpop.f32.mrf.mxu0 }
0x16af   : > { %v2444_v49 = vadd.f32 %v2438_v48, %v2285_v33  ;;  %v3402_v48 = vld [vmem:[%s3630_s12 + $0x8] sm:$0xff]  }
0x16b0   : > { %v3289_v50 = vpop.f32.mrf.mxu0 }
0x16b1   : > { %v2445_v51 = vadd.f32 %v2444_v49, %v3790_v39  ;;  %v3394_v39 = vld [vmem:[%s3964_s16 + $0x18] sm:$0xff]   ;;  %v3403_v49 = vld [vmem:[%s3630_s12] sm:$0xff]  }
0x16b2   : > { %v2441_v52 = vpop.f32.mrf.mxu0  ;;  %3300 = vmatpush3.bf16.msra.mxu0 %v3394_v39  ;;  %v3034_v50 = vld [vmem:[%s3973_s11] ss:$0 sm:$0xff] }
0x16b3   : > { %v2448_v53 = vsel %vm940_vm1, %v2445_v51, 0.0  ;;  %3301 = vmatprep.subr.bf16.mxu0 %v3479_v1 }
0x16b4   : > { %2449 = vadd.xlane.f32.xlu0 %v2448_v53  ;;  %v3290_v54 = vpop.f32.mrf.mxu0 }
0x16b6   : > { %3302 = vmatpush3.bf16.msra.mxu0 %v3395_v62  ;;  %v3042_v62 = vld [vmem:[%s3635_s20] ss:$0 sm:$0xff] }
0x16b7   : > { %3303 = vmatprep.subr.bf16.mxu0 %v3479_v1 }
0x16ba   : > { %3304 = vmatpush3.bf16.msra.mxu0 %v3396_v10 }
0x16bb   : > { %3305 = vmatprep.subr.bf16.mxu0 %v3479_v1 }
0x16be   : > { %3306 = vmatpush3.bf16.msra.mxu0 %v3397_v11 }
0x16bf   : > { %3327 = vmatprep.subr.bf16.mxu0 %v3479_v1 }
0x173d   : > { %v2450_v55 = vpop.xlane.xlu0 %2449 }
0x173e   : > { %v2451_v56 = vmul.f32 0.03125, %v2450_v55 }
0x1740   : > { %v2452_v57 = vsub.f32 %v2445_v51, %v2451_v56  ;;  %v3038_v56 = vld [vmem:[%s3974_s18] ss:$0 sm:$0xff] }
0x1742   : > { %v2453_v58 = vmul.f32 %v2452_v57, %v2452_v57 }
0x1744   : > { %v2454_v59 = vsel %vm940_vm1, %v2453_v58, 0.0 }
0x1745   : > { %2455 = vadd.xlane.f32.xlu0 %v2454_v59 }
0x17ce   : > { %v2456_v63 = vpop.xlane.xlu0 %2455 }
0x17cf   : > { %v2457_v0 = vmul.f32 0.03125, %v2456_v63 }
0x17d1   : > { %v2458_v2 = vadd.f32 1e-05, %v2457_v0 }
0x17d3   : > { %3438 = vrsqrt.f32 %v2458_v2 }
0x17e0   : > { %v3439_v3 = vpop.eup %3438 }
0x17e1   : > { %v2460_v6 = vmul.f32 %v3439_v3, %v2452_v57 }
0x17e3   : > { %v2467_v19 = vmul.f32 %v3020_v4, %v2460_v6 }
0x17e5   : > { %v2474_v8 = vadd.f32 %v3021_v7, %v2467_v19 }
0x17e7   : > { %v2480_v9 = vpack.c.bf16 %v2474_v8, %v2474_v8 }
0x17e9   : > { %3296 = vmatmul.mubr.msk.bf16.vlgmr.msra.gmra.mxu1 %vm940_vm1, %v2480_v9 }
0x17ea   : > { %3315 = vmatprep.mubr.msk.bf16.mxu1 %vm3480_vm0, %v3479_v1  ;;  %3312 = vmatpush3.bf16.msra.mxu1 %v3398_v34 }
0x17eb   : > { %3313 = vmatprep.subr.bf16.mxu1 %v3479_v1 }
0x17ee   : > { %3314 = vmatpush3.bf16.msra.mxu1 %v3399_v35 }
0x17ef   : > { %3319 = vmatprep.subr.bf16.mxu1 %v3479_v1 }
0x18a9   : > { %v2536_v13 = vpop.f32.mrf.mxu1 }
0x18aa   : > { %v2537_v14 = vadd.f32 %v3022_v12, %v2536_v13 }
0x18ab   : > { %v3297_v15 = vpop.f32.mrf.mxu1 }
0x18ac   : > { %v2542_v16 = vmax.f32 %v2537_v14, 0.0 }
0x18ad   : > { %v2539_v17 = vpop.f32.mrf.mxu1 }
0x18ae   : > { %v2552_v18 = vpack.c.bf16 %v2542_v16, %v2542_v16 }
0x18af   : > { %v3298_v20 = vpop.f32.mrf.mxu1 }
0x18b0   : > { %3308 = vmatmul.mubr.msk.bf16.vlgmr.msra.gmra.mxu0 %vm2583_vm5, %v2552_v18 }
0x18b1   : > { %3331 = vmatprep.mubr.msk.bf16.mxu0 %vm3480_vm0, %v3479_v1  ;;  %3328 = vmatpush3.bf16.msra.mxu0 %v3402_v48 }
0x18b2   : > { %3329 = vmatprep.subr.bf16.mxu0 %v3479_v1 }
0x18b5   : > { %3330 = vmatpush3.bf16.msra.mxu0 %v3403_v49 }
0x1970   : > { %v2621_v22 = vpop.f32.mrf.mxu0 }
0x1971   : > { %v2622_v24 = vadd.f32 %v3026_v21, %v2621_v22 }
0x1972   : > { %v3309_v25 = vpop.f32.mrf.mxu0 }
0x1973   : > { %v2627_v26 = vadd.f32 %v2622_v24, %v2474_v8 }
0x1974   : > { %v2624_v27 = vpop.f32.mrf.mxu0 }
0x1975   : > { %v2630_v28 = vsel %vm940_vm1, %v2627_v26, 0.0 }
0x1976   : > { %2631 = vadd.xlane.f32.xlu0 %v2630_v28  ;;  %v3310_v29 = vpop.f32.mrf.mxu0 }
0x19ff   : > { %v2632_v30 = vpop.xlane.xlu0 %2631 }
0x1a00   : > { %v2633_v31 = vmul.f32 0.03125, %v2632_v30 }
0x1a02   : > { %v2634_v32 = vsub.f32 %v2627_v26, %v2633_v31 }
0x1a04   : > { %v2635_v5 = vmul.f32 %v2634_v32, %v2634_v32 }
0x1a06   : > { %v2636_v33 = vsel %vm940_vm1, %v2635_v5, 0.0 }
0x1a07   : > { %2637 = vadd.xlane.f32.xlu0 %v2636_v33 }
0x1a90   : > { %v2638_v45 = vpop.xlane.xlu0 %2637 }
0x1a91   : > { %v2639_v23 = vmul.f32 0.03125, %v2638_v45 }
0x1a93   : > { %v2640_v36 = vadd.f32 1e-05, %v2639_v23 }
0x1a95   : > { %3440 = vrsqrt.f32 %v2640_v36 }
0x1aa2   : > { %v3441_v37 = vpop.eup %3440 }
0x1aa3   : > { %v2642_v40 = vmul.f32 %v3441_v37, %v2634_v32 }
0x1aa5   : > { %v2649_v42 = vmul.f32 %v3032_v38, %v2642_v40 }
0x1aa7   : > { %v2656_v43 = vadd.f32 %v3033_v41, %v2649_v42 }
0x1aa9   : > { %v2662_v46 = vpack.c.bf16 %v2656_v43, %v2656_v43 }
0x1aab   : > { %3316 = vmatmul.mubr.msk.bf16.vlgmr.msra.gmra.mxu1 %vm940_vm1, %v2662_v46 }
0x1aac   : > { %3320 = vmatpush3.bf16.msra.mxu1 %v3400_v44  ;;  %3323 = vmatprep.mubr.msk.bf16.mxu1 %vm3480_vm0, %v3479_v1 }
0x1aad   : > { %3321 = vmatprep.subr.bf16.mxu1 %v3479_v1 }
0x1ab0   : > { %3322 = vmatpush3.bf16.msra.mxu1 %v3401_v47 }
0x1ab3   : > { %3324 = vmatmul.mubr.msk.bf16.vlgmr.msra.gmra.mxu1 %vm940_vm1, %v2662_v46 }
0x1b6b   : > { %v2718_v51 = vpop.f32.mrf.mxu1 }
0x1b6c   : > { %v2719_v52 = vadd.f32 %v3034_v50, %v2718_v51 }
0x1b6d   : > { %v3317_v53 = vpop.f32.mrf.mxu1 }
0x1b6e   : > { %2724 = vst [vmem:[%s907_s22] sm:$0xff] %v2719_v52 }
0x1b6f   : > { %v2721_v54 = vpop.f32.mrf.mxu1 }
0x1b71   : > { %v3318_v55 = vpop.f32.mrf.mxu1 }
0x1b73   : > { %v2782_v57 = vpop.f32.mrf.mxu1 }
0x1b74   : > { %v2783_v58 = vadd.f32 %v3038_v56, %v2782_v57 }
0x1b75   : > { %v3325_v59 = vpop.f32.mrf.mxu1 }
0x1b76   : > { %v2788_v60 = vmax.f32 %v2783_v58, 0.0 }
0x1b77   : > { %v2785_v61 = vpop.f32.mrf.mxu1 }
0x1b78   : > { %v2794_v1 = vpack.c.bf16 %v2788_v60, %v2788_v60 }
0x1b79   : > { %v3326_v39 = vpop.f32.mrf.mxu1 }
0x1b7a   : > { %3332 = vmatmul.mubr.msk.bf16.vlgmr.msra.gmra.mxu0 %vm940_vm1, %v2794_v1 }
0x1c3a   : > { %v2850_v63 = vpop.f32.mrf.mxu0 }
0x1c3b   : > { %v2851_v0 = vadd.f32 %v3042_v62, %v2850_v63 }
0x1c3c   : > { %v3333_v2 = vpop.f32.mrf.mxu0 }
0x1c3d   : > { %2856 = vst.msk [vmem:[%s911_s23] sm:$0xff] %vm940_vm1, %v2851_v0 }
0x1c3e   : > { %v2853_v3 = vpop.f32.mrf.mxu0 }
0x1c40   : > { %v3334_v4 = vpop.f32.mrf.mxu0 }
0x1c41 PF: > { %s70_s7 = sadd.s32 1, %s3448_s7  }
0x1c42   : > { %p67_p4 = scmp.ge.s32.totalorder %s70_s7, 4  }
0x1c44   :  { %69 = sbr.rel (!%p67_p4) target bundleno = 49 (0x31), region = 203 }

</bundles_post_ra>
